<compile_context>
chip_gen: v5e
topology: v5e:2x2
jax: 0.10.0
libtpu: 0.0.40
codegen_flags: <defaults>
</compile_context>

<pallas_src>
import functools

import jax
import jax.numpy as jnp
from jax.experimental import pallas as pl
from jax.experimental.pallas import tpu as pltpu


# ----------------------------------------------------------------------------
# Fused kernel: all LSTM layers + Linear(H, 1) head in one call per batch block.
# Data layout inside the kernel: time-major (S, Bc, feat); gate order [i,f,g,o],
# each gate occupying a full Hp (=multiple of 128) lane block.
# ----------------------------------------------------------------------------
def _lstm_fused_kernel(num_layers, hidden_p, x_ref, *refs):
    L, H = num_layers, hidden_p
    layer_refs = refs[:3 * L]                                   # (wihT, whhT, b) per layer
    wlin_ref, blin_ref, out_ref, xg_sc, seq_sc = refs[3 * L:]

    S, Bc, _ = x_ref.shape
    f32 = jnp.float32

    def sigmoid(z):
        # One EUP tanh instead of exp + reciprocal on the serial critical path.
        return 0.5 * jnp.tanh(0.5 * z) + 0.5

    for l in range(L):
        wih_ref, whh_ref, b_ref = layer_refs[3 * l: 3 * l + 3]

        # ---- Hoisted input projection: one big MXU matmul for all timesteps,
        #      bias folded in once (outside the time loop). -----------------
        inp = x_ref[...] if l == 0 else seq_sc[...]             # (S, Bc, Din)
        d_in = inp.shape[-1]
        xg_sc[...] = (jnp.dot(inp.reshape(S * Bc, d_in), wih_ref[...],
                              preferred_element_type=f32)
                      + b_ref[...]).reshape(S, Bc, 4 * H)

        whh = whh_ref[...]                                      # (H, 4H) loop-invariant

        # ---- Time recurrence: one small matmul + full-vreg gate math. -----
        def step(t, carry, whh=whh):
            h, c = carry
            gates = xg_sc[t] + jnp.dot(h, whh, preferred_element_type=f32)
            i_g = sigmoid(gates[:, 0 * H:1 * H])
            f_g = sigmoid(gates[:, 1 * H:2 * H])
            g_g = jnp.tanh(gates[:, 2 * H:3 * H])
            o_g = sigmoid(gates[:, 3 * H:4 * H])
            c_new = f_g * c + i_g * g_g
            h_new = o_g * jnp.tanh(c_new)
            seq_sc[t] = h_new            # consumed by the next layer / the head
            return h_new, c_new

        h0 = jnp.zeros((Bc, H), f32)
        c0 = jnp.zeros((Bc, H), f32)
        jax.lax.fori_loop(0, S, step, (h0, c0), unroll=min(S, 8))

    # ---- Fused Linear(H, 1) head: single post-loop MXU matmul over the whole
    #      last-layer hidden sequence (no per-step reduce / select). ---------
    y = (jnp.dot(seq_sc[...].reshape(S * Bc, H), wlin_ref[...],
                 preferred_element_type=f32)
         + blin_ref[...])                                        # (S*Bc, 1)
    out_ref[...] = y.reshape(S, Bc, 1).astype(out_ref.dtype)


# ----------------------------------------------------------------------------
# One-time parameter preparation (outside the jitted forward):
# transpose weights, fuse biases, and pad hidden to a multiple of 128 lanes.
# Zero padding keeps padded hidden state exactly 0, so results are unchanged.
# ----------------------------------------------------------------------------
def prepare_params(params):
    H = params["w_lin"].shape[0]
    Hp = max(128, ((H + 127) // 128) * 128)
    layers = []
    for li, (w_ih, w_hh, b_ih, b_hh) in enumerate(params["lstm"]):
        d_in = w_ih.shape[1]
        d_in_p = d_in if li == 0 else Hp
        w_ih_t = w_ih.T.astype(jnp.float32)                     # (d_in, 4H)
        w_hh_t = w_hh.T.astype(jnp.float32)                     # (H, 4H)
        bias = (b_ih + b_hh).reshape(1, 4 * H).astype(jnp.float32)

        wihT = jnp.zeros((d_in_p, 4 * Hp), jnp.float32)
        whhT = jnp.zeros((Hp, 4 * Hp), jnp.float32)
        b = jnp.zeros((1, 4 * Hp), jnp.float32)
        for g in range(4):                                      # scatter gate blocks
            wihT = wihT.at[:d_in, g * Hp:g * Hp + H].set(w_ih_t[:, g * H:(g + 1) * H])
            whhT = whhT.at[:H, g * Hp:g * Hp + H].set(w_hh_t[:, g * H:(g + 1) * H])
            b = b.at[:, g * Hp:g * Hp + H].set(bias[:, g * H:(g + 1) * H])
        layers.append((wihT, whhT, b))

    w_lin = jnp.zeros((Hp, 1), jnp.float32).at[:H].set(params["w_lin"].astype(jnp.float32))
    b_lin = params["b_lin"].reshape(1, 1).astype(jnp.float32)
    return {"lstm": layers, "w_lin": w_lin, "b_lin": b_lin}


# ----------------------------------------------------------------------------
# Wrapper: layout plumbing only (pad batch, go time-major), then one
# pallas_call (grid over batch blocks) does all layers + the linear head.
# ----------------------------------------------------------------------------
@jax.jit
def lstm_model_forward(x, prep):
    """x: (batch, seq, input_size)  ->  (batch, seq, 1)"""
    B, S, D = x.shape
    Hp = prep["w_lin"].shape[0]
    L = len(prep["lstm"])

    # Batch padding + block policy: only split the batch once each block still
    # keeps >=128 rows streaming through the MXU per step (v7x 2-TC win,
    # ~free on single-TC v5e/v6e); otherwise a single block.
    Bp0 = ((B + 7) // 8) * 8
    num_blocks = 2 if Bp0 >= 256 else 1
    Bc = ((-(-Bp0 // num_blocks) + 7) // 8) * 8
    Bp = Bc * num_blocks

    xp = jnp.zeros((Bp, S, D), x.dtype).at[:B].set(x)
    x3 = jnp.transpose(xp, (1, 0, 2))                           # (S, Bp, D) time-major

    inputs = [x3]
    in_specs = [pl.BlockSpec((S, Bc, D), lambda b: (0, b, 0))]
    for (wihT, whhT, bias) in prep["lstm"]:
        d_in = wihT.shape[0]
        inputs += [wihT, whhT, bias]
        in_specs += [pl.BlockSpec((d_in, 4 * Hp), lambda b: (0, 0)),
                     pl.BlockSpec((Hp, 4 * Hp), lambda b: (0, 0)),
                     pl.BlockSpec((1, 4 * Hp), lambda b: (0, 0))]
    inputs += [prep["w_lin"], prep["b_lin"]]
    in_specs += [pl.BlockSpec((Hp, 1), lambda b: (0, 0)),
                 pl.BlockSpec((1, 1), lambda b: (0, 0))]

    out_specs = pl.BlockSpec((S, Bc, 1), lambda b: (0, b, 0))

    # Explicit scoped-VMEM budget from the actual resident footprint (f32),
    # double-counting pipelined operands/outputs for double buffering.
    def nbytes(shape):
        n = 4
        for s in shape:
            n *= s
        return n
    operand_bytes = (nbytes((S, Bc, D)) + nbytes((S, Bc, 1))
                     + sum(nbytes(a.shape) for a in inputs[1:]))
    scratch_bytes = nbytes((S, Bc, 4 * Hp)) + nbytes((S, Bc, Hp))
    vmem_limit = min(max(2 * operand_bytes + scratch_bytes + (4 << 20), 16 << 20),
                     100 * 1024 * 1024)

    out = pl.pallas_call(
        functools.partial(_lstm_fused_kernel, L, Hp),
        out_shape=jax.ShapeDtypeStruct((S, Bp, 1), x.dtype),
        grid=(Bp // Bc,),
        in_specs=in_specs,
        out_specs=out_specs,
        scratch_shapes=[
            pltpu.VMEM((S, Bc, 4 * Hp), jnp.float32),   # precomputed input gates
            pltpu.VMEM((S, Bc, Hp), jnp.float32),       # inter-layer hidden seq
        ],
        compiler_params=pltpu.CompilerParams(
            dimension_semantics=("parallel",),
            vmem_limit_bytes=int(vmem_limit)),
    )(*inputs)

    return jnp.transpose(out, (1, 0, 2))[:B]                    # (B, S, 1)


# ----------------------------------------------------------------------------
# Pure-JAX reference (same math, lax.scan) for a correctness check
# ----------------------------------------------------------------------------
def lstm_model_ref(x, params):
    B, S, _ = x.shape
    seq = x
    for (w_ih, w_hh, b_ih, b_hh) in params["lstm"]:
        H = w_hh.shape[1]

        def step(carry, x_t, w_ih=w_ih, w_hh=w_hh, b_ih=b_ih, b_hh=b_hh):
            h, c = carry
            gates = x_t @ w_ih.T + h @ w_hh.T + b_ih + b_hh
            i, f, g, o = jnp.split(gates, 4, axis=-1)
            i, f, o = jax.nn.sigmoid(i), jax.nn.sigmoid(f), jax.nn.sigmoid(o)
            g = jnp.tanh(g)
            c = f * c + i * g
            h = o * jnp.tanh(c)
            return (h, c), h

        init = (jnp.zeros((B, H), x.dtype), jnp.zeros((B, H), x.dtype))
        _, ys = jax.lax.scan(step, init, jnp.transpose(seq, (1, 0, 2)))
        seq = jnp.transpose(ys, (1, 0, 2))
    return seq @ params["w_lin"] + params["b_lin"]


# ----------------------------------------------------------------------------
# Deterministic parameter initialization (PyTorch-style uniform(-k, k))
# ----------------------------------------------------------------------------
def init_params(key, input_size, hidden_size, num_layers):
    k = 1.0 / jnp.sqrt(hidden_size)
    layers = []
    for layer in range(num_layers):
        d_in = input_size if layer == 0 else hidden_size
        key, k1, k2, k3, k4 = jax.random.split(key, 5)
        layers.append((
            jax.random.uniform(k1, (4 * hidden_size, d_in), jnp.float32, -k, k),
            jax.random.uniform(k2, (4 * hidden_size, hidden_size), jnp.float32, -k, k),
            jax.random.uniform(k3, (4 * hidden_size,), jnp.float32, -k, k),
            jax.random.uniform(k4, (4 * hidden_size,), jnp.float32, -k, k),
        ))
    key, k5, k6 = jax.random.split(key, 3)
    w_lin = jax.random.uniform(k5, (hidden_size, 1), jnp.float32, -k, k)
    b_lin = jax.random.uniform(k6, (1, 1), jnp.float32, -k, k)
    return {"lstm": layers, "w_lin": w_lin, "b_lin": b_lin}


if __name__ == "__main__":
    B, S, D, H, L = 2, 8, 16, 32, 2

    key = jax.random.PRNGKey(0)
    key_p, key_x = jax.random.split(key)
    params = init_params(key_p, D, H, L)
    x = jax.random.normal(key_x, (B, S, D), jnp.float32)

    prep = prepare_params(params)                    # one-time layout prep
    y = lstm_model_forward(x, prep)
    y = jax.block_until_ready(y)

    y_ref = lstm_model_ref(x, params)
    assert y.shape == (B, S, 1), y.shape
    assert jnp.allclose(y, y_ref, atol=2e-5, rtol=2e-5), \
        float(jnp.max(jnp.abs(y - y_ref)))

    print("KERNEL_OK")
</pallas_src>

<mosaic_0001>
module attributes {stable_mosaic.version = 11 : i64} {
  func.func @_lstm_fused_kernel(%arg0: i32, %arg1: memref<8x8x16xf32, #tpu.memory_space<vmem>>, %arg2: memref<16x512xf32, #tpu.memory_space<vmem>>, %arg3: memref<128x512xf32, #tpu.memory_space<vmem>>, %arg4: memref<1x512xf32, #tpu.memory_space<vmem>>, %arg5: memref<128x512xf32, #tpu.memory_space<vmem>>, %arg6: memref<128x512xf32, #tpu.memory_space<vmem>>, %arg7: memref<1x512xf32, #tpu.memory_space<vmem>>, %arg8: memref<128x1xf32, #tpu.memory_space<vmem>>, %arg9: memref<1x1xf32, #tpu.memory_space<vmem>>, %arg10: memref<8x8x1xf32, #tpu.memory_space<vmem>>, %arg11: memref<8x8x512xf32, #tpu.memory_space<vmem>>, %arg12: memref<8x8x128xf32, #tpu.memory_space<vmem>>) attributes {dimension_semantics = [#tpu.dimension_semantics<parallel>], iteration_bounds = array<i64: 1>, scalar_prefetch = 0 : i64, scratch_operands = 2 : i64, tpu.core_type = #tpu.core_type<tc>, window_params = [{transform_indices = @transform_0, window_bounds = array<i64: 8, 8, 16>}, {pipeline_mode = #tpu.pipeline_mode<synchronous>, transform_indices = @transform_1, window_bounds = array<i64: 16, 512>}, {pipeline_mode = #tpu.pipeline_mode<synchronous>, transform_indices = @transform_2, window_bounds = array<i64: 128, 512>}, {pipeline_mode = #tpu.pipeline_mode<synchronous>, transform_indices = @transform_3, window_bounds = array<i64: 1, 512>}, {pipeline_mode = #tpu.pipeline_mode<synchronous>, transform_indices = @transform_4, window_bounds = array<i64: 128, 512>}, {pipeline_mode = #tpu.pipeline_mode<synchronous>, transform_indices = @transform_5, window_bounds = array<i64: 128, 512>}, {pipeline_mode = #tpu.pipeline_mode<synchronous>, transform_indices = @transform_6, window_bounds = array<i64: 1, 512>}, {pipeline_mode = #tpu.pipeline_mode<synchronous>, transform_indices = @transform_7, window_bounds = array<i64: 128, 1>}, {pipeline_mode = #tpu.pipeline_mode<synchronous>, transform_indices = @transform_8, window_bounds = array<i64: 1, 1>}, {transform_indices = @transform_9, window_bounds = array<i64: 8, 8, 1>}]} {
    %c0 = arith.constant 0 : index
    %c0_0 = arith.constant 0 : index
    %c0_1 = arith.constant 0 : index
    %0 = vector.load %arg1[%c0, %c0_0, %c0_1] : memref<8x8x16xf32, #tpu.memory_space<vmem>>, vector<8x8x16xf32>
    %1 = vector.shape_cast %0 : vector<8x8x16xf32> to vector<64x16xf32>
    %c0_2 = arith.constant 0 : index
    %c0_3 = arith.constant 0 : index
    %2 = vector.load %arg2[%c0_2, %c0_3] : memref<16x512xf32, #tpu.memory_space<vmem>>, vector<16x512xf32>
    %cst = arith.constant dense<0.000000e+00> : vector<64x512xf32>
    %3 = tpu.matmul %1, %2, %cst {dimension_numbers = #tpu.dot_dimension_numbers<[1], [0], [0], [1], [0, 0, 1, 1], [], []>} : vector<64x16xf32>, vector<16x512xf32>, vector<64x512xf32> -> vector<64x512xf32>
    %c0_4 = arith.constant 0 : index
    %c0_5 = arith.constant 0 : index
    %4 = vector.load %arg4[%c0_4, %c0_5] : memref<1x512xf32, #tpu.memory_space<vmem>>, vector<1x512xf32>
    %5 = vector.broadcast %4 : vector<1x512xf32> to vector<64x512xf32>
    %6 = arith.addf %3, %5 : vector<64x512xf32>
    %7 = vector.shape_cast %6 : vector<64x512xf32> to vector<8x8x512xf32>
    %c0_6 = arith.constant 0 : index
    %c0_7 = arith.constant 0 : index
    %c0_8 = arith.constant 0 : index
    %8 = vector.load %arg11[%c0_6, %c0_7, %c0_8] : memref<8x8x512xf32, #tpu.memory_space<vmem>>, vector<8x8x512xf32>
    tpu.vector_store %arg11[%c0_6, %c0_7, %c0_8], %7 {strides = array<i32>} : memref<8x8x512xf32, #tpu.memory_space<vmem>>, vector<8x8x512xf32>,
    %c0_9 = arith.constant 0 : index
    %c0_10 = arith.constant 0 : index
    %9 = vector.load %arg3[%c0_9, %c0_10] : memref<128x512xf32, #tpu.memory_space<vmem>>, vector<128x512xf32>
    %cst_11 = arith.constant 0.000000e+00 : f32
    %10 = vector.broadcast %cst_11 : f32 to vector<8x128xf32>
    %cst_12 = arith.constant 0.000000e+00 : f32
    %11 = vector.broadcast %cst_12 : f32 to vector<8x128xf32>
    %c0_i32 = arith.constant 0 : i32
    %12 = arith.index_cast %c0_i32 : i32 to index
    %c0_13 = arith.constant 0 : index
    %c0_14 = arith.constant 0 : index
    %13 = vector.load %arg11[%12, %c0_13, %c0_14] : memref<8x8x512xf32, #tpu.memory_space<vmem>>, vector<1x8x512xf32>
    %14 = vector.shape_cast %13 : vector<1x8x512xf32> to vector<8x512xf32>
    %cst_15 = arith.constant dense<0.000000e+00> : vector<8x512xf32>
    %15 = tpu.matmul %10, %9, %cst_15 {dimension_numbers = #tpu.dot_dimension_numbers<[1], [0], [0], [1], [0, 0, 1, 1], [], []>} : vector<8x128xf32>, vector<128x512xf32>, vector<8x512xf32> -> vector<8x512xf32>
    %16 = arith.addf %14, %15 : vector<8x512xf32>
    %17 = vector.extract_strided_slice %16 {offsets = [0, 0], sizes = [8, 128], strides = [1, 1]} : vector<8x512xf32> to vector<8x128xf32>
    %cst_16 = arith.constant 5.000000e-01 : f32
    %18 = vector.broadcast %cst_16 : f32 to vector<8x128xf32>
    %19 = arith.mulf %18, %17 : vector<8x128xf32>
    %20 = math.tanh %19 : vector<8x128xf32>
    %cst_17 = arith.constant 5.000000e-01 : f32
    %21 = vector.broadcast %cst_17 : f32 to vector<8x128xf32>
    %22 = arith.mulf %21, %20 : vector<8x128xf32>
    %cst_18 = arith.constant 5.000000e-01 : f32
    %23 = vector.broadcast %cst_18 : f32 to vector<8x128xf32>
    %24 = arith.addf %22, %23 : vector<8x128xf32>
    %25 = vector.extract_strided_slice %16 {offsets = [0, 128], sizes = [8, 128], strides = [1, 1]} : vector<8x512xf32> to vector<8x128xf32>
    %cst_19 = arith.constant 5.000000e-01 : f32
    %26 = vector.broadcast %cst_19 : f32 to vector<8x128xf32>
    %27 = arith.mulf %26, %25 : vector<8x128xf32>
    %28 = math.tanh %27 : vector<8x128xf32>
    %cst_20 = arith.constant 5.000000e-01 : f32
    %29 = vector.broadcast %cst_20 : f32 to vector<8x128xf32>
    %30 = arith.mulf %29, %28 : vector<8x128xf32>
    %cst_21 = arith.constant 5.000000e-01 : f32
    %31 = vector.broadcast %cst_21 : f32 to vector<8x128xf32>
    %32 = arith.addf %30, %31 : vector<8x128xf32>
    %33 = vector.extract_strided_slice %16 {offsets = [0, 256], sizes = [8, 128], strides = [1, 1]} : vector<8x512xf32> to vector<8x128xf32>
    %34 = math.tanh %33 : vector<8x128xf32>
    %35 = vector.extract_strided_slice %16 {offsets = [0, 384], sizes = [8, 128], strides = [1, 1]} : vector<8x512xf32> to vector<8x128xf32>
    %cst_22 = arith.constant 5.000000e-01 : f32
    %36 = vector.broadcast %cst_22 : f32 to vector<8x128xf32>
    %37 = arith.mulf %36, %35 : vector<8x128xf32>
    %38 = math.tanh %37 : vector<8x128xf32>
    %cst_23 = arith.constant 5.000000e-01 : f32
    %39 = vector.broadcast %cst_23 : f32 to vector<8x128xf32>
    %40 = arith.mulf %39, %38 : vector<8x128xf32>
    %cst_24 = arith.constant 5.000000e-01 : f32
    %41 = vector.broadcast %cst_24 : f32 to vector<8x128xf32>
    %42 = arith.addf %40, %41 : vector<8x128xf32>
    %43 = arith.mulf %32, %11 : vector<8x128xf32>
    %44 = arith.mulf %24, %34 : vector<8x128xf32>
    %45 = arith.addf %43, %44 : vector<8x128xf32>
    %46 = math.tanh %45 : vector<8x128xf32>
    %47 = arith.mulf %42, %46 : vector<8x128xf32>
    %48 = arith.index_cast %c0_i32 : i32 to index
    %c0_25 = arith.constant 0 : index
    %c0_26 = arith.constant 0 : index
    %49 = vector.load %arg12[%48, %c0_25, %c0_26] : memref<8x8x128xf32, #tpu.memory_space<vmem>>, vector<1x8x128xf32>
    %50 = vector.shape_cast %49 : vector<1x8x128xf32> to vector<8x128xf32>
    %51 = vector.shape_cast %47 : vector<8x128xf32> to vector<1x8x128xf32>
    tpu.vector_store %arg12[%48, %c0_25, %c0_26], %51 {strides = array<i32>} : memref<8x8x128xf32, #tpu.memory_space<vmem>>, vector<1x8x128xf32>,
    %c1_i32 = arith.constant 1 : i32
    %52 = arith.index_cast %c1_i32 : i32 to index
    %c0_27 = arith.constant 0 : index
    %c0_28 = arith.constant 0 : index
    %53 = vector.load %arg11[%52, %c0_27, %c0_28] : memref<8x8x512xf32, #tpu.memory_space<vmem>>, vector<1x8x512xf32>
    %54 = vector.shape_cast %53 : vector<1x8x512xf32> to vector<8x512xf32>
    %cst_29 = arith.constant dense<0.000000e+00> : vector<8x512xf32>
    %55 = tpu.matmul %47, %9, %cst_29 {dimension_numbers = #tpu.dot_dimension_numbers<[1], [0], [0], [1], [0, 0, 1, 1], [], []>} : vector<8x128xf32>, vector<128x512xf32>, vector<8x512xf32> -> vector<8x512xf32>
    %56 = arith.addf %54, %55 : vector<8x512xf32>
    %57 = vector.extract_strided_slice %56 {offsets = [0, 0], sizes = [8, 128], strides = [1, 1]} : vector<8x512xf32> to vector<8x128xf32>
    %cst_30 = arith.constant 5.000000e-01 : f32
    %58 = vector.broadcast %cst_30 : f32 to vector<8x128xf32>
    %59 = arith.mulf %58, %57 : vector<8x128xf32>
    %60 = math.tanh %59 : vector<8x128xf32>
    %cst_31 = arith.constant 5.000000e-01 : f32
    %61 = vector.broadcast %cst_31 : f32 to vector<8x128xf32>
    %62 = arith.mulf %61, %60 : vector<8x128xf32>
    %cst_32 = arith.constant 5.000000e-01 : f32
    %63 = vector.broadcast %cst_32 : f32 to vector<8x128xf32>
    %64 = arith.addf %62, %63 : vector<8x128xf32>
    %65 = vector.extract_strided_slice %56 {offsets = [0, 128], sizes = [8, 128], strides = [1, 1]} : vector<8x512xf32> to vector<8x128xf32>
    %cst_33 = arith.constant 5.000000e-01 : f32
    %66 = vector.broadcast %cst_33 : f32 to vector<8x128xf32>
    %67 = arith.mulf %66, %65 : vector<8x128xf32>
    %68 = math.tanh %67 : vector<8x128xf32>
    %cst_34 = arith.constant 5.000000e-01 : f32
    %69 = vector.broadcast %cst_34 : f32 to vector<8x128xf32>
    %70 = arith.mulf %69, %68 : vector<8x128xf32>
    %cst_35 = arith.constant 5.000000e-01 : f32
    %71 = vector.broadcast %cst_35 : f32 to vector<8x128xf32>
    %72 = arith.addf %70, %71 : vector<8x128xf32>
    %73 = vector.extract_strided_slice %56 {offsets = [0, 256], sizes = [8, 128], strides = [1, 1]} : vector<8x512xf32> to vector<8x128xf32>
    %74 = math.tanh %73 : vector<8x128xf32>
    %75 = vector.extract_strided_slice %56 {offsets = [0, 384], sizes = [8, 128], strides = [1, 1]} : vector<8x512xf32> to vector<8x128xf32>
    %cst_36 = arith.constant 5.000000e-01 : f32
    %76 = vector.broadcast %cst_36 : f32 to vector<8x128xf32>
    %77 = arith.mulf %76, %75 : vector<8x128xf32>
    %78 = math.tanh %77 : vector<8x128xf32>
    %cst_37 = arith.constant 5.000000e-01 : f32
    %79 = vector.broadcast %cst_37 : f32 to vector<8x128xf32>
    %80 = arith.mulf %79, %78 : vector<8x128xf32>
    %cst_38 = arith.constant 5.000000e-01 : f32
    %81 = vector.broadcast %cst_38 : f32 to vector<8x128xf32>
    %82 = arith.addf %80, %81 : vector<8x128xf32>
    %83 = arith.mulf %72, %45 : vector<8x128xf32>
    %84 = arith.mulf %64, %74 : vector<8x128xf32>
    %85 = arith.addf %83, %84 : vector<8x128xf32>
    %86 = math.tanh %85 : vector<8x128xf32>
    %87 = arith.mulf %82, %86 : vector<8x128xf32>
    %88 = arith.index_cast %c1_i32 : i32 to index
    %c0_39 = arith.constant 0 : index
    %c0_40 = arith.constant 0 : index
    %89 = vector.load %arg12[%88, %c0_39, %c0_40] : memref<8x8x128xf32, #tpu.memory_space<vmem>>, vector<1x8x128xf32>
    %90 = vector.shape_cast %89 : vector<1x8x128xf32> to vector<8x128xf32>
    %91 = vector.shape_cast %87 : vector<8x128xf32> to vector<1x8x128xf32>
    tpu.vector_store %arg12[%88, %c0_39, %c0_40], %91 {strides = array<i32>} : memref<8x8x128xf32, #tpu.memory_space<vmem>>, vector<1x8x128xf32>,
    %c2_i32 = arith.constant 2 : i32
    %92 = arith.index_cast %c2_i32 : i32 to index
    %c0_41 = arith.constant 0 : index
    %c0_42 = arith.constant 0 : index
    %93 = vector.load %arg11[%92, %c0_41, %c0_42] : memref<8x8x512xf32, #tpu.memory_space<vmem>>, vector<1x8x512xf32>
    %94 = vector.shape_cast %93 : vector<1x8x512xf32> to vector<8x512xf32>
    %cst_43 = arith.constant dense<0.000000e+00> : vector<8x512xf32>
    %95 = tpu.matmul %87, %9, %cst_43 {dimension_numbers = #tpu.dot_dimension_numbers<[1], [0], [0], [1], [0, 0, 1, 1], [], []>} : vector<8x128xf32>, vector<128x512xf32>, vector<8x512xf32> -> vector<8x512xf32>
    %96 = arith.addf %94, %95 : vector<8x512xf32>
    %97 = vector.extract_strided_slice %96 {offsets = [0, 0], sizes = [8, 128], strides = [1, 1]} : vector<8x512xf32> to vector<8x128xf32>
    %cst_44 = arith.constant 5.000000e-01 : f32
    %98 = vector.broadcast %cst_44 : f32 to vector<8x128xf32>
    %99 = arith.mulf %98, %97 : vector<8x128xf32>
    %100 = math.tanh %99 : vector<8x128xf32>
    %cst_45 = arith.constant 5.000000e-01 : f32
    %101 = vector.broadcast %cst_45 : f32 to vector<8x128xf32>
    %102 = arith.mulf %101, %100 : vector<8x128xf32>
    %cst_46 = arith.constant 5.000000e-01 : f32
    %103 = vector.broadcast %cst_46 : f32 to vector<8x128xf32>
    %104 = arith.addf %102, %103 : vector<8x128xf32>
    %105 = vector.extract_strided_slice %96 {offsets = [0, 128], sizes = [8, 128], strides = [1, 1]} : vector<8x512xf32> to vector<8x128xf32>
    %cst_47 = arith.constant 5.000000e-01 : f32
    %106 = vector.broadcast %cst_47 : f32 to vector<8x128xf32>
    %107 = arith.mulf %106, %105 : vector<8x128xf32>
    %108 = math.tanh %107 : vector<8x128xf32>
    %cst_48 = arith.constant 5.000000e-01 : f32
    %109 = vector.broadcast %cst_48 : f32 to vector<8x128xf32>
    %110 = arith.mulf %109, %108 : vector<8x128xf32>
    %cst_49 = arith.constant 5.000000e-01 : f32
    %111 = vector.broadcast %cst_49 : f32 to vector<8x128xf32>
    %112 = arith.addf %110, %111 : vector<8x128xf32>
    %113 = vector.extract_strided_slice %96 {offsets = [0, 256], sizes = [8, 128], strides = [1, 1]} : vector<8x512xf32> to vector<8x128xf32>
    %114 = math.tanh %113 : vector<8x128xf32>
    %115 = vector.extract_strided_slice %96 {offsets = [0, 384], sizes = [8, 128], strides = [1, 1]} : vector<8x512xf32> to vector<8x128xf32>
    %cst_50 = arith.constant 5.000000e-01 : f32
    %116 = vector.broadcast %cst_50 : f32 to vector<8x128xf32>
    %117 = arith.mulf %116, %115 : vector<8x128xf32>
    %118 = math.tanh %117 : vector<8x128xf32>
    %cst_51 = arith.constant 5.000000e-01 : f32
    %119 = vector.broadcast %cst_51 : f32 to vector<8x128xf32>
    %120 = arith.mulf %119, %118 : vector<8x128xf32>
    %cst_52 = arith.constant 5.000000e-01 : f32
    %121 = vector.broadcast %cst_52 : f32 to vector<8x128xf32>
    %122 = arith.addf %120, %121 : vector<8x128xf32>
    %123 = arith.mulf %112, %85 : vector<8x128xf32>
    %124 = arith.mulf %104, %114 : vector<8x128xf32>
    %125 = arith.addf %123, %124 : vector<8x128xf32>
    %126 = math.tanh %125 : vector<8x128xf32>
    %127 = arith.mulf %122, %126 : vector<8x128xf32>
    %128 = arith.index_cast %c2_i32 : i32 to index
    %c0_53 = arith.constant 0 : index
    %c0_54 = arith.constant 0 : index
    %129 = vector.load %arg12[%128, %c0_53, %c0_54] : memref<8x8x128xf32, #tpu.memory_space<vmem>>, vector<1x8x128xf32>
    %130 = vector.shape_cast %129 : vector<1x8x128xf32> to vector<8x128xf32>
    %131 = vector.shape_cast %127 : vector<8x128xf32> to vector<1x8x128xf32>
    tpu.vector_store %arg12[%128, %c0_53, %c0_54], %131 {strides = array<i32>} : memref<8x8x128xf32, #tpu.memory_space<vmem>>, vector<1x8x128xf32>,
    %c3_i32 = arith.constant 3 : i32
    %132 = arith.index_cast %c3_i32 : i32 to index
    %c0_55 = arith.constant 0 : index
    %c0_56 = arith.constant 0 : index
    %133 = vector.load %arg11[%132, %c0_55, %c0_56] : memref<8x8x512xf32, #tpu.memory_space<vmem>>, vector<1x8x512xf32>
    %134 = vector.shape_cast %133 : vector<1x8x512xf32> to vector<8x512xf32>
    %cst_57 = arith.constant dense<0.000000e+00> : vector<8x512xf32>
    %135 = tpu.matmul %127, %9, %cst_57 {dimension_numbers = #tpu.dot_dimension_numbers<[1], [0], [0], [1], [0, 0, 1, 1], [], []>} : vector<8x128xf32>, vector<128x512xf32>, vector<8x512xf32> -> vector<8x512xf32>
    %136 = arith.addf %134, %135 : vector<8x512xf32>
    %137 = vector.extract_strided_slice %136 {offsets = [0, 0], sizes = [8, 128], strides = [1, 1]} : vector<8x512xf32> to vector<8x128xf32>
    %cst_58 = arith.constant 5.000000e-01 : f32
    %138 = vector.broadcast %cst_58 : f32 to vector<8x128xf32>
    %139 = arith.mulf %138, %137 : vector<8x128xf32>
    %140 = math.tanh %139 : vector<8x128xf32>
    %cst_59 = arith.constant 5.000000e-01 : f32
    %141 = vector.broadcast %cst_59 : f32 to vector<8x128xf32>
    %142 = arith.mulf %141, %140 : vector<8x128xf32>
    %cst_60 = arith.constant 5.000000e-01 : f32
    %143 = vector.broadcast %cst_60 : f32 to vector<8x128xf32>
    %144 = arith.addf %142, %143 : vector<8x128xf32>
    %145 = vector.extract_strided_slice %136 {offsets = [0, 128], sizes = [8, 128], strides = [1, 1]} : vector<8x512xf32> to vector<8x128xf32>
    %cst_61 = arith.constant 5.000000e-01 : f32
    %146 = vector.broadcast %cst_61 : f32 to vector<8x128xf32>
    %147 = arith.mulf %146, %145 : vector<8x128xf32>
    %148 = math.tanh %147 : vector<8x128xf32>
    %cst_62 = arith.constant 5.000000e-01 : f32
    %149 = vector.broadcast %cst_62 : f32 to vector<8x128xf32>
    %150 = arith.mulf %149, %148 : vector<8x128xf32>
    %cst_63 = arith.constant 5.000000e-01 : f32
    %151 = vector.broadcast %cst_63 : f32 to vector<8x128xf32>
    %152 = arith.addf %150, %151 : vector<8x128xf32>
    %153 = vector.extract_strided_slice %136 {offsets = [0, 256], sizes = [8, 128], strides = [1, 1]} : vector<8x512xf32> to vector<8x128xf32>
    %154 = math.tanh %153 : vector<8x128xf32>
    %155 = vector.extract_strided_slice %136 {offsets = [0, 384], sizes = [8, 128], strides = [1, 1]} : vector<8x512xf32> to vector<8x128xf32>
    %cst_64 = arith.constant 5.000000e-01 : f32
    %156 = vector.broadcast %cst_64 : f32 to vector<8x128xf32>
    %157 = arith.mulf %156, %155 : vector<8x128xf32>
    %158 = math.tanh %157 : vector<8x128xf32>
    %cst_65 = arith.constant 5.000000e-01 : f32
    %159 = vector.broadcast %cst_65 : f32 to vector<8x128xf32>
    %160 = arith.mulf %159, %158 : vector<8x128xf32>
    %cst_66 = arith.constant 5.000000e-01 : f32
    %161 = vector.broadcast %cst_66 : f32 to vector<8x128xf32>
    %162 = arith.addf %160, %161 : vector<8x128xf32>
    %163 = arith.mulf %152, %125 : vector<8x128xf32>
    %164 = arith.mulf %144, %154 : vector<8x128xf32>
    %165 = arith.addf %163, %164 : vector<8x128xf32>
    %166 = math.tanh %165 : vector<8x128xf32>
    %167 = arith.mulf %162, %166 : vector<8x128xf32>
    %168 = arith.index_cast %c3_i32 : i32 to index
    %c0_67 = arith.constant 0 : index
    %c0_68 = arith.constant 0 : index
    %169 = vector.load %arg12[%168, %c0_67, %c0_68] : memref<8x8x128xf32, #tpu.memory_space<vmem>>, vector<1x8x128xf32>
    %170 = vector.shape_cast %169 : vector<1x8x128xf32> to vector<8x128xf32>
    %171 = vector.shape_cast %167 : vector<8x128xf32> to vector<1x8x128xf32>
    tpu.vector_store %arg12[%168, %c0_67, %c0_68], %171 {strides = array<i32>} : memref<8x8x128xf32, #tpu.memory_space<vmem>>, vector<1x8x128xf32>,
    %c4_i32 = arith.constant 4 : i32
    %172 = arith.index_cast %c4_i32 : i32 to index
    %c0_69 = arith.constant 0 : index
    %c0_70 = arith.constant 0 : index
    %173 = vector.load %arg11[%172, %c0_69, %c0_70] : memref<8x8x512xf32, #tpu.memory_space<vmem>>, vector<1x8x512xf32>
    %174 = vector.shape_cast %173 : vector<1x8x512xf32> to vector<8x512xf32>
    %cst_71 = arith.constant dense<0.000000e+00> : vector<8x512xf32>
    %175 = tpu.matmul %167, %9, %cst_71 {dimension_numbers = #tpu.dot_dimension_numbers<[1], [0], [0], [1], [0, 0, 1, 1], [], []>} : vector<8x128xf32>, vector<128x512xf32>, vector<8x512xf32> -> vector<8x512xf32>
    %176 = arith.addf %174, %175 : vector<8x512xf32>
    %177 = vector.extract_strided_slice %176 {offsets = [0, 0], sizes = [8, 128], strides = [1, 1]} : vector<8x512xf32> to vector<8x128xf32>
    %cst_72 = arith.constant 5.000000e-01 : f32
    %178 = vector.broadcast %cst_72 : f32 to vector<8x128xf32>
    %179 = arith.mulf %178, %177 : vector<8x128xf32>
    %180 = math.tanh %179 : vector<8x128xf32>
    %cst_73 = arith.constant 5.000000e-01 : f32
    %181 = vector.broadcast %cst_73 : f32 to vector<8x128xf32>
    %182 = arith.mulf %181, %180 : vector<8x128xf32>
    %cst_74 = arith.constant 5.000000e-01 : f32
    %183 = vector.broadcast %cst_74 : f32 to vector<8x128xf32>
    %184 = arith.addf %182, %183 : vector<8x128xf32>
    %185 = vector.extract_strided_slice %176 {offsets = [0, 128], sizes = [8, 128], strides = [1, 1]} : vector<8x512xf32> to vector<8x128xf32>
    %cst_75 = arith.constant 5.000000e-01 : f32
    %186 = vector.broadcast %cst_75 : f32 to vector<8x128xf32>
    %187 = arith.mulf %186, %185 : vector<8x128xf32>
    %188 = math.tanh %187 : vector<8x128xf32>
    %cst_76 = arith.constant 5.000000e-01 : f32
    %189 = vector.broadcast %cst_76 : f32 to vector<8x128xf32>
    %190 = arith.mulf %189, %188 : vector<8x128xf32>
    %cst_77 = arith.constant 5.000000e-01 : f32
    %191 = vector.broadcast %cst_77 : f32 to vector<8x128xf32>
    %192 = arith.addf %190, %191 : vector<8x128xf32>
    %193 = vector.extract_strided_slice %176 {offsets = [0, 256], sizes = [8, 128], strides = [1, 1]} : vector<8x512xf32> to vector<8x128xf32>
    %194 = math.tanh %193 : vector<8x128xf32>
    %195 = vector.extract_strided_slice %176 {offsets = [0, 384], sizes = [8, 128], strides = [1, 1]} : vector<8x512xf32> to vector<8x128xf32>
    %cst_78 = arith.constant 5.000000e-01 : f32
    %196 = vector.broadcast %cst_78 : f32 to vector<8x128xf32>
    %197 = arith.mulf %196, %195 : vector<8x128xf32>
    %198 = math.tanh %197 : vector<8x128xf32>
    %cst_79 = arith.constant 5.000000e-01 : f32
    %199 = vector.broadcast %cst_79 : f32 to vector<8x128xf32>
    %200 = arith.mulf %199, %198 : vector<8x128xf32>
    %cst_80 = arith.constant 5.000000e-01 : f32
    %201 = vector.broadcast %cst_80 : f32 to vector<8x128xf32>
    %202 = arith.addf %200, %201 : vector<8x128xf32>
    %203 = arith.mulf %192, %165 : vector<8x128xf32>
    %204 = arith.mulf %184, %194 : vector<8x128xf32>
    %205 = arith.addf %203, %204 : vector<8x128xf32>
    %206 = math.tanh %205 : vector<8x128xf32>
    %207 = arith.mulf %202, %206 : vector<8x128xf32>
    %208 = arith.index_cast %c4_i32 : i32 to index
    %c0_81 = arith.constant 0 : index
    %c0_82 = arith.constant 0 : index
    %209 = vector.load %arg12[%208, %c0_81, %c0_82] : memref<8x8x128xf32, #tpu.memory_space<vmem>>, vector<1x8x128xf32>
    %210 = vector.shape_cast %209 : vector<1x8x128xf32> to vector<8x128xf32>
    %211 = vector.shape_cast %207 : vector<8x128xf32> to vector<1x8x128xf32>
    tpu.vector_store %arg12[%208, %c0_81, %c0_82], %211 {strides = array<i32>} : memref<8x8x128xf32, #tpu.memory_space<vmem>>, vector<1x8x128xf32>,
    %c5_i32 = arith.constant 5 : i32
    %212 = arith.index_cast %c5_i32 : i32 to index
    %c0_83 = arith.constant 0 : index
    %c0_84 = arith.constant 0 : index
    %213 = vector.load %arg11[%212, %c0_83, %c0_84] : memref<8x8x512xf32, #tpu.memory_space<vmem>>, vector<1x8x512xf32>
    %214 = vector.shape_cast %213 : vector<1x8x512xf32> to vector<8x512xf32>
    %cst_85 = arith.constant dense<0.000000e+00> : vector<8x512xf32>
    %215 = tpu.matmul %207, %9, %cst_85 {dimension_numbers = #tpu.dot_dimension_numbers<[1], [0], [0], [1], [0, 0, 1, 1], [], []>} : vector<8x128xf32>, vector<128x512xf32>, vector<8x512xf32> -> vector<8x512xf32>
    %216 = arith.addf %214, %215 : vector<8x512xf32>
    %217 = vector.extract_strided_slice %216 {offsets = [0, 0], sizes = [8, 128], strides = [1, 1]} : vector<8x512xf32> to vector<8x128xf32>
    %cst_86 = arith.constant 5.000000e-01 : f32
    %218 = vector.broadcast %cst_86 : f32 to vector<8x128xf32>
    %219 = arith.mulf %218, %217 : vector<8x128xf32>
    %220 = math.tanh %219 : vector<8x128xf32>
    %cst_87 = arith.constant 5.000000e-01 : f32
    %221 = vector.broadcast %cst_87 : f32 to vector<8x128xf32>
    %222 = arith.mulf %221, %220 : vector<8x128xf32>
    %cst_88 = arith.constant 5.000000e-01 : f32
    %223 = vector.broadcast %cst_88 : f32 to vector<8x128xf32>
    %224 = arith.addf %222, %223 : vector<8x128xf32>
    %225 = vector.extract_strided_slice %216 {offsets = [0, 128], sizes = [8, 128], strides = [1, 1]} : vector<8x512xf32> to vector<8x128xf32>
    %cst_89 = arith.constant 5.000000e-01 : f32
    %226 = vector.broadcast %cst_89 : f32 to vector<8x128xf32>
    %227 = arith.mulf %226, %225 : vector<8x128xf32>
    %228 = math.tanh %227 : vector<8x128xf32>
    %cst_90 = arith.constant 5.000000e-01 : f32
    %229 = vector.broadcast %cst_90 : f32 to vector<8x128xf32>
    %230 = arith.mulf %229, %228 : vector<8x128xf32>
    %cst_91 = arith.constant 5.000000e-01 : f32
    %231 = vector.broadcast %cst_91 : f32 to vector<8x128xf32>
    %232 = arith.addf %230, %231 : vector<8x128xf32>
    %233 = vector.extract_strided_slice %216 {offsets = [0, 256], sizes = [8, 128], strides = [1, 1]} : vector<8x512xf32> to vector<8x128xf32>
    %234 = math.tanh %233 : vector<8x128xf32>
    %235 = vector.extract_strided_slice %216 {offsets = [0, 384], sizes = [8, 128], strides = [1, 1]} : vector<8x512xf32> to vector<8x128xf32>
    %cst_92 = arith.constant 5.000000e-01 : f32
    %236 = vector.broadcast %cst_92 : f32 to vector<8x128xf32>
    %237 = arith.mulf %236, %235 : vector<8x128xf32>
    %238 = math.tanh %237 : vector<8x128xf32>
    %cst_93 = arith.constant 5.000000e-01 : f32
    %239 = vector.broadcast %cst_93 : f32 to vector<8x128xf32>
    %240 = arith.mulf %239, %238 : vector<8x128xf32>
    %cst_94 = arith.constant 5.000000e-01 : f32
    %241 = vector.broadcast %cst_94 : f32 to vector<8x128xf32>
    %242 = arith.addf %240, %241 : vector<8x128xf32>
    %243 = arith.mulf %232, %205 : vector<8x128xf32>
    %244 = arith.mulf %224, %234 : vector<8x128xf32>
    %245 = arith.addf %243, %244 : vector<8x128xf32>
    %246 = math.tanh %245 : vector<8x128xf32>
    %247 = arith.mulf %242, %246 : vector<8x128xf32>
    %248 = arith.index_cast %c5_i32 : i32 to index
    %c0_95 = arith.constant 0 : index
    %c0_96 = arith.constant 0 : index
    %249 = vector.load %arg12[%248, %c0_95, %c0_96] : memref<8x8x128xf32, #tpu.memory_space<vmem>>, vector<1x8x128xf32>
    %250 = vector.shape_cast %249 : vector<1x8x128xf32> to vector<8x128xf32>
    %251 = vector.shape_cast %247 : vector<8x128xf32> to vector<1x8x128xf32>
    tpu.vector_store %arg12[%248, %c0_95, %c0_96], %251 {strides = array<i32>} : memref<8x8x128xf32, #tpu.memory_space<vmem>>, vector<1x8x128xf32>,
    %c6_i32 = arith.constant 6 : i32
    %252 = arith.index_cast %c6_i32 : i32 to index
    %c0_97 = arith.constant 0 : index
    %c0_98 = arith.constant 0 : index
    %253 = vector.load %arg11[%252, %c0_97, %c0_98] : memref<8x8x512xf32, #tpu.memory_space<vmem>>, vector<1x8x512xf32>
    %254 = vector.shape_cast %253 : vector<1x8x512xf32> to vector<8x512xf32>
    %cst_99 = arith.constant dense<0.000000e+00> : vector<8x512xf32>
    %255 = tpu.matmul %247, %9, %cst_99 {dimension_numbers = #tpu.dot_dimension_numbers<[1], [0], [0], [1], [0, 0, 1, 1], [], []>} : vector<8x128xf32>, vector<128x512xf32>, vector<8x512xf32> -> vector<8x512xf32>
    %256 = arith.addf %254, %255 : vector<8x512xf32>
    %257 = vector.extract_strided_slice %256 {offsets = [0, 0], sizes = [8, 128], strides = [1, 1]} : vector<8x512xf32> to vector<8x128xf32>
    %cst_100 = arith.constant 5.000000e-01 : f32
    %258 = vector.broadcast %cst_100 : f32 to vector<8x128xf32>
    %259 = arith.mulf %258, %257 : vector<8x128xf32>
    %260 = math.tanh %259 : vector<8x128xf32>
    %cst_101 = arith.constant 5.000000e-01 : f32
    %261 = vector.broadcast %cst_101 : f32 to vector<8x128xf32>
    %262 = arith.mulf %261, %260 : vector<8x128xf32>
    %cst_102 = arith.constant 5.000000e-01 : f32
    %263 = vector.broadcast %cst_102 : f32 to vector<8x128xf32>
    %264 = arith.addf %262, %263 : vector<8x128xf32>
    %265 = vector.extract_strided_slice %256 {offsets = [0, 128], sizes = [8, 128], strides = [1, 1]} : vector<8x512xf32> to vector<8x128xf32>
    %cst_103 = arith.constant 5.000000e-01 : f32
    %266 = vector.broadcast %cst_103 : f32 to vector<8x128xf32>
    %267 = arith.mulf %266, %265 : vector<8x128xf32>
    %268 = math.tanh %267 : vector<8x128xf32>
    %cst_104 = arith.constant 5.000000e-01 : f32
    %269 = vector.broadcast %cst_104 : f32 to vector<8x128xf32>
    %270 = arith.mulf %269, %268 : vector<8x128xf32>
    %cst_105 = arith.constant 5.000000e-01 : f32
    %271 = vector.broadcast %cst_105 : f32 to vector<8x128xf32>
    %272 = arith.addf %270, %271 : vector<8x128xf32>
    %273 = vector.extract_strided_slice %256 {offsets = [0, 256], sizes = [8, 128], strides = [1, 1]} : vector<8x512xf32> to vector<8x128xf32>
    %274 = math.tanh %273 : vector<8x128xf32>
    %275 = vector.extract_strided_slice %256 {offsets = [0, 384], sizes = [8, 128], strides = [1, 1]} : vector<8x512xf32> to vector<8x128xf32>
    %cst_106 = arith.constant 5.000000e-01 : f32
    %276 = vector.broadcast %cst_106 : f32 to vector<8x128xf32>
    %277 = arith.mulf %276, %275 : vector<8x128xf32>
    %278 = math.tanh %277 : vector<8x128xf32>
    %cst_107 = arith.constant 5.000000e-01 : f32
    %279 = vector.broadcast %cst_107 : f32 to vector<8x128xf32>
    %280 = arith.mulf %279, %278 : vector<8x128xf32>
    %cst_108 = arith.constant 5.000000e-01 : f32
    %281 = vector.broadcast %cst_108 : f32 to vector<8x128xf32>
    %282 = arith.addf %280, %281 : vector<8x128xf32>
    %283 = arith.mulf %272, %245 : vector<8x128xf32>
    %284 = arith.mulf %264, %274 : vector<8x128xf32>
    %285 = arith.addf %283, %284 : vector<8x128xf32>
    %286 = math.tanh %285 : vector<8x128xf32>
    %287 = arith.mulf %282, %286 : vector<8x128xf32>
    %288 = arith.index_cast %c6_i32 : i32 to index
    %c0_109 = arith.constant 0 : index
    %c0_110 = arith.constant 0 : index
    %289 = vector.load %arg12[%288, %c0_109, %c0_110] : memref<8x8x128xf32, #tpu.memory_space<vmem>>, vector<1x8x128xf32>
    %290 = vector.shape_cast %289 : vector<1x8x128xf32> to vector<8x128xf32>
    %291 = vector.shape_cast %287 : vector<8x128xf32> to vector<1x8x128xf32>
    tpu.vector_store %arg12[%288, %c0_109, %c0_110], %291 {strides = array<i32>} : memref<8x8x128xf32, #tpu.memory_space<vmem>>, vector<1x8x128xf32>,
    %c7_i32 = arith.constant 7 : i32
    %292 = arith.index_cast %c7_i32 : i32 to index
    %c0_111 = arith.constant 0 : index
    %c0_112 = arith.constant 0 : index
    %293 = vector.load %arg11[%292, %c0_111, %c0_112] : memref<8x8x512xf32, #tpu.memory_space<vmem>>, vector<1x8x512xf32>
    %294 = vector.shape_cast %293 : vector<1x8x512xf32> to vector<8x512xf32>
    %cst_113 = arith.constant dense<0.000000e+00> : vector<8x512xf32>
    %295 = tpu.matmul %287, %9, %cst_113 {dimension_numbers = #tpu.dot_dimension_numbers<[1], [0], [0], [1], [0, 0, 1, 1], [], []>} : vector<8x128xf32>, vector<128x512xf32>, vector<8x512xf32> -> vector<8x512xf32>
    %296 = arith.addf %294, %295 : vector<8x512xf32>
    %297 = vector.extract_strided_slice %296 {offsets = [0, 0], sizes = [8, 128], strides = [1, 1]} : vector<8x512xf32> to vector<8x128xf32>
    %cst_114 = arith.constant 5.000000e-01 : f32
    %298 = vector.broadcast %cst_114 : f32 to vector<8x128xf32>
    %299 = arith.mulf %298, %297 : vector<8x128xf32>
    %300 = math.tanh %299 : vector<8x128xf32>
    %cst_115 = arith.constant 5.000000e-01 : f32
    %301 = vector.broadcast %cst_115 : f32 to vector<8x128xf32>
    %302 = arith.mulf %301, %300 : vector<8x128xf32>
    %cst_116 = arith.constant 5.000000e-01 : f32
    %303 = vector.broadcast %cst_116 : f32 to vector<8x128xf32>
    %304 = arith.addf %302, %303 : vector<8x128xf32>
    %305 = vector.extract_strided_slice %296 {offsets = [0, 128], sizes = [8, 128], strides = [1, 1]} : vector<8x512xf32> to vector<8x128xf32>
    %cst_117 = arith.constant 5.000000e-01 : f32
    %306 = vector.broadcast %cst_117 : f32 to vector<8x128xf32>
    %307 = arith.mulf %306, %305 : vector<8x128xf32>
    %308 = math.tanh %307 : vector<8x128xf32>
    %cst_118 = arith.constant 5.000000e-01 : f32
    %309 = vector.broadcast %cst_118 : f32 to vector<8x128xf32>
    %310 = arith.mulf %309, %308 : vector<8x128xf32>
    %cst_119 = arith.constant 5.000000e-01 : f32
    %311 = vector.broadcast %cst_119 : f32 to vector<8x128xf32>
    %312 = arith.addf %310, %311 : vector<8x128xf32>
    %313 = vector.extract_strided_slice %296 {offsets = [0, 256], sizes = [8, 128], strides = [1, 1]} : vector<8x512xf32> to vector<8x128xf32>
    %314 = math.tanh %313 : vector<8x128xf32>
    %315 = vector.extract_strided_slice %296 {offsets = [0, 384], sizes = [8, 128], strides = [1, 1]} : vector<8x512xf32> to vector<8x128xf32>
    %cst_120 = arith.constant 5.000000e-01 : f32
    %316 = vector.broadcast %cst_120 : f32 to vector<8x128xf32>
    %317 = arith.mulf %316, %315 : vector<8x128xf32>
    %318 = math.tanh %317 : vector<8x128xf32>
    %cst_121 = arith.constant 5.000000e-01 : f32
    %319 = vector.broadcast %cst_121 : f32 to vector<8x128xf32>
    %320 = arith.mulf %319, %318 : vector<8x128xf32>
    %cst_122 = arith.constant 5.000000e-01 : f32
    %321 = vector.broadcast %cst_122 : f32 to vector<8x128xf32>
    %322 = arith.addf %320, %321 : vector<8x128xf32>
    %323 = arith.mulf %312, %285 : vector<8x128xf32>
    %324 = arith.mulf %304, %314 : vector<8x128xf32>
    %325 = arith.addf %323, %324 : vector<8x128xf32>
    %326 = math.tanh %325 : vector<8x128xf32>
    %327 = arith.mulf %322, %326 : vector<8x128xf32>
    %328 = arith.index_cast %c7_i32 : i32 to index
    %c0_123 = arith.constant 0 : index
    %c0_124 = arith.constant 0 : index
    %329 = vector.load %arg12[%328, %c0_123, %c0_124] : memref<8x8x128xf32, #tpu.memory_space<vmem>>, vector<1x8x128xf32>
    %330 = vector.shape_cast %329 : vector<1x8x128xf32> to vector<8x128xf32>
    %331 = vector.shape_cast %327 : vector<8x128xf32> to vector<1x8x128xf32>
    tpu.vector_store %arg12[%328, %c0_123, %c0_124], %331 {strides = array<i32>} : memref<8x8x128xf32, #tpu.memory_space<vmem>>, vector<1x8x128xf32>,
    %c8_i32 = arith.constant 8 : i32
    %c0_125 = arith.constant 0 : index
    %c0_126 = arith.constant 0 : index
    %c0_127 = arith.constant 0 : index
    %332 = vector.load %arg12[%c0_125, %c0_126, %c0_127] : memref<8x8x128xf32, #tpu.memory_space<vmem>>, vector<8x8x128xf32>
    %333 = vector.shape_cast %332 : vector<8x8x128xf32> to vector<64x128xf32>
    %c0_128 = arith.constant 0 : index
    %c0_129 = arith.constant 0 : index
    %334 = vector.load %arg5[%c0_128, %c0_129] : memref<128x512xf32, #tpu.memory_space<vmem>>, vector<128x512xf32>
    %cst_130 = arith.constant dense<0.000000e+00> : vector<64x512xf32>
    %335 = tpu.matmul %333, %334, %cst_130 {dimension_numbers = #tpu.dot_dimension_numbers<[1], [0], [0], [1], [0, 0, 1, 1], [], []>} : vector<64x128xf32>, vector<128x512xf32>, vector<64x512xf32> -> vector<64x512xf32>
    %c0_131 = arith.constant 0 : index
    %c0_132 = arith.constant 0 : index
    %336 = vector.load %arg7[%c0_131, %c0_132] : memref<1x512xf32, #tpu.memory_space<vmem>>, vector<1x512xf32>
    %337 = vector.broadcast %336 : vector<1x512xf32> to vector<64x512xf32>
    %338 = arith.addf %335, %337 : vector<64x512xf32>
    %339 = vector.shape_cast %338 : vector<64x512xf32> to vector<8x8x512xf32>
    %c0_133 = arith.constant 0 : index
    %c0_134 = arith.constant 0 : index
    %c0_135 = arith.constant 0 : index
    %340 = vector.load %arg11[%c0_133, %c0_134, %c0_135] : memref<8x8x512xf32, #tpu.memory_space<vmem>>, vector<8x8x512xf32>
    tpu.vector_store %arg11[%c0_133, %c0_134, %c0_135], %339 {strides = array<i32>} : memref<8x8x512xf32, #tpu.memory_space<vmem>>, vector<8x8x512xf32>,
    %c0_136 = arith.constant 0 : index
    %c0_137 = arith.constant 0 : index
    %341 = vector.load %arg6[%c0_136, %c0_137] : memref<128x512xf32, #tpu.memory_space<vmem>>, vector<128x512xf32>
    %cst_138 = arith.constant 0.000000e+00 : f32
    %342 = vector.broadcast %cst_138 : f32 to vector<8x128xf32>
    %cst_139 = arith.constant 0.000000e+00 : f32
    %343 = vector.broadcast %cst_139 : f32 to vector<8x128xf32>
    %c0_i32_140 = arith.constant 0 : i32
    %344 = arith.index_cast %c0_i32_140 : i32 to index
    %c0_141 = arith.constant 0 : index
    %c0_142 = arith.constant 0 : index
    %345 = vector.load %arg11[%344, %c0_141, %c0_142] : memref<8x8x512xf32, #tpu.memory_space<vmem>>, vector<1x8x512xf32>
    %346 = vector.shape_cast %345 : vector<1x8x512xf32> to vector<8x512xf32>
    %cst_143 = arith.constant dense<0.000000e+00> : vector<8x512xf32>
    %347 = tpu.matmul %342, %341, %cst_143 {dimension_numbers = #tpu.dot_dimension_numbers<[1], [0], [0], [1], [0, 0, 1, 1], [], []>} : vector<8x128xf32>, vector<128x512xf32>, vector<8x512xf32> -> vector<8x512xf32>
    %348 = arith.addf %346, %347 : vector<8x512xf32>
    %349 = vector.extract_strided_slice %348 {offsets = [0, 0], sizes = [8, 128], strides = [1, 1]} : vector<8x512xf32> to vector<8x128xf32>
    %cst_144 = arith.constant 5.000000e-01 : f32
    %350 = vector.broadcast %cst_144 : f32 to vector<8x128xf32>
    %351 = arith.mulf %350, %349 : vector<8x128xf32>
    %352 = math.tanh %351 : vector<8x128xf32>
    %cst_145 = arith.constant 5.000000e-01 : f32
    %353 = vector.broadcast %cst_145 : f32 to vector<8x128xf32>
    %354 = arith.mulf %353, %352 : vector<8x128xf32>
    %cst_146 = arith.constant 5.000000e-01 : f32
    %355 = vector.broadcast %cst_146 : f32 to vector<8x128xf32>
    %356 = arith.addf %354, %355 : vector<8x128xf32>
    %357 = vector.extract_strided_slice %348 {offsets = [0, 128], sizes = [8, 128], strides = [1, 1]} : vector<8x512xf32> to vector<8x128xf32>
    %cst_147 = arith.constant 5.000000e-01 : f32
    %358 = vector.broadcast %cst_147 : f32 to vector<8x128xf32>
    %359 = arith.mulf %358, %357 : vector<8x128xf32>
    %360 = math.tanh %359 : vector<8x128xf32>
    %cst_148 = arith.constant 5.000000e-01 : f32
    %361 = vector.broadcast %cst_148 : f32 to vector<8x128xf32>
    %362 = arith.mulf %361, %360 : vector<8x128xf32>
    %cst_149 = arith.constant 5.000000e-01 : f32
    %363 = vector.broadcast %cst_149 : f32 to vector<8x128xf32>
    %364 = arith.addf %362, %363 : vector<8x128xf32>
    %365 = vector.extract_strided_slice %348 {offsets = [0, 256], sizes = [8, 128], strides = [1, 1]} : vector<8x512xf32> to vector<8x128xf32>
    %366 = math.tanh %365 : vector<8x128xf32>
    %367 = vector.extract_strided_slice %348 {offsets = [0, 384], sizes = [8, 128], strides = [1, 1]} : vector<8x512xf32> to vector<8x128xf32>
    %cst_150 = arith.constant 5.000000e-01 : f32
    %368 = vector.broadcast %cst_150 : f32 to vector<8x128xf32>
    %369 = arith.mulf %368, %367 : vector<8x128xf32>
    %370 = math.tanh %369 : vector<8x128xf32>
    %cst_151 = arith.constant 5.000000e-01 : f32
    %371 = vector.broadcast %cst_151 : f32 to vector<8x128xf32>
    %372 = arith.mulf %371, %370 : vector<8x128xf32>
    %cst_152 = arith.constant 5.000000e-01 : f32
    %373 = vector.broadcast %cst_152 : f32 to vector<8x128xf32>
    %374 = arith.addf %372, %373 : vector<8x128xf32>
    %375 = arith.mulf %364, %343 : vector<8x128xf32>
    %376 = arith.mulf %356, %366 : vector<8x128xf32>
    %377 = arith.addf %375, %376 : vector<8x128xf32>
    %378 = math.tanh %377 : vector<8x128xf32>
    %379 = arith.mulf %374, %378 : vector<8x128xf32>
    %380 = arith.index_cast %c0_i32_140 : i32 to index
    %c0_153 = arith.constant 0 : index
    %c0_154 = arith.constant 0 : index
    %381 = vector.load %arg12[%380, %c0_153, %c0_154] : memref<8x8x128xf32, #tpu.memory_space<vmem>>, vector<1x8x128xf32>
    %382 = vector.shape_cast %381 : vector<1x8x128xf32> to vector<8x128xf32>
    %383 = vector.shape_cast %379 : vector<8x128xf32> to vector<1x8x128xf32>
    tpu.vector_store %arg12[%380, %c0_153, %c0_154], %383 {strides = array<i32>} : memref<8x8x128xf32, #tpu.memory_space<vmem>>, vector<1x8x128xf32>,
    %c1_i32_155 = arith.constant 1 : i32
    %384 = arith.index_cast %c1_i32_155 : i32 to index
    %c0_156 = arith.constant 0 : index
    %c0_157 = arith.constant 0 : index
    %385 = vector.load %arg11[%384, %c0_156, %c0_157] : memref<8x8x512xf32, #tpu.memory_space<vmem>>, vector<1x8x512xf32>
    %386 = vector.shape_cast %385 : vector<1x8x512xf32> to vector<8x512xf32>
    %cst_158 = arith.constant dense<0.000000e+00> : vector<8x512xf32>
    %387 = tpu.matmul %379, %341, %cst_158 {dimension_numbers = #tpu.dot_dimension_numbers<[1], [0], [0], [1], [0, 0, 1, 1], [], []>} : vector<8x128xf32>, vector<128x512xf32>, vector<8x512xf32> -> vector<8x512xf32>
    %388 = arith.addf %386, %387 : vector<8x512xf32>
    %389 = vector.extract_strided_slice %388 {offsets = [0, 0], sizes = [8, 128], strides = [1, 1]} : vector<8x512xf32> to vector<8x128xf32>
    %cst_159 = arith.constant 5.000000e-01 : f32
    %390 = vector.broadcast %cst_159 : f32 to vector<8x128xf32>
    %391 = arith.mulf %390, %389 : vector<8x128xf32>
    %392 = math.tanh %391 : vector<8x128xf32>
    %cst_160 = arith.constant 5.000000e-01 : f32
    %393 = vector.broadcast %cst_160 : f32 to vector<8x128xf32>
    %394 = arith.mulf %393, %392 : vector<8x128xf32>
    %cst_161 = arith.constant 5.000000e-01 : f32
    %395 = vector.broadcast %cst_161 : f32 to vector<8x128xf32>
    %396 = arith.addf %394, %395 : vector<8x128xf32>
    %397 = vector.extract_strided_slice %388 {offsets = [0, 128], sizes = [8, 128], strides = [1, 1]} : vector<8x512xf32> to vector<8x128xf32>
    %cst_162 = arith.constant 5.000000e-01 : f32
    %398 = vector.broadcast %cst_162 : f32 to vector<8x128xf32>
    %399 = arith.mulf %398, %397 : vector<8x128xf32>
    %400 = math.tanh %399 : vector<8x128xf32>
    %cst_163 = arith.constant 5.000000e-01 : f32
    %401 = vector.broadcast %cst_163 : f32 to vector<8x128xf32>
    %402 = arith.mulf %401, %400 : vector<8x128xf32>
    %cst_164 = arith.constant 5.000000e-01 : f32
    %403 = vector.broadcast %cst_164 : f32 to vector<8x128xf32>
    %404 = arith.addf %402, %403 : vector<8x128xf32>
    %405 = vector.extract_strided_slice %388 {offsets = [0, 256], sizes = [8, 128], strides = [1, 1]} : vector<8x512xf32> to vector<8x128xf32>
    %406 = math.tanh %405 : vector<8x128xf32>
    %407 = vector.extract_strided_slice %388 {offsets = [0, 384], sizes = [8, 128], strides = [1, 1]} : vector<8x512xf32> to vector<8x128xf32>
    %cst_165 = arith.constant 5.000000e-01 : f32
    %408 = vector.broadcast %cst_165 : f32 to vector<8x128xf32>
    %409 = arith.mulf %408, %407 : vector<8x128xf32>
    %410 = math.tanh %409 : vector<8x128xf32>
    %cst_166 = arith.constant 5.000000e-01 : f32
    %411 = vector.broadcast %cst_166 : f32 to vector<8x128xf32>
    %412 = arith.mulf %411, %410 : vector<8x128xf32>
    %cst_167 = arith.constant 5.000000e-01 : f32
    %413 = vector.broadcast %cst_167 : f32 to vector<8x128xf32>
    %414 = arith.addf %412, %413 : vector<8x128xf32>
    %415 = arith.mulf %404, %377 : vector<8x128xf32>
    %416 = arith.mulf %396, %406 : vector<8x128xf32>
    %417 = arith.addf %415, %416 : vector<8x128xf32>
    %418 = math.tanh %417 : vector<8x128xf32>
    %419 = arith.mulf %414, %418 : vector<8x128xf32>
    %420 = arith.index_cast %c1_i32_155 : i32 to index
    %c0_168 = arith.constant 0 : index
    %c0_169 = arith.constant 0 : index
    %421 = vector.load %arg12[%420, %c0_168, %c0_169] : memref<8x8x128xf32, #tpu.memory_space<vmem>>, vector<1x8x128xf32>
    %422 = vector.shape_cast %421 : vector<1x8x128xf32> to vector<8x128xf32>
    %423 = vector.shape_cast %419 : vector<8x128xf32> to vector<1x8x128xf32>
    tpu.vector_store %arg12[%420, %c0_168, %c0_169], %423 {strides = array<i32>} : memref<8x8x128xf32, #tpu.memory_space<vmem>>, vector<1x8x128xf32>,
    %c2_i32_170 = arith.constant 2 : i32
    %424 = arith.index_cast %c2_i32_170 : i32 to index
    %c0_171 = arith.constant 0 : index
    %c0_172 = arith.constant 0 : index
    %425 = vector.load %arg11[%424, %c0_171, %c0_172] : memref<8x8x512xf32, #tpu.memory_space<vmem>>, vector<1x8x512xf32>
    %426 = vector.shape_cast %425 : vector<1x8x512xf32> to vector<8x512xf32>
    %cst_173 = arith.constant dense<0.000000e+00> : vector<8x512xf32>
    %427 = tpu.matmul %419, %341, %cst_173 {dimension_numbers = #tpu.dot_dimension_numbers<[1], [0], [0], [1], [0, 0, 1, 1], [], []>} : vector<8x128xf32>, vector<128x512xf32>, vector<8x512xf32> -> vector<8x512xf32>
    %428 = arith.addf %426, %427 : vector<8x512xf32>
    %429 = vector.extract_strided_slice %428 {offsets = [0, 0], sizes = [8, 128], strides = [1, 1]} : vector<8x512xf32> to vector<8x128xf32>
    %cst_174 = arith.constant 5.000000e-01 : f32
    %430 = vector.broadcast %cst_174 : f32 to vector<8x128xf32>
    %431 = arith.mulf %430, %429 : vector<8x128xf32>
    %432 = math.tanh %431 : vector<8x128xf32>
    %cst_175 = arith.constant 5.000000e-01 : f32
    %433 = vector.broadcast %cst_175 : f32 to vector<8x128xf32>
    %434 = arith.mulf %433, %432 : vector<8x128xf32>
    %cst_176 = arith.constant 5.000000e-01 : f32
    %435 = vector.broadcast %cst_176 : f32 to vector<8x128xf32>
    %436 = arith.addf %434, %435 : vector<8x128xf32>
    %437 = vector.extract_strided_slice %428 {offsets = [0, 128], sizes = [8, 128], strides = [1, 1]} : vector<8x512xf32> to vector<8x128xf32>
    %cst_177 = arith.constant 5.000000e-01 : f32
    %438 = vector.broadcast %cst_177 : f32 to vector<8x128xf32>
    %439 = arith.mulf %438, %437 : vector<8x128xf32>
    %440 = math.tanh %439 : vector<8x128xf32>
    %cst_178 = arith.constant 5.000000e-01 : f32
    %441 = vector.broadcast %cst_178 : f32 to vector<8x128xf32>
    %442 = arith.mulf %441, %440 : vector<8x128xf32>
    %cst_179 = arith.constant 5.000000e-01 : f32
    %443 = vector.broadcast %cst_179 : f32 to vector<8x128xf32>
    %444 = arith.addf %442, %443 : vector<8x128xf32>
    %445 = vector.extract_strided_slice %428 {offsets = [0, 256], sizes = [8, 128], strides = [1, 1]} : vector<8x512xf32> to vector<8x128xf32>
    %446 = math.tanh %445 : vector<8x128xf32>
    %447 = vector.extract_strided_slice %428 {offsets = [0, 384], sizes = [8, 128], strides = [1, 1]} : vector<8x512xf32> to vector<8x128xf32>
    %cst_180 = arith.constant 5.000000e-01 : f32
    %448 = vector.broadcast %cst_180 : f32 to vector<8x128xf32>
    %449 = arith.mulf %448, %447 : vector<8x128xf32>
    %450 = math.tanh %449 : vector<8x128xf32>
    %cst_181 = arith.constant 5.000000e-01 : f32
    %451 = vector.broadcast %cst_181 : f32 to vector<8x128xf32>
    %452 = arith.mulf %451, %450 : vector<8x128xf32>
    %cst_182 = arith.constant 5.000000e-01 : f32
    %453 = vector.broadcast %cst_182 : f32 to vector<8x128xf32>
    %454 = arith.addf %452, %453 : vector<8x128xf32>
    %455 = arith.mulf %444, %417 : vector<8x128xf32>
    %456 = arith.mulf %436, %446 : vector<8x128xf32>
    %457 = arith.addf %455, %456 : vector<8x128xf32>
    %458 = math.tanh %457 : vector<8x128xf32>
    %459 = arith.mulf %454, %458 : vector<8x128xf32>
    %460 = arith.index_cast %c2_i32_170 : i32 to index
    %c0_183 = arith.constant 0 : index
    %c0_184 = arith.constant 0 : index
    %461 = vector.load %arg12[%460, %c0_183, %c0_184] : memref<8x8x128xf32, #tpu.memory_space<vmem>>, vector<1x8x128xf32>
    %462 = vector.shape_cast %461 : vector<1x8x128xf32> to vector<8x128xf32>
    %463 = vector.shape_cast %459 : vector<8x128xf32> to vector<1x8x128xf32>
    tpu.vector_store %arg12[%460, %c0_183, %c0_184], %463 {strides = array<i32>} : memref<8x8x128xf32, #tpu.memory_space<vmem>>, vector<1x8x128xf32>,
    %c3_i32_185 = arith.constant 3 : i32
    %464 = arith.index_cast %c3_i32_185 : i32 to index
    %c0_186 = arith.constant 0 : index
    %c0_187 = arith.constant 0 : index
    %465 = vector.load %arg11[%464, %c0_186, %c0_187] : memref<8x8x512xf32, #tpu.memory_space<vmem>>, vector<1x8x512xf32>
    %466 = vector.shape_cast %465 : vector<1x8x512xf32> to vector<8x512xf32>
    %cst_188 = arith.constant dense<0.000000e+00> : vector<8x512xf32>
    %467 = tpu.matmul %459, %341, %cst_188 {dimension_numbers = #tpu.dot_dimension_numbers<[1], [0], [0], [1], [0, 0, 1, 1], [], []>} : vector<8x128xf32>, vector<128x512xf32>, vector<8x512xf32> -> vector<8x512xf32>
    %468 = arith.addf %466, %467 : vector<8x512xf32>
    %469 = vector.extract_strided_slice %468 {offsets = [0, 0], sizes = [8, 128], strides = [1, 1]} : vector<8x512xf32> to vector<8x128xf32>
    %cst_189 = arith.constant 5.000000e-01 : f32
    %470 = vector.broadcast %cst_189 : f32 to vector<8x128xf32>
    %471 = arith.mulf %470, %469 : vector<8x128xf32>
    %472 = math.tanh %471 : vector<8x128xf32>
    %cst_190 = arith.constant 5.000000e-01 : f32
    %473 = vector.broadcast %cst_190 : f32 to vector<8x128xf32>
    %474 = arith.mulf %473, %472 : vector<8x128xf32>
    %cst_191 = arith.constant 5.000000e-01 : f32
    %475 = vector.broadcast %cst_191 : f32 to vector<8x128xf32>
    %476 = arith.addf %474, %475 : vector<8x128xf32>
    %477 = vector.extract_strided_slice %468 {offsets = [0, 128], sizes = [8, 128], strides = [1, 1]} : vector<8x512xf32> to vector<8x128xf32>
    %cst_192 = arith.constant 5.000000e-01 : f32
    %478 = vector.broadcast %cst_192 : f32 to vector<8x128xf32>
    %479 = arith.mulf %478, %477 : vector<8x128xf32>
    %480 = math.tanh %479 : vector<8x128xf32>
    %cst_193 = arith.constant 5.000000e-01 : f32
    %481 = vector.broadcast %cst_193 : f32 to vector<8x128xf32>
    %482 = arith.mulf %481, %480 : vector<8x128xf32>
    %cst_194 = arith.constant 5.000000e-01 : f32
    %483 = vector.broadcast %cst_194 : f32 to vector<8x128xf32>
    %484 = arith.addf %482, %483 : vector<8x128xf32>
    %485 = vector.extract_strided_slice %468 {offsets = [0, 256], sizes = [8, 128], strides = [1, 1]} : vector<8x512xf32> to vector<8x128xf32>
    %486 = math.tanh %485 : vector<8x128xf32>
    %487 = vector.extract_strided_slice %468 {offsets = [0, 384], sizes = [8, 128], strides = [1, 1]} : vector<8x512xf32> to vector<8x128xf32>
    %cst_195 = arith.constant 5.000000e-01 : f32
    %488 = vector.broadcast %cst_195 : f32 to vector<8x128xf32>
    %489 = arith.mulf %488, %487 : vector<8x128xf32>
    %490 = math.tanh %489 : vector<8x128xf32>
    %cst_196 = arith.constant 5.000000e-01 : f32
    %491 = vector.broadcast %cst_196 : f32 to vector<8x128xf32>
    %492 = arith.mulf %491, %490 : vector<8x128xf32>
    %cst_197 = arith.constant 5.000000e-01 : f32
    %493 = vector.broadcast %cst_197 : f32 to vector<8x128xf32>
    %494 = arith.addf %492, %493 : vector<8x128xf32>
    %495 = arith.mulf %484, %457 : vector<8x128xf32>
    %496 = arith.mulf %476, %486 : vector<8x128xf32>
    %497 = arith.addf %495, %496 : vector<8x128xf32>
    %498 = math.tanh %497 : vector<8x128xf32>
    %499 = arith.mulf %494, %498 : vector<8x128xf32>
    %500 = arith.index_cast %c3_i32_185 : i32 to index
    %c0_198 = arith.constant 0 : index
    %c0_199 = arith.constant 0 : index
    %501 = vector.load %arg12[%500, %c0_198, %c0_199] : memref<8x8x128xf32, #tpu.memory_space<vmem>>, vector<1x8x128xf32>
    %502 = vector.shape_cast %501 : vector<1x8x128xf32> to vector<8x128xf32>
    %503 = vector.shape_cast %499 : vector<8x128xf32> to vector<1x8x128xf32>
    tpu.vector_store %arg12[%500, %c0_198, %c0_199], %503 {strides = array<i32>} : memref<8x8x128xf32, #tpu.memory_space<vmem>>, vector<1x8x128xf32>,
    %c4_i32_200 = arith.constant 4 : i32
    %504 = arith.index_cast %c4_i32_200 : i32 to index
    %c0_201 = arith.constant 0 : index
    %c0_202 = arith.constant 0 : index
    %505 = vector.load %arg11[%504, %c0_201, %c0_202] : memref<8x8x512xf32, #tpu.memory_space<vmem>>, vector<1x8x512xf32>
    %506 = vector.shape_cast %505 : vector<1x8x512xf32> to vector<8x512xf32>
    %cst_203 = arith.constant dense<0.000000e+00> : vector<8x512xf32>
    %507 = tpu.matmul %499, %341, %cst_203 {dimension_numbers = #tpu.dot_dimension_numbers<[1], [0], [0], [1], [0, 0, 1, 1], [], []>} : vector<8x128xf32>, vector<128x512xf32>, vector<8x512xf32> -> vector<8x512xf32>
    %508 = arith.addf %506, %507 : vector<8x512xf32>
    %509 = vector.extract_strided_slice %508 {offsets = [0, 0], sizes = [8, 128], strides = [1, 1]} : vector<8x512xf32> to vector<8x128xf32>
    %cst_204 = arith.constant 5.000000e-01 : f32
    %510 = vector.broadcast %cst_204 : f32 to vector<8x128xf32>
    %511 = arith.mulf %510, %509 : vector<8x128xf32>
    %512 = math.tanh %511 : vector<8x128xf32>
    %cst_205 = arith.constant 5.000000e-01 : f32
    %513 = vector.broadcast %cst_205 : f32 to vector<8x128xf32>
    %514 = arith.mulf %513, %512 : vector<8x128xf32>
    %cst_206 = arith.constant 5.000000e-01 : f32
    %515 = vector.broadcast %cst_206 : f32 to vector<8x128xf32>
    %516 = arith.addf %514, %515 : vector<8x128xf32>
    %517 = vector.extract_strided_slice %508 {offsets = [0, 128], sizes = [8, 128], strides = [1, 1]} : vector<8x512xf32> to vector<8x128xf32>
    %cst_207 = arith.constant 5.000000e-01 : f32
    %518 = vector.broadcast %cst_207 : f32 to vector<8x128xf32>
    %519 = arith.mulf %518, %517 : vector<8x128xf32>
    %520 = math.tanh %519 : vector<8x128xf32>
    %cst_208 = arith.constant 5.000000e-01 : f32
    %521 = vector.broadcast %cst_208 : f32 to vector<8x128xf32>
    %522 = arith.mulf %521, %520 : vector<8x128xf32>
    %cst_209 = arith.constant 5.000000e-01 : f32
    %523 = vector.broadcast %cst_209 : f32 to vector<8x128xf32>
    %524 = arith.addf %522, %523 : vector<8x128xf32>
    %525 = vector.extract_strided_slice %508 {offsets = [0, 256], sizes = [8, 128], strides = [1, 1]} : vector<8x512xf32> to vector<8x128xf32>
    %526 = math.tanh %525 : vector<8x128xf32>
    %527 = vector.extract_strided_slice %508 {offsets = [0, 384], sizes = [8, 128], strides = [1, 1]} : vector<8x512xf32> to vector<8x128xf32>
    %cst_210 = arith.constant 5.000000e-01 : f32
    %528 = vector.broadcast %cst_210 : f32 to vector<8x128xf32>
    %529 = arith.mulf %528, %527 : vector<8x128xf32>
    %530 = math.tanh %529 : vector<8x128xf32>
    %cst_211 = arith.constant 5.000000e-01 : f32
    %531 = vector.broadcast %cst_211 : f32 to vector<8x128xf32>
    %532 = arith.mulf %531, %530 : vector<8x128xf32>
    %cst_212 = arith.constant 5.000000e-01 : f32
    %533 = vector.broadcast %cst_212 : f32 to vector<8x128xf32>
    %534 = arith.addf %532, %533 : vector<8x128xf32>
    %535 = arith.mulf %524, %497 : vector<8x128xf32>
    %536 = arith.mulf %516, %526 : vector<8x128xf32>
    %537 = arith.addf %535, %536 : vector<8x128xf32>
    %538 = math.tanh %537 : vector<8x128xf32>
    %539 = arith.mulf %534, %538 : vector<8x128xf32>
    %540 = arith.index_cast %c4_i32_200 : i32 to index
    %c0_213 = arith.constant 0 : index
    %c0_214 = arith.constant 0 : index
    %541 = vector.load %arg12[%540, %c0_213, %c0_214] : memref<8x8x128xf32, #tpu.memory_space<vmem>>, vector<1x8x128xf32>
    %542 = vector.shape_cast %541 : vector<1x8x128xf32> to vector<8x128xf32>
    %543 = vector.shape_cast %539 : vector<8x128xf32> to vector<1x8x128xf32>
    tpu.vector_store %arg12[%540, %c0_213, %c0_214], %543 {strides = array<i32>} : memref<8x8x128xf32, #tpu.memory_space<vmem>>, vector<1x8x128xf32>,
    %c5_i32_215 = arith.constant 5 : i32
    %544 = arith.index_cast %c5_i32_215 : i32 to index
    %c0_216 = arith.constant 0 : index
    %c0_217 = arith.constant 0 : index
    %545 = vector.load %arg11[%544, %c0_216, %c0_217] : memref<8x8x512xf32, #tpu.memory_space<vmem>>, vector<1x8x512xf32>
    %546 = vector.shape_cast %545 : vector<1x8x512xf32> to vector<8x512xf32>
    %cst_218 = arith.constant dense<0.000000e+00> : vector<8x512xf32>
    %547 = tpu.matmul %539, %341, %cst_218 {dimension_numbers = #tpu.dot_dimension_numbers<[1], [0], [0], [1], [0, 0, 1, 1], [], []>} : vector<8x128xf32>, vector<128x512xf32>, vector<8x512xf32> -> vector<8x512xf32>
    %548 = arith.addf %546, %547 : vector<8x512xf32>
    %549 = vector.extract_strided_slice %548 {offsets = [0, 0], sizes = [8, 128], strides = [1, 1]} : vector<8x512xf32> to vector<8x128xf32>
    %cst_219 = arith.constant 5.000000e-01 : f32
    %550 = vector.broadcast %cst_219 : f32 to vector<8x128xf32>
    %551 = arith.mulf %550, %549 : vector<8x128xf32>
    %552 = math.tanh %551 : vector<8x128xf32>
    %cst_220 = arith.constant 5.000000e-01 : f32
    %553 = vector.broadcast %cst_220 : f32 to vector<8x128xf32>
    %554 = arith.mulf %553, %552 : vector<8x128xf32>
    %cst_221 = arith.constant 5.000000e-01 : f32
    %555 = vector.broadcast %cst_221 : f32 to vector<8x128xf32>
    %556 = arith.addf %554, %555 : vector<8x128xf32>
    %557 = vector.extract_strided_slice %548 {offsets = [0, 128], sizes = [8, 128], strides = [1, 1]} : vector<8x512xf32> to vector<8x128xf32>
    %cst_222 = arith.constant 5.000000e-01 : f32
    %558 = vector.broadcast %cst_222 : f32 to vector<8x128xf32>
    %559 = arith.mulf %558, %557 : vector<8x128xf32>
    %560 = math.tanh %559 : vector<8x128xf32>
    %cst_223 = arith.constant 5.000000e-01 : f32
    %561 = vector.broadcast %cst_223 : f32 to vector<8x128xf32>
    %562 = arith.mulf %561, %560 : vector<8x128xf32>
    %cst_224 = arith.constant 5.000000e-01 : f32
    %563 = vector.broadcast %cst_224 : f32 to vector<8x128xf32>
    %564 = arith.addf %562, %563 : vector<8x128xf32>
    %565 = vector.extract_strided_slice %548 {offsets = [0, 256], sizes = [8, 128], strides = [1, 1]} : vector<8x512xf32> to vector<8x128xf32>
    %566 = math.tanh %565 : vector<8x128xf32>
    %567 = vector.extract_strided_slice %548 {offsets = [0, 384], sizes = [8, 128], strides = [1, 1]} : vector<8x512xf32> to vector<8x128xf32>
    %cst_225 = arith.constant 5.000000e-01 : f32
    %568 = vector.broadcast %cst_225 : f32 to vector<8x128xf32>
    %569 = arith.mulf %568, %567 : vector<8x128xf32>
    %570 = math.tanh %569 : vector<8x128xf32>
    %cst_226 = arith.constant 5.000000e-01 : f32
    %571 = vector.broadcast %cst_226 : f32 to vector<8x128xf32>
    %572 = arith.mulf %571, %570 : vector<8x128xf32>
    %cst_227 = arith.constant 5.000000e-01 : f32
    %573 = vector.broadcast %cst_227 : f32 to vector<8x128xf32>
    %574 = arith.addf %572, %573 : vector<8x128xf32>
    %575 = arith.mulf %564, %537 : vector<8x128xf32>
    %576 = arith.mulf %556, %566 : vector<8x128xf32>
    %577 = arith.addf %575, %576 : vector<8x128xf32>
    %578 = math.tanh %577 : vector<8x128xf32>
    %579 = arith.mulf %574, %578 : vector<8x128xf32>
    %580 = arith.index_cast %c5_i32_215 : i32 to index
    %c0_228 = arith.constant 0 : index
    %c0_229 = arith.constant 0 : index
    %581 = vector.load %arg12[%580, %c0_228, %c0_229] : memref<8x8x128xf32, #tpu.memory_space<vmem>>, vector<1x8x128xf32>
    %582 = vector.shape_cast %581 : vector<1x8x128xf32> to vector<8x128xf32>
    %583 = vector.shape_cast %579 : vector<8x128xf32> to vector<1x8x128xf32>
    tpu.vector_store %arg12[%580, %c0_228, %c0_229], %583 {strides = array<i32>} : memref<8x8x128xf32, #tpu.memory_space<vmem>>, vector<1x8x128xf32>,
    %c6_i32_230 = arith.constant 6 : i32
    %584 = arith.index_cast %c6_i32_230 : i32 to index
    %c0_231 = arith.constant 0 : index
    %c0_232 = arith.constant 0 : index
    %585 = vector.load %arg11[%584, %c0_231, %c0_232] : memref<8x8x512xf32, #tpu.memory_space<vmem>>, vector<1x8x512xf32>
    %586 = vector.shape_cast %585 : vector<1x8x512xf32> to vector<8x512xf32>
    %cst_233 = arith.constant dense<0.000000e+00> : vector<8x512xf32>
    %587 = tpu.matmul %579, %341, %cst_233 {dimension_numbers = #tpu.dot_dimension_numbers<[1], [0], [0], [1], [0, 0, 1, 1], [], []>} : vector<8x128xf32>, vector<128x512xf32>, vector<8x512xf32> -> vector<8x512xf32>
    %588 = arith.addf %586, %587 : vector<8x512xf32>
    %589 = vector.extract_strided_slice %588 {offsets = [0, 0], sizes = [8, 128], strides = [1, 1]} : vector<8x512xf32> to vector<8x128xf32>
    %cst_234 = arith.constant 5.000000e-01 : f32
    %590 = vector.broadcast %cst_234 : f32 to vector<8x128xf32>
    %591 = arith.mulf %590, %589 : vector<8x128xf32>
    %592 = math.tanh %591 : vector<8x128xf32>
    %cst_235 = arith.constant 5.000000e-01 : f32
    %593 = vector.broadcast %cst_235 : f32 to vector<8x128xf32>
    %594 = arith.mulf %593, %592 : vector<8x128xf32>
    %cst_236 = arith.constant 5.000000e-01 : f32
    %595 = vector.broadcast %cst_236 : f32 to vector<8x128xf32>
    %596 = arith.addf %594, %595 : vector<8x128xf32>
    %597 = vector.extract_strided_slice %588 {offsets = [0, 128], sizes = [8, 128], strides = [1, 1]} : vector<8x512xf32> to vector<8x128xf32>
    %cst_237 = arith.constant 5.000000e-01 : f32
    %598 = vector.broadcast %cst_237 : f32 to vector<8x128xf32>
    %599 = arith.mulf %598, %597 : vector<8x128xf32>
    %600 = math.tanh %599 : vector<8x128xf32>
    %cst_238 = arith.constant 5.000000e-01 : f32
    %601 = vector.broadcast %cst_238 : f32 to vector<8x128xf32>
    %602 = arith.mulf %601, %600 : vector<8x128xf32>
    %cst_239 = arith.constant 5.000000e-01 : f32
    %603 = vector.broadcast %cst_239 : f32 to vector<8x128xf32>
    %604 = arith.addf %602, %603 : vector<8x128xf32>
    %605 = vector.extract_strided_slice %588 {offsets = [0, 256], sizes = [8, 128], strides = [1, 1]} : vector<8x512xf32> to vector<8x128xf32>
    %606 = math.tanh %605 : vector<8x128xf32>
    %607 = vector.extract_strided_slice %588 {offsets = [0, 384], sizes = [8, 128], strides = [1, 1]} : vector<8x512xf32> to vector<8x128xf32>
    %cst_240 = arith.constant 5.000000e-01 : f32
    %608 = vector.broadcast %cst_240 : f32 to vector<8x128xf32>
    %609 = arith.mulf %608, %607 : vector<8x128xf32>
    %610 = math.tanh %609 : vector<8x128xf32>
    %cst_241 = arith.constant 5.000000e-01 : f32
    %611 = vector.broadcast %cst_241 : f32 to vector<8x128xf32>
    %612 = arith.mulf %611, %610 : vector<8x128xf32>
    %cst_242 = arith.constant 5.000000e-01 : f32
    %613 = vector.broadcast %cst_242 : f32 to vector<8x128xf32>
    %614 = arith.addf %612, %613 : vector<8x128xf32>
    %615 = arith.mulf %604, %577 : vector<8x128xf32>
    %616 = arith.mulf %596, %606 : vector<8x128xf32>
    %617 = arith.addf %615, %616 : vector<8x128xf32>
    %618 = math.tanh %617 : vector<8x128xf32>
    %619 = arith.mulf %614, %618 : vector<8x128xf32>
    %620 = arith.index_cast %c6_i32_230 : i32 to index
    %c0_243 = arith.constant 0 : index
    %c0_244 = arith.constant 0 : index
    %621 = vector.load %arg12[%620, %c0_243, %c0_244] : memref<8x8x128xf32, #tpu.memory_space<vmem>>, vector<1x8x128xf32>
    %622 = vector.shape_cast %621 : vector<1x8x128xf32> to vector<8x128xf32>
    %623 = vector.shape_cast %619 : vector<8x128xf32> to vector<1x8x128xf32>
    tpu.vector_store %arg12[%620, %c0_243, %c0_244], %623 {strides = array<i32>} : memref<8x8x128xf32, #tpu.memory_space<vmem>>, vector<1x8x128xf32>,
    %c7_i32_245 = arith.constant 7 : i32
    %624 = arith.index_cast %c7_i32_245 : i32 to index
    %c0_246 = arith.constant 0 : index
    %c0_247 = arith.constant 0 : index
    %625 = vector.load %arg11[%624, %c0_246, %c0_247] : memref<8x8x512xf32, #tpu.memory_space<vmem>>, vector<1x8x512xf32>
    %626 = vector.shape_cast %625 : vector<1x8x512xf32> to vector<8x512xf32>
    %cst_248 = arith.constant dense<0.000000e+00> : vector<8x512xf32>
    %627 = tpu.matmul %619, %341, %cst_248 {dimension_numbers = #tpu.dot_dimension_numbers<[1], [0], [0], [1], [0, 0, 1, 1], [], []>} : vector<8x128xf32>, vector<128x512xf32>, vector<8x512xf32> -> vector<8x512xf32>
    %628 = arith.addf %626, %627 : vector<8x512xf32>
    %629 = vector.extract_strided_slice %628 {offsets = [0, 0], sizes = [8, 128], strides = [1, 1]} : vector<8x512xf32> to vector<8x128xf32>
    %cst_249 = arith.constant 5.000000e-01 : f32
    %630 = vector.broadcast %cst_249 : f32 to vector<8x128xf32>
    %631 = arith.mulf %630, %629 : vector<8x128xf32>
    %632 = math.tanh %631 : vector<8x128xf32>
    %cst_250 = arith.constant 5.000000e-01 : f32
    %633 = vector.broadcast %cst_250 : f32 to vector<8x128xf32>
    %634 = arith.mulf %633, %632 : vector<8x128xf32>
    %cst_251 = arith.constant 5.000000e-01 : f32
    %635 = vector.broadcast %cst_251 : f32 to vector<8x128xf32>
    %636 = arith.addf %634, %635 : vector<8x128xf32>
    %637 = vector.extract_strided_slice %628 {offsets = [0, 128], sizes = [8, 128], strides = [1, 1]} : vector<8x512xf32> to vector<8x128xf32>
    %cst_252 = arith.constant 5.000000e-01 : f32
    %638 = vector.broadcast %cst_252 : f32 to vector<8x128xf32>
    %639 = arith.mulf %638, %637 : vector<8x128xf32>
    %640 = math.tanh %639 : vector<8x128xf32>
    %cst_253 = arith.constant 5.000000e-01 : f32
    %641 = vector.broadcast %cst_253 : f32 to vector<8x128xf32>
    %642 = arith.mulf %641, %640 : vector<8x128xf32>
    %cst_254 = arith.constant 5.000000e-01 : f32
    %643 = vector.broadcast %cst_254 : f32 to vector<8x128xf32>
    %644 = arith.addf %642, %643 : vector<8x128xf32>
    %645 = vector.extract_strided_slice %628 {offsets = [0, 256], sizes = [8, 128], strides = [1, 1]} : vector<8x512xf32> to vector<8x128xf32>
    %646 = math.tanh %645 : vector<8x128xf32>
    %647 = vector.extract_strided_slice %628 {offsets = [0, 384], sizes = [8, 128], strides = [1, 1]} : vector<8x512xf32> to vector<8x128xf32>
    %cst_255 = arith.constant 5.000000e-01 : f32
    %648 = vector.broadcast %cst_255 : f32 to vector<8x128xf32>
    %649 = arith.mulf %648, %647 : vector<8x128xf32>
    %650 = math.tanh %649 : vector<8x128xf32>
    %cst_256 = arith.constant 5.000000e-01 : f32
    %651 = vector.broadcast %cst_256 : f32 to vector<8x128xf32>
    %652 = arith.mulf %651, %650 : vector<8x128xf32>
    %cst_257 = arith.constant 5.000000e-01 : f32
    %653 = vector.broadcast %cst_257 : f32 to vector<8x128xf32>
    %654 = arith.addf %652, %653 : vector<8x128xf32>
    %655 = arith.mulf %644, %617 : vector<8x128xf32>
    %656 = arith.mulf %636, %646 : vector<8x128xf32>
    %657 = arith.addf %655, %656 : vector<8x128xf32>
    %658 = math.tanh %657 : vector<8x128xf32>
    %659 = arith.mulf %654, %658 : vector<8x128xf32>
    %660 = arith.index_cast %c7_i32_245 : i32 to index
    %c0_258 = arith.constant 0 : index
    %c0_259 = arith.constant 0 : index
    %661 = vector.load %arg12[%660, %c0_258, %c0_259] : memref<8x8x128xf32, #tpu.memory_space<vmem>>, vector<1x8x128xf32>
    %662 = vector.shape_cast %661 : vector<1x8x128xf32> to vector<8x128xf32>
    %663 = vector.shape_cast %659 : vector<8x128xf32> to vector<1x8x128xf32>
    tpu.vector_store %arg12[%660, %c0_258, %c0_259], %663 {strides = array<i32>} : memref<8x8x128xf32, #tpu.memory_space<vmem>>, vector<1x8x128xf32>,
    %c8_i32_260 = arith.constant 8 : i32
    %c0_261 = arith.constant 0 : index
    %c0_262 = arith.constant 0 : index
    %c0_263 = arith.constant 0 : index
    %664 = vector.load %arg12[%c0_261, %c0_262, %c0_263] : memref<8x8x128xf32, #tpu.memory_space<vmem>>, vector<8x8x128xf32>
    %665 = vector.shape_cast %664 : vector<8x8x128xf32> to vector<64x128xf32>
    %c0_264 = arith.constant 0 : index
    %c0_265 = arith.constant 0 : index
    %666 = vector.load %arg8[%c0_264, %c0_265] : memref<128x1xf32, #tpu.memory_space<vmem>>, vector<128x1xf32>
    %cst_266 = arith.constant dense<0.000000e+00> : vector<64x1xf32>
    %667 = tpu.matmul %665, %666, %cst_266 {dimension_numbers = #tpu.dot_dimension_numbers<[1], [0], [0], [1], [0, 0, 1, 1], [], []>} : vector<64x128xf32>, vector<128x1xf32>, vector<64x1xf32> -> vector<64x1xf32>
    %c0_267 = arith.constant 0 : index
    %c0_268 = arith.constant 0 : index
    %668 = vector.load %arg9[%c0_267, %c0_268] : memref<1x1xf32, #tpu.memory_space<vmem>>, vector<1x1xf32>
    %669 = vector.broadcast %668 : vector<1x1xf32> to vector<64x1xf32>
    %670 = arith.addf %667, %669 : vector<64x1xf32>
    %671 = vector.shape_cast %670 : vector<64x1xf32> to vector<8x8x1xf32>
    %c0_269 = arith.constant 0 : index
    %c0_270 = arith.constant 0 : index
    %c0_271 = arith.constant 0 : index
    %672 = vector.load %arg10[%c0_269, %c0_270, %c0_271] : memref<8x8x1xf32, #tpu.memory_space<vmem>>, vector<8x8x1xf32>
    tpu.vector_store %arg10[%c0_269, %c0_270, %c0_271], %671 {strides = array<i32>} : memref<8x8x1xf32, #tpu.memory_space<vmem>>, vector<8x8x1xf32>,
    return
  }
  func.func @transform_0(%arg0: i32) -> (i32, i32, i32) {
    %c0_i32 = arith.constant 0 : i32
    %c0_i32_0 = arith.constant 0 : i32
    %c0_i32_1 = arith.constant 0 : i32
    return %c0_i32, %arg0, %c0_i32_0 : i32, i32, i32
  }
  func.func @transform_1(%arg0: i32) -> (i32, i32) {
    %c0_i32 = arith.constant 0 : i32
    %c0_i32_0 = arith.constant 0 : i32
    %c0_i32_1 = arith.constant 0 : i32
    return %c0_i32, %c0_i32_0 : i32, i32
  }
  func.func @transform_2(%arg0: i32) -> (i32, i32) {
    %c0_i32 = arith.constant 0 : i32
    %c0_i32_0 = arith.constant 0 : i32
    %c0_i32_1 = arith.constant 0 : i32
    return %c0_i32, %c0_i32_0 : i32, i32
  }
  func.func @transform_3(%arg0: i32) -> (i32, i32) {
    %c0_i32 = arith.constant 0 : i32
    %c0_i32_0 = arith.constant 0 : i32
    %c0_i32_1 = arith.constant 0 : i32
    return %c0_i32, %c0_i32_0 : i32, i32
  }
  func.func @transform_4(%arg0: i32) -> (i32, i32) {
    %c0_i32 = arith.constant 0 : i32
    %c0_i32_0 = arith.constant 0 : i32
    %c0_i32_1 = arith.constant 0 : i32
    return %c0_i32, %c0_i32_0 : i32, i32
  }
  func.func @transform_5(%arg0: i32) -> (i32, i32) {
    %c0_i32 = arith.constant 0 : i32
    %c0_i32_0 = arith.constant 0 : i32
    %c0_i32_1 = arith.constant 0 : i32
    return %c0_i32, %c0_i32_0 : i32, i32
  }
  func.func @transform_6(%arg0: i32) -> (i32, i32) {
    %c0_i32 = arith.constant 0 : i32
    %c0_i32_0 = arith.constant 0 : i32
    %c0_i32_1 = arith.constant 0 : i32
    return %c0_i32, %c0_i32_0 : i32, i32
  }
  func.func @transform_7(%arg0: i32) -> (i32, i32) {
    %c0_i32 = arith.constant 0 : i32
    %c0_i32_0 = arith.constant 0 : i32
    %c0_i32_1 = arith.constant 0 : i32
    return %c0_i32, %c0_i32_0 : i32, i32
  }
  func.func @transform_8(%arg0: i32) -> (i32, i32) {
    %c0_i32 = arith.constant 0 : i32
    %c0_i32_0 = arith.constant 0 : i32
    %c0_i32_1 = arith.constant 0 : i32
    return %c0_i32, %c0_i32_0 : i32, i32
  }
  func.func @transform_9(%arg0: i32) -> (i32, i32, i32) {
    %c0_i32 = arith.constant 0 : i32
    %c0_i32_0 = arith.constant 0 : i32
    %c0_i32_1 = arith.constant 0 : i32
    return %c0_i32, %arg0, %c0_i32_0 : i32, i32, i32
  }
}

</mosaic_0001>

<bundles_post_ra>
// kernel: lstm_model_forward.1
= control target key start
LH: loop header
LB: loop body
LE: loop exit
PB: predicated region body
PF: predicated region fallthrough
CT: control target
= control target key end

     0   :  { %s5186_s0 = inlined_call_operand.vmem [shape: f32[8,8,16], index: 0, kind: input, shape index: {}]   ;;  %s5187_s1 = inlined_call_operand.vmem [shape: f32[16,512], index: 1, kind: input, shape index: {}]   ;;  %s5188_s2 = inlined_call_operand.hbm [shape: f32[128,512], index: 2, kind: input, shape index: {}]   ;;  %s5189_s3 = inlined_call_operand.vmem [shape: f32[1,512], index: 3, kind: input, shape index: {}]   ;;  %s5190_s4 = inlined_call_operand.hbm [shape: f32[128,512], index: 4, kind: input, shape index: {}]   ;;  %s5191_s5 = inlined_call_operand.hbm [shape: f32[128,512], index: 5, kind: input, shape index: {}]   ;;  %s5192_s6 = inlined_call_operand.vmem [shape: f32[1,512], index: 6, kind: input, shape index: {}]   ;;  %s5193_s7 = inlined_call_operand.vmem [shape: f32[128,1], index: 7, kind: input, shape index: {}]   ;;  %s5194_s8 = inlined_call_operand.<no memory space> [shape: f32[1,1], index: 8, kind: input, shape index: {}]   ;;  %s5195_s9 = inlined_call_operand.vmem [shape: f32[8,8,1], index: 9, kind: output, shape index: {}]  }
   0x1   :  { %v14_v0 = vstv %s5194_s8 }
   0x2   :  { %15 = vst [vmem:[#allocation4] sm:$0x1] %v14_v0 }
   0x3   :  { %16 = vsyncpa [#allocation6], 0 }
   0x4   :  { %17 = vsyncpa [#allocation8], 0  ;;  %s41_s13 = sshll.u32 %s5190_s4, 4  ;;  %s2951_s14 = smov [#allocation7]   ;;  %s42_s13 = int_to_ptr.hbm [resolvable:$true] %s41_s13 }
   0x5   :  { %s43_s15 = sshll.u32 %s2951_s14, 4  ;;  %s26_s18 = sshll.u32 %s5188_s2, 4  ;;  %s44_s15 = int_to_ptr.vmem [resolvable:$true] %s43_s15  ;;  %s27_s18 = int_to_ptr.hbm [resolvable:$true] %s26_s18 }
   0x6   :  { %s2952_s19 = smov 512   ;;  %s2953_s20 = smov 32  }
   0x7   :  { %49 = dma.hbm_to_vmem [thread:$0]  %s42_s13, 8192, %s44_s15, [#allocation8], %s2952_s19, %s2952_s19, %s2953_s20  }
   0x8   :  { %s2954_s8 = smov [#allocation5]   ;;  %s54_s24 = sshll.u32 %s5191_s5, 4  ;;  %s55_s24 = int_to_ptr.hbm [resolvable:$true] %s54_s24 }
   0x9   :  { %s28_s21 = sshll.u32 %s2954_s8, 4  ;;  %s2955_s4 = smov [#allocation9]   ;;  %s29_s21 = int_to_ptr.vmem [resolvable:$true] %s28_s21 }
   0xa   :  { %34 = dma.hbm_to_vmem [thread:$0]  %s27_s18, 8192, %s29_s21, [#allocation6], %s2952_s19, %s2952_s19, %s2953_s20  }
   0xb   :  { %s56_s25 = sshll.u32 %s2955_s4, 4  ;;  %s57_s25 = int_to_ptr.vmem [resolvable:$true] %s56_s25 }
   0xc   :  { %62 = dma.hbm_to_vmem [thread:$0]  %s55_s24, 8192, %s57_s25, [#allocation8], %s2952_s19, %s2952_s19, %s2953_s20  }
   0xd   :  { %2947 = dma.done.wait [#allocation6], 8192  }
   0xe   :  { %2948 = vsyncadd [#allocation6], 4294959104 }
   0xf   :  { %2949 = dma.done.wait [#allocation8], 16384  }
  0x10   :  { %2950 = vsyncadd [#allocation8], 4294950912  ;;  %v93_v1 = vld [vmem:[%s5187_s1 + $0x20] sm:$0xff]  ;;  %v95_v2 = vld [vmem:[%s5187_s1 + $0x30] sm:$0xff]  ;;  %vm107_vm0 = vcmask 130048   ;;  %vm2529_vm1 = vcmask 7168  }
  0x11   :  { %v89_v3 = vld [vmem:[%s5187_s1] sm:$0xff]  ;;  %2576 = vmatpush.msra.mxu1 %v93_v1  ;;  %2577 = vmatpush.msra.mxu3 %v93_v1  ;;  %v91_v4 = vld [vmem:[%s5187_s1 + $0x10] sm:$0xff]  ;;  %v3039_v6 = vld [vmem:[%s5186_s0 + $0x28] sm:$0xff] }
  0x12   :  { %v3034_v5 = vld [vmem:[%s5186_s0 + $0x20] sm:$0xff]  ;;  %228 = vmatpush.msra.mxu2 %v95_v2  ;;  %146 = vmatpush.msra.mxu0 %v93_v1  ;;  %v96_v8 = vld [vmem:[%s5187_s1 + $0x38] sm:$0xff]  ;;  %v94_v9 = vld [vmem:[%s5187_s1 + $0x28] sm:$0xff] }
  0x13   :  { %v3044_v7 = vld [vmem:[%s5186_s0] sm:$0xff]  ;;  %2578 = vmatpush.msra.mxu1 %v89_v3  ;;  %2579 = vmatpush.msra.mxu3 %v89_v3  ;;  %v90_v11 = vld [vmem:[%s5187_s1 + $0x8] sm:$0xff]  ;;  %v92_v12 = vld [vmem:[%s5187_s1 + $0x18] sm:$0xff] }
  0x14   :  { %229 = vmatpush.msra.mxu2 %v91_v4  ;;  %2548 = vmatmul.msk.f32.vlgmr.msra.gmra.mxu1 %vm107_vm0, %v3034_v5  ;;  %v3054_v10 = vld [vmem:[#allocation5 + $0x1e0] sm:$0xff]  ;;  %v3068_v14 = vld [vmem:[#allocation5 + $0x1e8] sm:$0xff]  ;;  %v3075_v17 = vld [vmem:[#allocation5 + $0x1f8] sm:$0xff] }
  0x15   :  { %2549 = vmatmul.msk.f32.vlgmr.msra.gmra.mxu3 %vm107_vm0, %v3039_v6  ;;  %2560 = vmatmul.msk.f32.vlgmr.msra.gmra.mxu2 %vm107_vm0, %v3044_v7  ;;  %v3066_v13 = vld [vmem:[#allocation5 + $0x1c0] sm:$0xff]  ;;  %v3073_v16 = vld [vmem:[#allocation5 + $0x1c8] sm:$0xff]  ;;  %v3090_v20 = vld [vmem:[#allocation5 + $0x1d8] sm:$0xff] }
  0x16   :  { %269 = vmatpush.msrb.mxu3 %v96_v8  ;;  %187 = vmatpush.msrb.mxu1 %v94_v9  ;;  %v3071_v15 = vld [vmem:[#allocation5 + $0x1a0] sm:$0xff]  ;;  %v3082_v18 = vld [vmem:[%s5186_s0 + $0x30] sm:$0xff]  ;;  %v3103_v23 = vld [vmem:[#allocation5 + $0x1b8] sm:$0xff] }
  0x17   :  { %396 = vmatpush.msrb.mxu2 %v3054_v10  ;;  %147 = vmatpush.msra.mxu0 %v89_v3  ;;  %v3087_v19 = vld [vmem:[%s5186_s0 + $0x8] sm:$0xff]  ;;  %v3115_v26 = vld [vmem:[#allocation5 + $0x198] sm:$0xff]  ;;  %v3139_v32 = vld [vmem:[%s5186_s0 + $0x10] sm:$0xff] }
  0x18   :  { %188 = vmatpush.msrb.mxu1 %v90_v11  ;;  %270 = vmatpush.msrb.mxu3 %v92_v12  ;;  %v3095_v21 = vld [vmem:[#allocation5 + $0x180] sm:$0xff]  ;;  %v3098_v22 = vld [vmem:[#allocation5 + $0x1a8] sm:$0xff]  ;;  %v3125_v29 = vld [vmem:[#allocation5 + $0x178] sm:$0xff] }
  0x19   :  { %397 = vmatpush.msrb.mxu2 %v3066_v13  ;;  %2544 = vmatmul.msk.f32.vlgmr.msra.gmra.mxu0 %vm107_vm0, %v3044_v7  ;;  %v3109_v24 = vld [vmem:[#allocation5 + $0x160] sm:$0xff]  ;;  %v3111_v25 = vld [vmem:[#allocation5 + $0x188] sm:$0xff]  ;;  %v3134_v31 = vld [vmem:[%s5186_s0 + $0x38] sm:$0xff] }
  0x1a   :  { %416 = vmatpush.msra.mxu1 %v3068_v14  ;;  %456 = vmatpush.msra.mxu3 %v3075_v17  ;;  %v3117_v27 = vld [vmem:[#allocation5 + $0x140] sm:$0xff]  ;;  %v3120_v28 = vld [vmem:[#allocation5 + $0x168] sm:$0xff]  ;;  %v3152_v35 = vld [vmem:[#allocation5 + $0x158] sm:$0xff] }
  0x1b   :  { %398 = vmatpush.msrb.mxu2 %v3071_v15  ;;  %504 = vmatpush.msrb.mxu0 %v3054_v10  ;;  %v3127_v30 = vld [vmem:[#allocation5 + $0x120] sm:$0xff]  ;;  %v3145_v34 = vld [vmem:[#allocation5 + $0x148] sm:$0xff]  ;;  %v3164_v38 = vld [vmem:[#allocation5 + $0x138] sm:$0xff] }
  0x1c   :  { %417 = vmatpush.msra.mxu1 %v3073_v16  ;;  %457 = vmatpush.msra.mxu3 %v3090_v20  ;;  %v3143_v33 = vld [vmem:[#allocation5 + $0x100] sm:$0xff]  ;;  %v3160_v37 = vld [vmem:[#allocation5 + $0x128] sm:$0xff]  ;;  %v3174_v41 = vld [vmem:[#allocation5 + $0x118] sm:$0xff] }
  0x1d   :  { %2552 = vmatmul.msk.f32.vlgmr.msrb.gmra.mxu1 %vm107_vm0, %v3044_v7  ;;  %2550 = vmatmul.msk.f32.gmra.mxu3 %vm107_vm0, %v3082_v18  ;;  %v3158_v36 = vld [vmem:[#allocation5 + $0xe0] sm:$0xff]  ;;  %v3169_v40 = vld [vmem:[#allocation5 + $0x108] sm:$0xff]  ;;  %v3184_v43 = vld [vmem:[%s5186_s0 + $0x18] sm:$0xff] }
  0x1e   :  { %2561 = vmatmul.msk.f32.gmra.mxu2 %vm107_vm0, %v3087_v19  ;;  %418 = vmatpush.msra.mxu1 %v3098_v22  ;;  %v3166_v39 = vld [vmem:[#allocation5 + $0xc0] sm:$0xff]  ;;  %v3190_v45 = vld [vmem:[#allocation5 + $0xe8] sm:$0xff]  ;;  %v3205_v48 = vld [vmem:[#allocation5 + $0xf8] sm:$0xff] }
  0x1f   :  { %399 = vmatpush.msrb.mxu2 %v3095_v21  ;;  %458 = vmatpush.msra.mxu3 %v3103_v23  ;;  %v3176_v42 = vld [vmem:[#allocation5 + $0xa0] sm:$0xff]  ;;  %v3203_v47 = vld [vmem:[#allocation5 + $0xc8] sm:$0xff]  ;;  %v3209_v49 = vld [vmem:[#allocation5 + $0xd8] sm:$0xff] }
  0x20   :  { %419 = vmatpush.msra.mxu1 %v3111_v25  ;;  %505 = vmatpush.msrb.mxu0 %v3066_v13  ;;  %v3188_v44 = vld [vmem:[#allocation5 + $0x80] sm:$0xff]  ;;  %v3214_v51 = vld [vmem:[#allocation5 + $0xa8] sm:$0xff]  ;;  %v3233_v55 = vld [vmem:[#allocation5 + $0x1f0] sm:$0xff] }
  0x21   :  { %400 = vmatpush.msrb.mxu2 %v3109_v24  ;;  %459 = vmatpush.msra.mxu3 %v3115_v26  ;;  %5390 = vst [vmem:[#allocation12_spill] sm:$0xff] %v3188_v44  ;;  %v3201_v46 = vld [vmem:[#allocation5 + $0x60] sm:$0xff]  ;;  %v3227_v54 = vld [vmem:[#allocation5 + $0x88] sm:$0xff]  ;;  %v3239_v56 = vld [vmem:[#allocation5 + $0xb8] sm:$0xff] }
  0x22   :  { %420 = vmatpush.msra.mxu1 %v3120_v28  ;;  %506 = vmatpush.msrb.mxu0 %v3071_v15  ;;  %5391 = vst [vmem:[#allocation13_spill] sm:$0xff] %v3201_v46  ;;  %v3211_v50 = vld [vmem:[#allocation5 + $0x40] sm:$0xff]  ;;  %v3241_v57 = vld [vmem:[#allocation5 + $0x68] sm:$0xff]  ;;  %v3244_v58 = vld [vmem:[#allocation5 + $0x1d0] sm:$0xff] }
  0x23   :  { %401 = vmatpush.msrb.mxu2 %v3117_v27  ;;  %460 = vmatpush.msra.mxu3 %v3125_v29  ;;  %5392 = vst [vmem:[#allocation14_spill] sm:$0xff] %v3211_v50  ;;  %v3219_v52 = vld [vmem:[#allocation5 + $0x20] sm:$0xff]  ;;  %v3247_v59 = vld [vmem:[#allocation5 + $0x98] sm:$0xff]  ;;  %v3251_v60 = vld [vmem:[#allocation5 + $0x48] sm:$0xff] }
  0x24   :  { %421 = vmatpush.msra.mxu1 %v3145_v34  ;;  %507 = vmatpush.msrb.mxu0 %v3095_v21  ;;  %5393 = vst [vmem:[#allocation15_spill] sm:$0xff] %v3219_v52  ;;  %v3225_v53 = vld [vmem:[#allocation5] sm:$0xff]  ;;  %v3253_v61 = vld [vmem:[#allocation5 + $0x1b0] sm:$0xff]  ;;  %v3265_v63 = vld [vmem:[#allocation5 + $0x28] sm:$0xff] }
  0x25   :  { %2553 = vmatmul.msk.f32.gmra.mxu1 %vm107_vm0, %v3087_v19  ;;  %402 = vmatpush.msrb.mxu2 %v3127_v30  ;;  %5394 = vst [vmem:[#allocation16_spill] sm:$0xff] %v3225_v53  ;;  %v3263_v62 = vld [vmem:[#allocation5 + $0x190] sm:$0xff]  ;;  %v3276_v1 = vld [vmem:[#allocation5 + $0x8] sm:$0xff]  ;;  %v3278_v2 = vld [vmem:[#allocation5 + $0x78] sm:$0xff] }
  0x26   :  { %2551 = vmatmul.msk.f32.gmra.mxu3 %vm107_vm0, %v3134_v31  ;;  %2562 = vmatmul.msk.f32.gmra.mxu2 %vm107_vm0, %v3139_v32  ;;  %5395 = vst [vmem:[#allocation17_spill] sm:$0xff] %v3227_v54  ;;  %v3274_v0 = vld [vmem:[#allocation5 + $0x170] sm:$0xff]  ;;  %v3282_v3 = vld [vmem:[#allocation5 + $0x58] sm:$0xff] }
  0x27   :  { %403 = vmatpush.msrb.mxu2 %v3143_v33  ;;  %461 = vmatpush.msra.mxu3 %v3152_v35  ;;  %5396 = vst [vmem:[#allocation18_spill] sm:$0xff] %v3239_v56  ;;  %v3284_v4 = vld [vmem:[#allocation5 + $0x150] sm:$0xff]  ;;  %v3310_v11 = vld [vmem:[#allocation5 + $0x38] sm:$0xff] }
  0x28   :  { %422 = vmatpush.msra.mxu1 %v3160_v37  ;;  %2545 = vmatmul.msk.f32.gmra.mxu0 %vm107_vm0, %v3087_v19  ;;  %5397 = vst [vmem:[#allocation19_spill] sm:$0xff] %v3241_v57  ;;  %v3296_v8 = vld [vmem:[#allocation5 + $0x110] sm:$0xff]  ;;  %v3312_v12 = vld [vmem:[#allocation5 + $0x18] sm:$0xff] }
  0x29   :  { %404 = vmatpush.msrb.mxu2 %v3158_v36  ;;  %462 = vmatpush.msra.mxu3 %v3164_v38  ;;  %5398 = vst [vmem:[#allocation20_spill] sm:$0xff] %v3247_v59  ;;  %v3308_v9 = vld [vmem:[#allocation5 + $0xf0] sm:$0xff] }
  0x2a   :  { %423 = vmatpush.msra.mxu1 %v3169_v40  ;;  %508 = vmatpush.msrb.mxu0 %v3109_v24  ;;  %5399 = vst [vmem:[#allocation21_spill] sm:$0xff] %v3251_v60 }
  0x2b   :  { %405 = vmatpush.msrb.mxu2 %v3166_v39  ;;  %463 = vmatpush.msra.mxu3 %v3174_v41  ;;  %5400 = vst [vmem:[#allocation22_spill] sm:$0xff] %v3265_v63 }
  0x2c   :  { %424 = vmatpush.msra.mxu1 %v3190_v45  ;;  %509 = vmatpush.msrb.mxu0 %v3117_v27  ;;  %5401 = vst [vmem:[#allocation23_spill] sm:$0xff] %v3276_v1 }
  0x2d   :  { %2554 = vmatmul.msk.f32.gmra.mxu1 %vm107_vm0, %v3139_v32  ;;  %406 = vmatpush.msrb.mxu2 %v3176_v42  ;;  %5402 = vst [vmem:[#allocation24_spill] sm:$0xff] %v3278_v2 }
  0x2e   :  { %2563 = vmatmul.msk.f32.gmra.mxu2 %vm107_vm0, %v3184_v43  ;;  %2568 = vmatmul.msk.f32.vlgmr.msrb.gmra.mxu3 %vm107_vm0, %v3044_v7  ;;  %5403 = vst [vmem:[#allocation25_spill] sm:$0xff] %v3282_v3  ;;  %v3290_v7 = vld [vmem:[#allocation5 + $0x130] sm:$0xff] }
  0x2f   :  { %407 = vmatpush.msrb.mxu2 %v3188_v44  ;;  %464 = vmatpush.msra.mxu3 %v3205_v48  ;;  %5404 = vst [vmem:[#allocation26_spill] sm:$0xff] %v3310_v11 }
  0x30   :  { %425 = vmatpush.msra.mxu1 %v3203_v47  ;;  %510 = vmatpush.msrb.mxu0 %v3127_v30  ;;  %5405 = vst [vmem:[#allocation27_spill] sm:$0xff] %v3312_v12 }
  0x31   :  { %408 = vmatpush.msrb.mxu2 %v3201_v46  ;;  %465 = vmatpush.msra.mxu3 %v3209_v49 }
  0x32   :  { %426 = vmatpush.msra.mxu1 %v3214_v51  ;;  %511 = vmatpush.msrb.mxu0 %v3143_v33 }
  0x33   :  { %409 = vmatpush.msrb.mxu2 %v3211_v50  ;;  %466 = vmatpush.msra.mxu3 %v3239_v56 }
  0x34   :  { %427 = vmatpush.msra.mxu1 %v3227_v54  ;;  %2546 = vmatmul.msk.f32.gmra.mxu0 %vm107_vm0, %v3139_v32 }
  0x35   :  { %2555 = vmatmul.msk.f32.gmra.mxu1 %vm107_vm0, %v3184_v43  ;;  %410 = vmatpush.msrb.mxu2 %v3219_v52 }
  0x36   :  { %2564 = vmatmul.msk.f32.gmra.mxu2 %vm107_vm0, %v3034_v5  ;;  %2569 = vmatmul.msk.f32.gmra.mxu3 %vm107_vm0, %v3087_v19  ;;  %v3316_v19 = vld [vmem:[#allocation5 + $0xd0] sm:$0xff] }
  0x37   :  { %411 = vmatpush.msrb.mxu2 %v3225_v53  ;;  %428 = vmatpush.msra.mxu1 %v3241_v57 }
  0x38   :  { %467 = vmatpush.msra.mxu3 %v3247_v59  ;;  %512 = vmatpush.msrb.mxu0 %v3158_v36 }
  0x39   :  { %436 = vmatpush.msra.mxu2 %v3233_v55  ;;  %429 = vmatpush.msra.mxu1 %v3251_v60 }
  0x3a   :  { %513 = vmatpush.msrb.mxu0 %v3166_v39  ;;  %468 = vmatpush.msra.mxu3 %v3278_v2 }
  0x3b   :  { %437 = vmatpush.msra.mxu2 %v3244_v58  ;;  %430 = vmatpush.msra.mxu1 %v3265_v63 }
  0x3c   :  { %514 = vmatpush.msrb.mxu0 %v3176_v42  ;;  %469 = vmatpush.msra.mxu3 %v3282_v3 }
  0x3d   :  { %438 = vmatpush.msra.mxu2 %v3253_v61  ;;  %2556 = vmatmul.msk.f32.gmra.mxu1 %vm107_vm0, %v3034_v5 }
  0x3e   :  { %2565 = vmatmul.msk.f32.gmra.mxu2 %vm107_vm0, %v3039_v6  ;;  %2570 = vmatmul.msk.f32.gmra.mxu3 %vm107_vm0, %v3139_v32  ;;  %v3322_v32 = vld [vmem:[#allocation5 + $0xb0] sm:$0xff] }
  0x3f   :  { %439 = vmatpush.msra.mxu2 %v3263_v62  ;;  %431 = vmatpush.msra.mxu1 %v3276_v1  ;;  %5406 = vst [vmem:[#allocation28_spill] sm:$0xff] %v3322_v32 }
  0x40   :  { %515 = vmatpush.msrb.mxu0 %v3188_v44  ;;  %470 = vmatpush.msra.mxu3 %v3310_v11  ;;  %v3349_v44 = vld [vmem:[#allocation5 + $0x30] sm:$0xff] }
  0x41   :  { %440 = vmatpush.msra.mxu2 %v3274_v0  ;;  %524 = vmatpush.msrb.mxu1 %v3068_v14  ;;  %5410 = vst [vmem:[#allocation32_spill] sm:$0xff] %v3349_v44 }
  0x42   :  { %2547 = vmatmul.msk.f32.gmra.mxu0 %vm107_vm0, %v3184_v43  ;;  %471 = vmatpush.msra.mxu3 %v3312_v12 }
  0x43   :  { %441 = vmatpush.msra.mxu2 %v3284_v4  ;;  %525 = vmatpush.msrb.mxu1 %v3073_v16 }
  0x44   :  { %516 = vmatpush.msrb.mxu0 %v3201_v46  ;;  %564 = vmatpush.msrb.mxu3 %v3075_v17  ;;  %v3339_v46 = vld [vmem:[#allocation5 + $0x70] sm:$0xff] }
  0x45   :  { %2557 = vmatmul.msk.f32.gmra.mxu1 %vm107_vm0, %v3039_v6  ;;  %442 = vmatpush.msra.mxu2 %v3290_v7  ;;  %5408 = vst [vmem:[#allocation30_spill] sm:$0xff] %v3339_v46 }
  0x46   :  { %2566 = vmatmul.msk.f32.gmra.mxu2 %vm107_vm0, %v3082_v18  ;;  %2571 = vmatmul.msk.f32.gmra.mxu3 %vm107_vm0, %v3184_v43  ;;  %v3328_v43 = vld [vmem:[#allocation5 + $0x90] sm:$0xff] }
  0x47   :  { %443 = vmatpush.msra.mxu2 %v3296_v8  ;;  %526 = vmatpush.msrb.mxu1 %v3098_v22  ;;  %5407 = vst [vmem:[#allocation29_spill] sm:$0xff] %v3328_v43 }
  0x48   :  { %517 = vmatpush.msrb.mxu0 %v3211_v50  ;;  %565 = vmatpush.msrb.mxu3 %v3090_v20  ;;  %v3343_v50 = vld [vmem:[#allocation5 + $0x50] sm:$0xff] }
  0x49   :  { %444 = vmatpush.msra.mxu2 %v3308_v9  ;;  %527 = vmatpush.msrb.mxu1 %v3111_v25  ;;  %5409 = vst [vmem:[#allocation31_spill] sm:$0xff] %v3343_v50 }
  0x4a   :  { %566 = vmatpush.msrb.mxu3 %v3103_v23  ;;  %518 = vmatpush.msrb.mxu0 %v3219_v52  ;;  %v5204_v52 = vmov 0.0  }
  0x4b   :  { %445 = vmatpush.msra.mxu2 %v3316_v19  ;;  %528 = vmatpush.msrb.mxu1 %v3120_v28 }
  0x4c   :  { %567 = vmatpush.msrb.mxu3 %v3115_v26  ;;  %519 = vmatpush.msrb.mxu0 %v3225_v53 }
  0x4d   :  { %2558 = vmatmul.msk.f32.gmra.mxu1 %vm107_vm0, %v3082_v18  ;;  %446 = vmatpush.msra.mxu2 %v3322_v32 }
  0x4e   :  { %2567 = vmatmul.msk.f32.gmra.mxu2 %vm107_vm0, %v3134_v31  ;;  %2572 = vmatmul.msk.f32.gmra.mxu3 %vm107_vm0, %v3034_v5  ;;  %v3355_v5 = vld [vmem:[#allocation5 + $0x10] sm:$0xff] }
  0x4f   :  { %447 = vmatpush.msra.mxu2 %v3328_v43  ;;  %529 = vmatpush.msrb.mxu1 %v3145_v34  ;;  %5411 = vst [vmem:[#allocation33_spill] sm:$0xff] %v3355_v5 }
  0x50   :  { %568 = vmatpush.msrb.mxu3 %v3125_v29  ;;  %613 = vmatpush.msra.mxu0 %v3054_v10 }
  0x51   :  { %448 = vmatpush.msra.mxu2 %v3339_v46  ;;  %530 = vmatpush.msrb.mxu1 %v3160_v37 }
  0x52   :  { %569 = vmatpush.msrb.mxu3 %v3152_v35  ;;  %614 = vmatpush.msra.mxu0 %v3066_v13 }
  0x53   :  { %449 = vmatpush.msra.mxu2 %v3343_v50  ;;  %531 = vmatpush.msrb.mxu1 %v3169_v40 }
  0x54   :  { %570 = vmatpush.msrb.mxu3 %v3164_v38  ;;  %615 = vmatpush.msra.mxu0 %v3071_v15 }
  0x55   :  { %2559 = vmatmul.msk.f32.gmra.mxu1 %vm107_vm0, %v3134_v31  ;;  %450 = vmatpush.msra.mxu2 %v3349_v44 }
  0x56   :  { %2573 = vmatmul.msk.f32.gmra.mxu3 %vm107_vm0, %v3039_v6  ;;  %412 = vmatmul.f32.vlgmr.msrb.gmra.mxu2 %v5204_v52  ;;  %v5412_v6 = vld [vmem:[#allocation12_spill] sm:$0xff] }
  0x57   :  { %451 = vmatpush.msra.mxu2 %v3355_v5  ;;  %532 = vmatpush.msrb.mxu1 %v3190_v45 }
  0x58   :  { %571 = vmatpush.msrb.mxu3 %v3174_v41  ;;  %616 = vmatpush.msra.mxu0 %v3095_v21 }
  0x59   :  { %544 = vmatpush.msrb.mxu2 %v3233_v55  ;;  %533 = vmatpush.msrb.mxu1 %v3203_v47 }
  0x5a   :  { %572 = vmatpush.msrb.mxu3 %v3205_v48  ;;  %617 = vmatpush.msra.mxu0 %v3109_v24 }
  0x5b   :  { %545 = vmatpush.msrb.mxu2 %v3244_v58  ;;  %534 = vmatpush.msrb.mxu1 %v3214_v51 }
  0x5c   :  { %573 = vmatpush.msrb.mxu3 %v3209_v49  ;;  %618 = vmatpush.msra.mxu0 %v3117_v27 }
  0x5d   :  { %546 = vmatpush.msrb.mxu2 %v3253_v61  ;;  %432 = vmatmul.f32.vlgmr.msra.gmra.mxu1 %v5204_v52 }
  0x5e   :  { %2574 = vmatmul.msk.f32.gmra.mxu3 %vm107_vm0, %v3082_v18  ;;  %452 = vmatmul.f32.vlgmr.msra.gmra.mxu2 %v5204_v52  ;;  %v5413_v18 = vld [vmem:[#allocation13_spill] sm:$0xff] }
  0x5f   :  { %547 = vmatpush.msrb.mxu2 %v3263_v62  ;;  %535 = vmatpush.msrb.mxu1 %v3227_v54 }
  0x60   :  { %574 = vmatpush.msrb.mxu3 %v3239_v56  ;;  %619 = vmatpush.msra.mxu0 %v3127_v30 }
  0x61   :  { %548 = vmatpush.msrb.mxu2 %v3274_v0  ;;  %536 = vmatpush.msrb.mxu1 %v3241_v57 }
  0x62   :  { %575 = vmatpush.msrb.mxu3 %v3247_v59  ;;  %620 = vmatpush.msra.mxu0 %v3143_v33 }
  0x63   :  { %549 = vmatpush.msrb.mxu2 %v3284_v4  ;;  %537 = vmatpush.msrb.mxu1 %v3251_v60 }
  0x64   :  { %576 = vmatpush.msrb.mxu3 %v3278_v2  ;;  %621 = vmatpush.msra.mxu0 %v3158_v36 }
  0x65   :  { %550 = vmatpush.msrb.mxu2 %v3290_v7  ;;  %538 = vmatpush.msrb.mxu1 %v3265_v63 }
  0x66   :  { %2575 = vmatmul.msk.f32.gmra.mxu3 %vm107_vm0, %v3134_v31  ;;  %622 = vmatpush.msra.mxu0 %v3166_v39  ;;  %v5414_v31 = vld [vmem:[#allocation14_spill] sm:$0xff] }
  0x67   :  { %551 = vmatpush.msrb.mxu2 %v3296_v8  ;;  %577 = vmatpush.msrb.mxu3 %v3282_v3 }
  0x68   :  { %539 = vmatpush.msrb.mxu1 %v3276_v1  ;;  %623 = vmatpush.msra.mxu0 %v3176_v42 }
  0x69   :  { %552 = vmatpush.msrb.mxu2 %v3308_v9  ;;  %578 = vmatpush.msrb.mxu3 %v3310_v11 }
  0x6a   :  { %633 = vmatpush.msra.mxu1 %v3068_v14  ;;  %624 = vmatpush.msra.mxu0 %v5412_v6 }
  0x6b   :  { %553 = vmatpush.msrb.mxu2 %v3316_v19  ;;  %579 = vmatpush.msrb.mxu3 %v3312_v12 }
  0x6c   :  { %634 = vmatpush.msra.mxu1 %v3073_v16  ;;  %625 = vmatpush.msra.mxu0 %v5413_v18 }
  0x6d   :  { %554 = vmatpush.msrb.mxu2 %v3322_v32 }
  0x6e   :  { %472 = vmatmul.f32.vlgmr.msra.gmra.mxu3 %v5204_v52  ;;  %635 = vmatpush.msra.mxu1 %v3098_v22  ;;  %v5415_v52 = vld [vmem:[#allocation15_spill] sm:$0xff] }
  0x6f   :  { %555 = vmatpush.msrb.mxu2 %v3328_v43  ;;  %673 = vmatpush.msra.mxu3 %v3075_v17 }
  0x70   :  { %636 = vmatpush.msra.mxu1 %v3111_v25  ;;  %626 = vmatpush.msra.mxu0 %v5414_v31 }
  0x71   :  { %556 = vmatpush.msrb.mxu2 %v3339_v46  ;;  %674 = vmatpush.msra.mxu3 %v3090_v20 }
  0x72   :  { %637 = vmatpush.msra.mxu1 %v3120_v28  ;;  %627 = vmatpush.msra.mxu0 %v5415_v52 }
  0x73   :  { %557 = vmatpush.msrb.mxu2 %v3343_v50  ;;  %675 = vmatpush.msra.mxu3 %v3103_v23 }
  0x74   :  { %638 = vmatpush.msra.mxu1 %v3145_v34  ;;  %628 = vmatpush.msra.mxu0 %v3225_v53 }
  0x75   :  { %558 = vmatpush.msrb.mxu2 %v3349_v44  ;;  %676 = vmatpush.msra.mxu3 %v3115_v26 }
  0x76   :  { %639 = vmatpush.msra.mxu1 %v3160_v37 }
  0x77   :  { %559 = vmatpush.msrb.mxu2 %v3355_v5  ;;  %677 = vmatpush.msra.mxu3 %v3125_v29 }
  0x78   :  { %640 = vmatpush.msra.mxu1 %v3169_v40 }
  0x79   :  { %653 = vmatpush.msra.mxu2 %v3233_v55  ;;  %678 = vmatpush.msra.mxu3 %v3152_v35 }
  0x7a   :  { %641 = vmatpush.msra.mxu1 %v3190_v45 }
  0x7b   :  { %654 = vmatpush.msra.mxu2 %v3244_v58  ;;  %679 = vmatpush.msra.mxu3 %v3164_v38 }
  0x7c   :  { %642 = vmatpush.msra.mxu1 %v3203_v47 }
  0x7d   :  { %655 = vmatpush.msra.mxu2 %v3253_v61  ;;  %680 = vmatpush.msra.mxu3 %v3174_v41 }
  0x7e   :  { %643 = vmatpush.msra.mxu1 %v3214_v51 }
  0x7f   :  { %656 = vmatpush.msra.mxu2 %v3263_v62  ;;  %681 = vmatpush.msra.mxu3 %v3205_v48 }
  0x80   :  { %644 = vmatpush.msra.mxu1 %v3227_v54 }
  0x81   :  { %657 = vmatpush.msra.mxu2 %v3274_v0  ;;  %682 = vmatpush.msra.mxu3 %v3209_v49 }
  0x82   :  { %645 = vmatpush.msra.mxu1 %v3241_v57 }
  0x83   :  { %658 = vmatpush.msra.mxu2 %v3284_v4  ;;  %683 = vmatpush.msra.mxu3 %v3239_v56 }
  0x84   :  { %646 = vmatpush.msra.mxu1 %v3251_v60 }
  0x85   :  { %659 = vmatpush.msra.mxu2 %v3290_v7  ;;  %684 = vmatpush.msra.mxu3 %v3247_v59 }
  0x86   :  { %647 = vmatpush.msra.mxu1 %v3265_v63 }
  0x87   :  { %660 = vmatpush.msra.mxu2 %v3296_v8  ;;  %685 = vmatpush.msra.mxu3 %v3278_v2 }
  0x88   :  { %648 = vmatpush.msra.mxu1 %v3276_v1 }
  0x89   :  { %661 = vmatpush.msra.mxu2 %v3308_v9  ;;  %686 = vmatpush.msra.mxu3 %v3282_v3 }
  0x8b   :  { %662 = vmatpush.msra.mxu2 %v3316_v19  ;;  %687 = vmatpush.msra.mxu3 %v3310_v11 }
  0x8d   :  { %663 = vmatpush.msra.mxu2 %v3322_v32  ;;  %688 = vmatpush.msra.mxu3 %v3312_v12 }
  0x8f   :  { %664 = vmatpush.msra.mxu2 %v3328_v43 }
  0x91   :  { %665 = vmatpush.msra.mxu2 %v3339_v46  ;;  %v3468_v53 = vpop.f32.mrf.mxu1 }
  0x92   :  { %5416 = vst [vmem:[#allocation34_spill] sm:$0xff] %v3468_v53 }
  0x93   :  { %666 = vmatpush.msra.mxu2 %v3343_v50 }
  0x95   :  { %667 = vmatpush.msra.mxu2 %v3349_v44 }
  0x97   :  { %668 = vmatpush.msra.mxu2 %v3355_v5 }
  0x98   :  { %v3473_v1 = vpop.f32.mrf.mxu3  ;;  %v231_v63 = vpop.f32.mrf.mxu2 }
  0x99   :  { %5417 = vst [vmem:[#allocation35_spill] sm:$0xff] %v3473_v1 }
  0x9a   :  { %v190_v11 = vpop.f32.mrf.mxu1 }
  0xa0   :  { %v3475_v52 = vpop.f32.mrf.mxu3 }
  0xa1   :  { %5418 = vst [vmem:[#allocation36_spill] sm:$0xff] %v3475_v52  ;;  %v3477_v3 = vpop.f32.mrf.mxu2 }
  0xa2   :  { %5419 = vst [vmem:[#allocation37_spill] sm:$0xff] %v3477_v3  ;;  %v3479_v12 = vpop.f32.mrf.mxu1 }
  0xa3   :  { %5420 = vst [vmem:[#allocation38_spill] sm:$0xff] %v3479_v12 }
  0xa9   :  { %v3481_v60 = vpop.f32.mrf.mxu3  ;;  %v3483_v31 = vpop.f32.mrf.mxu2 }
  0xaa   :  { %5421 = vst [vmem:[#allocation39_spill] sm:$0xff] %v3481_v60  ;;  %v3485_v53 = vpop.f32.mrf.mxu1 }
  0xab   :  { %5422 = vst [vmem:[#allocation40_spill] sm:$0xff] %v3483_v31 }
  0xac   :  { %5423 = vst [vmem:[#allocation41_spill] sm:$0xff] %v3485_v53 }
  0xb1   :  { %v3487_v50 = vpop.f32.mrf.mxu2  ;;  %v272_v44 = vpop.f32.mrf.mxu3 }
  0xb2   :  { %5424 = vst [vmem:[#allocation42_spill] sm:$0xff] %v3487_v50  ;;  %v3489_v5 = vpop.f32.mrf.mxu1 }
  0xb3   :  { %5425 = vst [vmem:[#allocation43_spill] sm:$0xff] %v3489_v5 }
  0xb9   :  { %v3491_v1 = vpop.f32.mrf.mxu2  ;;  %v3493_v2 = vpop.f32.mrf.mxu3 }
  0xba   :  { %5426 = vst [vmem:[#allocation44_spill] sm:$0xff] %v3491_v1  ;;  %v3495_v52 = vpop.f32.mrf.mxu1  ;;  %v97_v1 = vld [vmem:[%s5189_s3] sm:$0xf] }
  0xbb   :  { %5427 = vst [vmem:[#allocation45_spill] sm:$0xff] %v3493_v2 }
  0xbc   :  { %5428 = vst [vmem:[#allocation46_spill] sm:$0xff] %v3495_v52 }
  0xc1   :  { %v3497_v3 = vpop.f32.mrf.mxu2  ;;  %v3499_v12 = vpop.f32.mrf.mxu3 }
  0xc2   :  { %5429 = vst [vmem:[#allocation47_spill] sm:$0xff] %v3497_v3  ;;  %v3501_v60 = vpop.f32.mrf.mxu1  ;;  %v149_v3 = vpop.f32.mrf.mxu0 }
  0xc3   :  { %5430 = vst [vmem:[#allocation48_spill] sm:$0xff] %v3499_v12  ;;  %v3518_v12 = vperm.slane %v97_v1, 0 }
  0xc4   :  { %5431 = vst [vmem:[#allocation49_spill] sm:$0xff] %v3501_v60  ;;  %v3520_v60 = vperm.slane %v97_v1, 1 }
  0xc5   :  { %5438 = vst [vmem:[#allocation56_spill] sm:$0xff] %v3518_v12 }
  0xc6   :  { %5439 = vst [vmem:[#allocation57_spill] sm:$0xff] %v3520_v60 }
  0xc9   :  { %v3503_v31 = vpop.f32.mrf.mxu2  ;;  %v3505_v53 = vpop.f32.mrf.mxu3 }
  0xca   :  { %5432 = vst [vmem:[#allocation50_spill] sm:$0xff] %v3503_v31  ;;  %v3507_v50 = vpop.f32.mrf.mxu1  ;;  %v150_v31 = vadd.f32 %v149_v3, %v3518_v12 }
  0xcb   :  { %5433 = vst [vmem:[#allocation51_spill] sm:$0xff] %v3505_v53  ;;  %v191_v53 = vadd.f32 %v190_v11, %v3520_v60 }
  0xcc   :  { %5434 = vst [vmem:[#allocation52_spill] sm:$0xff] %v3507_v50 }
  0xd1   :  { %v3512_v5 = vpop.f32.mrf.mxu2  ;;  %v3514_v2 = vpop.f32.mrf.mxu3 }
  0xd2   :  { %5435 = vst [vmem:[#allocation53_spill] sm:$0xff] %v3512_v5  ;;  %v3516_v52 = vpop.f32.mrf.mxu1 }
  0xd3   :  { %5436 = vst [vmem:[#allocation54_spill] sm:$0xff] %v3514_v2  ;;  %v3526_v2 = vperm.slane %v97_v1, 2 }
  0xd4   :  { %5437 = vst [vmem:[#allocation55_spill] sm:$0xff] %v3516_v52 }
  0xd5   :  { %v232_v6 = vadd.f32 %v231_v63, %v3526_v2 }
  0xd9   :  { %v3524_v50 = vpop.f32.mrf.mxu3  ;;  %v413_v46 = vpop.f32.mrf.mxu2 }
  0xda   :  { %5440 = vst [vmem:[#allocation58_spill] sm:$0xff] %v3524_v50  ;;  %v476_v57 = vadd.f32 %v413_v46, %v150_v31  ;;  %v433_v18 = vpop.f32.mrf.mxu1 }
  0xdb   :  { %v477_v59 = vadd.f32 %v433_v18, %v191_v53  ;;  %v3533_v53 = vperm.slane %v97_v1, 3 }
  0xdc   :  { %v480_v5 = vmul.f32 0.5, %v476_v57 }
  0xdd   :  { %v484_v43 = vmul.f32 0.5, %v477_v59 }
  0xde   :  { %2587 = vtanh.f32 %v480_v5 }
  0xdf   :  { %2589 = vtanh.f32 %v484_v43  ;;  %v273_v43 = vadd.f32 %v272_v44, %v3533_v53  ;;  %v5444_v44 = vld [vmem:[#allocation18_spill] sm:$0xff] }
  0xe1   :  { %v3528_v52 = vpop.f32.mrf.mxu3  ;;  %v453_v54 = vpop.f32.mrf.mxu2 }
  0xe2   :  { %5441 = vst [vmem:[#allocation59_spill] sm:$0xff] %v3528_v52  ;;  %v478_v3 = vadd.f32 %v453_v54, %v232_v6 }
  0xe4   :  { %v2588_v12 = vpop.eup %2587  ;;  %2591 = vtanh.f32 %v478_v3 }
  0xe5   :  { %v2590_v11 = vpop.eup %2589  ;;  %v482_v46 = vmul.f32 0.5, %v2588_v12 }
  0xe6   :  { %v486_v31 = vmul.f32 0.5, %v2590_v11 }
  0xe7   :  { %v483_v57 = vadd.f32 0.5, %v482_v46  ;;  %v5448_v46 = vld [vmem:[#allocation20_spill] sm:$0xff] }
  0xe8   :  { %v487_v59 = vadd.f32 0.5, %v486_v31  ;;  %v5449_v31 = vld [vmem:[#allocation13_spill] sm:$0xff] }
  0xe9   :  { %v3531_v50 = vpop.f32.mrf.mxu3 }
  0xea   :  { %5442 = vst [vmem:[#allocation60_spill] sm:$0xff] %v3531_v50  ;;  %v2592_v18 = vpop.eup %2591  ;;  %v493_v52 = vmul.f32 0.0, %v487_v59  ;;  %v5451_v59 = vld [vmem:[#allocation30_spill] sm:$0xff] }
  0xeb   :  { %v494_v60 = vmul.f32 %v2592_v18, %v483_v57  ;;  %v5450_v57 = vld [vmem:[#allocation19_spill] sm:$0xff]  ;;  %v5452_v18 = vld [vmem:[#allocation24_spill] sm:$0xff]  ;;  %v5460_v50 = vld [vmem:[#allocation26_spill] sm:$0xff] }
  0xed   :  { %v3536_v54 = vadd.f32 %v494_v60, %v493_v52  ;;  %v5445_v52 = vld [vmem:[#allocation12_spill] sm:$0xff]  ;;  %v5447_v60 = vld [vmem:[#allocation29_spill] sm:$0xff] }
  0xf1   :  { %v473_v5 = vpop.f32.mrf.mxu3 }
  0xf2   :  { %v479_v56 = vadd.f32 %v473_v5, %v273_v43  ;;  %v5453_v43 = vld [vmem:[#allocation14_spill] sm:$0xff]  ;;  %v5454_v5 = vld [vmem:[#allocation21_spill] sm:$0xff] }
  0xf4   :  { %v489_v63 = vmul.f32 0.5, %v479_v56  ;;  %v5446_v56 = vld [vmem:[#allocation17_spill] sm:$0xff] }
  0xf6   :  { %2593 = vtanh.f32 %v489_v63  ;;  %v5455_v63 = vld [vmem:[#allocation31_spill] sm:$0xff] }
  0xf7   :  { %2595 = vtanh.f32 %v3536_v54 }
  0xfc   :  { %v2594_v6 = vpop.eup %2593 }
  0xfd   :  { %v491_v12 = vmul.f32 0.5, %v2594_v6  ;;  %v2596_v1 = vpop.eup %2595  ;;  %v5456_v6 = vld [vmem:[#allocation25_spill] sm:$0xff] }
  0xff   :  { %v492_v3 = vadd.f32 0.5, %v491_v12  ;;  %v5457_v12 = vld [vmem:[#allocation15_spill] sm:$0xff] }
 0x101   :  { %v3539_v11 = vmul.f32 %v2596_v1, %v492_v3  ;;  %v5458_v3 = vld [vmem:[#allocation22_spill] sm:$0xff]  ;;  %v5459_v1 = vld [vmem:[#allocation32_spill] sm:$0xff] }
 0x103   :  { %5443 = vst [vmem:[#allocation61_spill] sm:$0xff] %v3539_v11  ;;  %520 = vmatmul.f32.vlgmr.msrb.gmra.mxu0 %v3539_v11  ;;  %540 = vmatmul.f32.vlgmr.msrb.gmra.mxu1 %v3539_v11 }
 0x104   :  { %560 = vmatmul.f32.vlgmr.msrb.gmra.mxu2 %v3539_v11  ;;  %580 = vmatmul.f32.vlgmr.msrb.gmra.mxu3 %v3539_v11  ;;  %v5461_v11 = vld [vmem:[#allocation16_spill] sm:$0xff] }
 0x105   :  { %722 = vmatpush.msrb.mxu0 %v3054_v10  ;;  %742 = vmatpush.msrb.mxu1 %v3068_v14 }
 0x106   :  { %762 = vmatpush.msrb.mxu2 %v3233_v55  ;;  %782 = vmatpush.msrb.mxu3 %v3075_v17 }
 0x107   :  { %723 = vmatpush.msrb.mxu0 %v3066_v13  ;;  %743 = vmatpush.msrb.mxu1 %v3073_v16 }
 0x108   :  { %763 = vmatpush.msrb.mxu2 %v3244_v58  ;;  %783 = vmatpush.msrb.mxu3 %v3090_v20 }
 0x109   :  { %724 = vmatpush.msrb.mxu0 %v3071_v15  ;;  %744 = vmatpush.msrb.mxu1 %v3098_v22 }
 0x10a   :  { %764 = vmatpush.msrb.mxu2 %v3253_v61  ;;  %784 = vmatpush.msrb.mxu3 %v3103_v23 }
 0x10b   :  { %725 = vmatpush.msrb.mxu0 %v3095_v21  ;;  %745 = vmatpush.msrb.mxu1 %v3111_v25 }
 0x10c   :  { %765 = vmatpush.msrb.mxu2 %v3263_v62  ;;  %785 = vmatpush.msrb.mxu3 %v3115_v26 }
 0x10d   :  { %726 = vmatpush.msrb.mxu0 %v3109_v24  ;;  %746 = vmatpush.msrb.mxu1 %v3120_v28 }
 0x10e   :  { %766 = vmatpush.msrb.mxu2 %v3274_v0  ;;  %786 = vmatpush.msrb.mxu3 %v3125_v29 }
 0x10f   :  { %727 = vmatpush.msrb.mxu0 %v3117_v27  ;;  %747 = vmatpush.msrb.mxu1 %v3145_v34 }
 0x110   :  { %767 = vmatpush.msrb.mxu2 %v3284_v4  ;;  %787 = vmatpush.msrb.mxu3 %v3152_v35 }
 0x111   :  { %728 = vmatpush.msrb.mxu0 %v3127_v30  ;;  %748 = vmatpush.msrb.mxu1 %v3160_v37 }
 0x112   :  { %768 = vmatpush.msrb.mxu2 %v3290_v7  ;;  %788 = vmatpush.msrb.mxu3 %v3164_v38 }
 0x113   :  { %729 = vmatpush.msrb.mxu0 %v3143_v33  ;;  %749 = vmatpush.msrb.mxu1 %v3169_v40 }
 0x114   :  { %769 = vmatpush.msrb.mxu2 %v3296_v8  ;;  %789 = vmatpush.msrb.mxu3 %v3174_v41 }
 0x115   :  { %730 = vmatpush.msrb.mxu0 %v3158_v36  ;;  %750 = vmatpush.msrb.mxu1 %v3190_v45 }
 0x116   :  { %770 = vmatpush.msrb.mxu2 %v3308_v9  ;;  %790 = vmatpush.msrb.mxu3 %v3205_v48 }
 0x117   :  { %731 = vmatpush.msrb.mxu0 %v3166_v39  ;;  %751 = vmatpush.msrb.mxu1 %v3203_v47 }
 0x118   :  { %771 = vmatpush.msrb.mxu2 %v3316_v19  ;;  %791 = vmatpush.msrb.mxu3 %v3209_v49 }
 0x119   :  { %732 = vmatpush.msrb.mxu0 %v3176_v42  ;;  %752 = vmatpush.msrb.mxu1 %v3214_v51 }
 0x11a   :  { %772 = vmatpush.msrb.mxu2 %v3322_v32  ;;  %792 = vmatpush.msrb.mxu3 %v5444_v44 }
 0x11b   :  { %733 = vmatpush.msrb.mxu0 %v5445_v52  ;;  %753 = vmatpush.msrb.mxu1 %v5446_v56  ;;  %v5471_v52 = vld [vmem:[#allocation45_spill] sm:$0xff] }
 0x11c   :  { %773 = vmatpush.msrb.mxu2 %v5447_v60  ;;  %793 = vmatpush.msrb.mxu3 %v5448_v46 }
 0x11d   :  { %734 = vmatpush.msrb.mxu0 %v5449_v31  ;;  %754 = vmatpush.msrb.mxu1 %v5450_v57  ;;  %v5468_v57 = vld [vmem:[#allocation38_spill] sm:$0xff]  ;;  %v5469_v31 = vld [vmem:[#allocation56_spill] sm:$0xff] }
 0x11e   :  { %774 = vmatpush.msrb.mxu2 %v5451_v59  ;;  %794 = vmatpush.msrb.mxu3 %v5452_v18  ;;  %v5462_v59 = vld [vmem:[#allocation23_spill] sm:$0xff]  ;;  %v5463_v18 = vld [vmem:[#allocation33_spill] sm:$0xff] }
 0x11f   :  { %735 = vmatpush.msrb.mxu0 %v5453_v43  ;;  %755 = vmatpush.msrb.mxu1 %v5454_v5  ;;  %v5464_v43 = vld [vmem:[#allocation27_spill] sm:$0xff]  ;;  %v152_v5 = vpop.f32.mrf.mxu0 }
 0x120   :  { %775 = vmatpush.msrb.mxu2 %v5455_v63  ;;  %795 = vmatpush.msrb.mxu3 %v5456_v6 }
 0x121   :  { %736 = vmatpush.msrb.mxu0 %v5457_v12  ;;  %756 = vmatpush.msrb.mxu1 %v5458_v3  ;;  %v5467_v12 = vld [vmem:[#allocation57_spill] sm:$0xff] }
 0x122   :  { %776 = vmatpush.msrb.mxu2 %v5459_v1  ;;  %796 = vmatpush.msrb.mxu3 %v5460_v50  ;;  %v194_v3 = vadd.f32 %v5468_v57, %v5467_v12  ;;  %v153_v1 = vadd.f32 %v152_v5, %v5469_v31 }
 0x123   :  { %737 = vmatpush.msrb.mxu0 %v5461_v11  ;;  %757 = vmatpush.msrb.mxu1 %v5462_v59 }
 0x124   :  { %777 = vmatpush.msrb.mxu2 %v5463_v18  ;;  %797 = vmatpush.msrb.mxu3 %v5464_v43  ;;  %v5470_v18 = vld [vmem:[#allocation37_spill] sm:$0xff] }
 0x125   :  { %v235_v43 = vadd.f32 %v5470_v18, %v3526_v2 }
 0x127   :  { %v3609_v63 = vpop.f32.mrf.mxu0 }
 0x128   :  { %5465 = vst [vmem:[#allocation62_spill] sm:$0xff] %v3609_v63  ;;  %v276_v63 = vadd.f32 %v5471_v52, %v3533_v53 }
 0x12f   :  { %v3611_v6 = vpop.f32.mrf.mxu0 }
 0x130   :  { %5466 = vst [vmem:[#allocation63_spill] sm:$0xff] %v3611_v6 }
 0x180   :  { %v521_v46 = vpop.f32.mrf.mxu0  ;;  %v541_v50 = vpop.f32.mrf.mxu1 }
 0x181   :  { %v584_v60 = vadd.f32 %v521_v46, %v153_v1  ;;  %v585_v11 = vadd.f32 %v541_v50, %v194_v3 }
 0x183   :  { %v588_v56 = vmul.f32 0.5, %v584_v60  ;;  %v592_v59 = vmul.f32 0.5, %v585_v11 }
 0x185   :  { %2597 = vtanh.f32 %v588_v56 }
 0x186   :  { %2599 = vtanh.f32 %v592_v59 }
 0x187   :  { %v561_v6 = vpop.f32.mrf.mxu2  ;;  %v581_v44 = vpop.f32.mrf.mxu3 }
 0x188   :  { %v586_v32 = vadd.f32 %v561_v6, %v235_v43  ;;  %v587_v57 = vadd.f32 %v581_v44, %v276_v63  ;;  %v5499_v63 = vld [vmem:[#allocation40_spill] sm:$0xff] }
 0x189   :  { %v238_v6 = vadd.f32 %v5499_v63, %v3526_v2  ;;  %v3779_v63 = vld [vmem:[#allocation5 + $0x138] sm:$0xff] }
 0x18a   :  { %2601 = vtanh.f32 %v586_v32  ;;  %v597_v5 = vmul.f32 0.5, %v587_v57 }
 0x18b   :  { %v2598_v31 = vpop.eup %2597 }
 0x18c   :  { %v2600_v12 = vpop.eup %2599  ;;  %v590_v46 = vmul.f32 0.5, %v2598_v31  ;;  %2603 = vtanh.f32 %v597_v5 }
 0x18d   :  { %v594_v50 = vmul.f32 0.5, %v2600_v12  ;;  %v5500_v12 = vld [vmem:[#allocation48_spill] sm:$0xff] }
 0x18e   :  { %v591_v11 = vadd.f32 0.5, %v590_v46  ;;  %v279_v57 = vadd.f32 %v5500_v12, %v3533_v53  ;;  %v3789_v12 = vld [vmem:[#allocation5 + $0x118] sm:$0xff] }
 0x18f   :  { %v595_v56 = vadd.f32 0.5, %v594_v50 }
 0x190   :  { %v2602_v60 = vpop.eup %2601 }
 0x191   :  { %v601_v18 = vmul.f32 %v595_v56, %v3536_v54  ;;  %v602_v3 = vmul.f32 %v2602_v60, %v591_v11 }
 0x192   :  { %v2604_v1 = vpop.eup %2603 }
 0x193   :  { %v3621_v52 = vadd.f32 %v602_v3, %v601_v18  ;;  %v599_v59 = vmul.f32 0.5, %v2604_v1 }
 0x195   :  { %2605 = vtanh.f32 %v3621_v52  ;;  %v600_v44 = vadd.f32 0.5, %v599_v59 }
 0x19b   :  { %v2606_v32 = vpop.eup %2605 }
 0x19c   :  { %v3624_v43 = vmul.f32 %v2606_v32, %v600_v44 }
 0x19e   :  { %5472 = vst [vmem:[#allocation38_spill] sm:$0xff] %v3624_v43  ;;  %629 = vmatmul.f32.vlgmr.msra.gmra.mxu0 %v3624_v43  ;;  %649 = vmatmul.f32.vlgmr.msra.gmra.mxu1 %v3624_v43 }
 0x19f   :  { %669 = vmatmul.f32.vlgmr.msra.gmra.mxu2 %v3624_v43  ;;  %689 = vmatmul.f32.vlgmr.msra.gmra.mxu3 %v3624_v43 }
 0x1a0   :  { %831 = vmatpush.msra.mxu0 %v3054_v10  ;;  %851 = vmatpush.msra.mxu1 %v3068_v14  ;;  %v5473_v10 = vld [vmem:[#allocation28_spill] sm:$0xff] }
 0x1a1   :  { %871 = vmatpush.msra.mxu2 %v3233_v55  ;;  %891 = vmatpush.msra.mxu3 %v3075_v17  ;;  %v5475_v14 = vld [vmem:[#allocation12_spill] sm:$0xff] }
 0x1a2   :  { %832 = vmatpush.msra.mxu0 %v3066_v13  ;;  %852 = vmatpush.msra.mxu1 %v3073_v16  ;;  %v5474_v13 = vld [vmem:[#allocation18_spill] sm:$0xff]  ;;  %v5477_v16 = vld [vmem:[#allocation29_spill] sm:$0xff]  ;;  %v5478_v17 = vld [vmem:[#allocation20_spill] sm:$0xff] }
 0x1a3   :  { %872 = vmatpush.msra.mxu2 %v3244_v58  ;;  %892 = vmatpush.msra.mxu3 %v3090_v20  ;;  %v5479_v20 = vld [vmem:[#allocation13_spill] sm:$0xff] }
 0x1a4   :  { %833 = vmatpush.msra.mxu0 %v3071_v15  ;;  %853 = vmatpush.msra.mxu1 %v3098_v22  ;;  %v5476_v15 = vld [vmem:[#allocation17_spill] sm:$0xff]  ;;  %v5481_v22 = vld [vmem:[#allocation30_spill] sm:$0xff] }
 0x1a5   :  { %873 = vmatpush.msra.mxu2 %v3253_v61  ;;  %893 = vmatpush.msra.mxu3 %v3103_v23  ;;  %v5482_v23 = vld [vmem:[#allocation24_spill] sm:$0xff] }
 0x1a6   :  { %834 = vmatpush.msra.mxu0 %v3095_v21  ;;  %854 = vmatpush.msra.mxu1 %v3111_v25  ;;  %v5480_v21 = vld [vmem:[#allocation19_spill] sm:$0xff]  ;;  %v5484_v25 = vld [vmem:[#allocation21_spill] sm:$0xff] }
 0x1a7   :  { %874 = vmatpush.msra.mxu2 %v3263_v62  ;;  %894 = vmatpush.msra.mxu3 %v3115_v26  ;;  %v5485_v26 = vld [vmem:[#allocation31_spill] sm:$0xff] }
 0x1a8   :  { %835 = vmatpush.msra.mxu0 %v3109_v24  ;;  %855 = vmatpush.msra.mxu1 %v3120_v28  ;;  %v5483_v24 = vld [vmem:[#allocation14_spill] sm:$0xff]  ;;  %v5487_v28 = vld [vmem:[#allocation15_spill] sm:$0xff] }
 0x1a9   :  { %875 = vmatpush.msra.mxu2 %v3274_v0  ;;  %895 = vmatpush.msra.mxu3 %v3125_v29  ;;  %v5488_v29 = vld [vmem:[#allocation22_spill] sm:$0xff] }
 0x1aa   :  { %836 = vmatpush.msra.mxu0 %v3117_v27  ;;  %856 = vmatpush.msra.mxu1 %v3145_v34  ;;  %v5486_v27 = vld [vmem:[#allocation25_spill] sm:$0xff]  ;;  %v5491_v34 = vld [vmem:[#allocation16_spill] sm:$0xff] }
 0x1ab   :  { %876 = vmatpush.msra.mxu2 %v3284_v4  ;;  %896 = vmatpush.msra.mxu3 %v3152_v35  ;;  %v5492_v35 = vld [vmem:[#allocation23_spill] sm:$0xff] }
 0x1ac   :  { %837 = vmatpush.msra.mxu0 %v3127_v30  ;;  %857 = vmatpush.msra.mxu1 %v3160_v37  ;;  %v5489_v30 = vld [vmem:[#allocation32_spill] sm:$0xff]  ;;  %v5494_v37 = vld [vmem:[#allocation27_spill] sm:$0xff] }
 0x1ad   :  { %877 = vmatpush.msra.mxu2 %v3290_v7  ;;  %897 = vmatpush.msra.mxu3 %v3164_v38  ;;  %v5495_v38 = vld [vmem:[#allocation57_spill] sm:$0xff] }
 0x1ae   :  { %838 = vmatpush.msra.mxu0 %v3143_v33  ;;  %858 = vmatpush.msra.mxu1 %v3169_v40  ;;  %v5490_v33 = vld [vmem:[#allocation26_spill] sm:$0xff] }
 0x1af   :  { %878 = vmatpush.msra.mxu2 %v3296_v8  ;;  %898 = vmatpush.msra.mxu3 %v3174_v41  ;;  %v5497_v41 = vld [vmem:[#allocation56_spill] sm:$0xff] }
 0x1b0   :  { %839 = vmatpush.msra.mxu0 %v3158_v36  ;;  %859 = vmatpush.msra.mxu1 %v3190_v45  ;;  %v5493_v36 = vld [vmem:[#allocation33_spill] sm:$0xff] }
 0x1b1   :  { %879 = vmatpush.msra.mxu2 %v3308_v9  ;;  %899 = vmatpush.msra.mxu3 %v3205_v48 }
 0x1b2   :  { %840 = vmatpush.msra.mxu0 %v3166_v39  ;;  %860 = vmatpush.msra.mxu1 %v3203_v47  ;;  %v5496_v39 = vld [vmem:[#allocation41_spill] sm:$0xff] }
 0x1b3   :  { %880 = vmatpush.msra.mxu2 %v3316_v19  ;;  %900 = vmatpush.msra.mxu3 %v3209_v49  ;;  %v197_v40 = vadd.f32 %v5496_v39, %v5495_v38  ;;  %v3729_v39 = vld [vmem:[#allocation5 + $0x1d8] sm:$0xff] }
 0x1b4   :  { %841 = vmatpush.msra.mxu0 %v3176_v42  ;;  %861 = vmatpush.msra.mxu1 %v3214_v51  ;;  %v5498_v42 = vld [vmem:[#allocation62_spill] sm:$0xff] }
 0x1b5   :  { %881 = vmatpush.msra.mxu2 %v5473_v10  ;;  %901 = vmatpush.msra.mxu3 %v5474_v13  ;;  %v156_v45 = vadd.f32 %v5498_v42, %v5497_v41  ;;  %v3739_v42 = vld [vmem:[#allocation5 + $0x1b8] sm:$0xff] }
 0x1b6   :  { %842 = vmatpush.msra.mxu0 %v5475_v14  ;;  %862 = vmatpush.msra.mxu1 %v5476_v15 }
 0x1b7   :  { %882 = vmatpush.msra.mxu2 %v5477_v16  ;;  %902 = vmatpush.msra.mxu3 %v5478_v17 }
 0x1b8   :  { %843 = vmatpush.msra.mxu0 %v5479_v20  ;;  %863 = vmatpush.msra.mxu1 %v5480_v21 }
 0x1b9   :  { %883 = vmatpush.msra.mxu2 %v5481_v22  ;;  %903 = vmatpush.msra.mxu3 %v5482_v23 }
 0x1ba   :  { %844 = vmatpush.msra.mxu0 %v5483_v24  ;;  %864 = vmatpush.msra.mxu1 %v5484_v25 }
 0x1bb   :  { %884 = vmatpush.msra.mxu2 %v5485_v26  ;;  %904 = vmatpush.msra.mxu3 %v5486_v27 }
 0x1bc   :  { %845 = vmatpush.msra.mxu0 %v5487_v28  ;;  %865 = vmatpush.msra.mxu1 %v5488_v29  ;;  %v3715_v28 = vld [vmem:[#allocation5 + $0x1e8] sm:$0xff]  ;;  %v3719_v29 = vld [vmem:[#allocation5 + $0x1f8] sm:$0xff] }
 0x1bd   :  { %885 = vmatpush.msra.mxu2 %v5489_v30  ;;  %905 = vmatpush.msra.mxu3 %v5490_v33 }
 0x1be   :  { %846 = vmatpush.msra.mxu0 %v5491_v34  ;;  %866 = vmatpush.msra.mxu1 %v5492_v35  ;;  %v3722_v34 = vld [vmem:[#allocation5 + $0x1c0] sm:$0xff]  ;;  %v3725_v35 = vld [vmem:[#allocation5 + $0x1c8] sm:$0xff] }
 0x1bf   :  { %886 = vmatpush.msra.mxu2 %v5493_v36  ;;  %906 = vmatpush.msra.mxu3 %v5494_v37 }
 0x21b   :  { %v630_v47 = vpop.f32.mrf.mxu0  ;;  %v650_v48 = vpop.f32.mrf.mxu1 }
 0x21c   :  { %v693_v49 = vadd.f32 %v630_v47, %v156_v45  ;;  %v694_v51 = vadd.f32 %v650_v48, %v197_v40  ;;  %v3732_v40 = vld [vmem:[#allocation5 + $0x1a0] sm:$0xff]  ;;  %v3749_v47 = vld [vmem:[#allocation5 + $0x198] sm:$0xff] }
 0x21d   :  { %v3742_v45 = vld [vmem:[#allocation5 + $0x180] sm:$0xff] }
 0x21e   :  { %v697_v54 = vmul.f32 0.5, %v693_v49  ;;  %v701_v31 = vmul.f32 0.5, %v694_v51  ;;  %v3752_v48 = vld [vmem:[#allocation5 + $0x160] sm:$0xff]  ;;  %v3759_v49 = vld [vmem:[#allocation5 + $0x178] sm:$0xff] }
 0x21f   :  { %v3762_v51 = vld [vmem:[#allocation5 + $0x140] sm:$0xff] }
 0x220   :  { %2607 = vtanh.f32 %v697_v54  ;;  %v3769_v54 = vld [vmem:[#allocation5 + $0x158] sm:$0xff] }
 0x221   :  { %2609 = vtanh.f32 %v701_v31  ;;  %v3772_v31 = vld [vmem:[#allocation5 + $0x120] sm:$0xff] }
 0x222   :  { %v670_v5 = vpop.f32.mrf.mxu2  ;;  %v690_v46 = vpop.f32.mrf.mxu3 }
 0x223   :  { %v695_v50 = vadd.f32 %v670_v5, %v238_v6  ;;  %v696_v11 = vadd.f32 %v690_v46, %v279_v57  ;;  %v3782_v6 = vld [vmem:[#allocation5 + $0x100] sm:$0xff]  ;;  %v3799_v5 = vld [vmem:[#allocation5 + $0xf8] sm:$0xff] }
 0x224   :  { %v3792_v57 = vld [vmem:[#allocation5 + $0xe0] sm:$0xff] }
 0x225   :  { %2611 = vtanh.f32 %v695_v50  ;;  %v706_v56 = vmul.f32 0.5, %v696_v11  ;;  %v3802_v46 = vld [vmem:[#allocation5 + $0xc0] sm:$0xff]  ;;  %v3809_v50 = vld [vmem:[#allocation5 + $0xd8] sm:$0xff] }
 0x226   :  { %v2608_v60 = vpop.eup %2607  ;;  %v3812_v11 = vld [vmem:[#allocation5 + $0xa0] sm:$0xff] }
 0x227   :  { %v2610_v18 = vpop.eup %2609  ;;  %v699_v3 = vmul.f32 0.5, %v2608_v60  ;;  %2613 = vtanh.f32 %v706_v56  ;;  %v3819_v56 = vld [vmem:[#allocation5 + $0xb8] sm:$0xff]  ;;  %v3822_v60 = vld [vmem:[#allocation5 + $0x80] sm:$0xff] }
 0x228   :  { %v703_v1 = vmul.f32 0.5, %v2610_v18  ;;  %5502 = vst [vmem:[#allocation45_spill] sm:$0xff] %v3819_v56  ;;  %v3829_v18 = vld [vmem:[#allocation5 + $0x98] sm:$0xff] }
 0x229   :  { %v700_v59 = vadd.f32 0.5, %v699_v3  ;;  %5503 = vst [vmem:[#allocation28_spill] sm:$0xff] %v3822_v60  ;;  %v3832_v3 = vld [vmem:[#allocation5 + $0x60] sm:$0xff] }
 0x22a   :  { %v704_v44 = vadd.f32 0.5, %v703_v1  ;;  %5505 = vst [vmem:[#allocation12_spill] sm:$0xff] %v3829_v18  ;;  %v3840_v1 = vld [vmem:[#allocation5 + $0x40] sm:$0xff] }
 0x22b   :  { %v2612_v32 = vpop.eup %2611  ;;  %5506 = vst [vmem:[#allocation17_spill] sm:$0xff] %v3832_v3 }
 0x22c   :  { %v710_v13 = vmul.f32 %v704_v44, %v3621_v52  ;;  %v711_v14 = vmul.f32 %v2612_v32, %v700_v59  ;;  %v3712_v52 = vld [vmem:[#allocation5 + $0x1e0] sm:$0xff]  ;;  %5508 = vst [vmem:[#allocation20_spill] sm:$0xff] %v3840_v1  ;;  %v3851_v44 = vld [vmem:[#allocation5 + $0x28] sm:$0xff]  ;;  %v5515_v32 = vld [vmem:[#allocation63_spill] sm:$0xff] }
 0x22d   :  { %v2614_v15 = vpop.eup %2613  ;;  %v3848_v59 = vld [vmem:[#allocation5 + $0x20] sm:$0xff]  ;;  %5511 = vst [vmem:[#allocation30_spill] sm:$0xff] %v3851_v44 }
 0x22e   :  { %v3703_v17 = vadd.f32 %v711_v14, %v710_v13  ;;  %v708_v20 = vmul.f32 0.5, %v2614_v15  ;;  %5510 = vst [vmem:[#allocation19_spill] sm:$0xff] %v3848_v59 }
 0x230   :  { %2615 = vtanh.f32 %v3703_v17  ;;  %v709_v21 = vadd.f32 0.5, %v708_v20 }
 0x236   :  { %v2616_v24 = vpop.eup %2615 }
 0x237   :  { %v3706_v25 = vmul.f32 %v2616_v24, %v709_v21  ;;  %v5516_v24 = vld [vmem:[#allocation42_spill] sm:$0xff] }
 0x239   :  { %5501 = vst [vmem:[#allocation37_spill] sm:$0xff] %v3706_v25  ;;  %738 = vmatmul.f32.vlgmr.msrb.gmra.mxu0 %v3706_v25  ;;  %758 = vmatmul.f32.vlgmr.msrb.gmra.mxu1 %v3706_v25 }
 0x23a   :  { %778 = vmatmul.f32.vlgmr.msrb.gmra.mxu2 %v3706_v25  ;;  %798 = vmatmul.f32.vlgmr.msrb.gmra.mxu3 %v3706_v25  ;;  %v241_v25 = vadd.f32 %v5516_v24, %v3526_v2 }
 0x23b   :  { %940 = vmatpush.msrb.mxu0 %v3712_v52  ;;  %960 = vmatpush.msrb.mxu1 %v3715_v28 }
 0x23c   :  { %980 = vmatpush.msrb.mxu2 %v3233_v55  ;;  %1000 = vmatpush.msrb.mxu3 %v3719_v29  ;;  %v3735_v55 = vld [vmem:[#allocation5 + $0x1a8] sm:$0xff] }
 0x23d   :  { %941 = vmatpush.msrb.mxu0 %v3722_v34  ;;  %961 = vmatpush.msrb.mxu1 %v3725_v35 }
 0x23e   :  { %981 = vmatpush.msrb.mxu2 %v3244_v58  ;;  %1001 = vmatpush.msrb.mxu3 %v3729_v39  ;;  %v3745_v58 = vld [vmem:[#allocation5 + $0x188] sm:$0xff] }
 0x23f   :  { %942 = vmatpush.msrb.mxu0 %v3732_v40  ;;  %962 = vmatpush.msrb.mxu1 %v3735_v55 }
 0x240   :  { %982 = vmatpush.msrb.mxu2 %v3253_v61  ;;  %1002 = vmatpush.msrb.mxu3 %v3739_v42  ;;  %v3755_v61 = vld [vmem:[#allocation5 + $0x168] sm:$0xff] }
 0x241   :  { %943 = vmatpush.msrb.mxu0 %v3742_v45  ;;  %963 = vmatpush.msrb.mxu1 %v3745_v58 }
 0x242   :  { %983 = vmatpush.msrb.mxu2 %v3263_v62  ;;  %1003 = vmatpush.msrb.mxu3 %v3749_v47  ;;  %v3765_v62 = vld [vmem:[#allocation5 + $0x148] sm:$0xff] }
 0x243   :  { %944 = vmatpush.msrb.mxu0 %v3752_v48  ;;  %964 = vmatpush.msrb.mxu1 %v3755_v61 }
 0x244   :  { %984 = vmatpush.msrb.mxu2 %v3274_v0  ;;  %1004 = vmatpush.msrb.mxu3 %v3759_v49  ;;  %v3775_v0 = vld [vmem:[#allocation5 + $0x128] sm:$0xff] }
 0x245   :  { %945 = vmatpush.msrb.mxu0 %v3762_v51  ;;  %965 = vmatpush.msrb.mxu1 %v3765_v62 }
 0x246   :  { %985 = vmatpush.msrb.mxu2 %v3284_v4  ;;  %1005 = vmatpush.msrb.mxu3 %v3769_v54  ;;  %v3785_v4 = vld [vmem:[#allocation5 + $0x108] sm:$0xff] }
 0x247   :  { %946 = vmatpush.msrb.mxu0 %v3772_v31  ;;  %966 = vmatpush.msrb.mxu1 %v3775_v0 }
 0x248   :  { %986 = vmatpush.msrb.mxu2 %v3290_v7  ;;  %1006 = vmatpush.msrb.mxu3 %v3779_v63  ;;  %v3795_v7 = vld [vmem:[#allocation5 + $0xe8] sm:$0xff] }
 0x249   :  { %947 = vmatpush.msrb.mxu0 %v3782_v6  ;;  %967 = vmatpush.msrb.mxu1 %v3785_v4 }
 0x24a   :  { %987 = vmatpush.msrb.mxu2 %v3296_v8  ;;  %1007 = vmatpush.msrb.mxu3 %v3789_v12  ;;  %v3805_v8 = vld [vmem:[#allocation5 + $0xc8] sm:$0xff] }
 0x24b   :  { %948 = vmatpush.msrb.mxu0 %v3792_v57  ;;  %968 = vmatpush.msrb.mxu1 %v3795_v7 }
 0x24c   :  { %988 = vmatpush.msrb.mxu2 %v3308_v9  ;;  %1008 = vmatpush.msrb.mxu3 %v3799_v5  ;;  %v3815_v9 = vld [vmem:[#allocation5 + $0xa8] sm:$0xff] }
 0x24d   :  { %949 = vmatpush.msrb.mxu0 %v3802_v46  ;;  %969 = vmatpush.msrb.mxu1 %v3805_v8 }
 0x24e   :  { %989 = vmatpush.msrb.mxu2 %v3316_v19  ;;  %1009 = vmatpush.msrb.mxu3 %v3809_v50  ;;  %v3825_v19 = vld [vmem:[#allocation5 + $0x88] sm:$0xff] }
 0x24f   :  { %950 = vmatpush.msrb.mxu0 %v3812_v11  ;;  %970 = vmatpush.msrb.mxu1 %v3815_v9  ;;  %5504 = vst [vmem:[#allocation18_spill] sm:$0xff] %v3825_v19 }
 0x250   :  { %990 = vmatpush.msrb.mxu2 %v5473_v10  ;;  %1010 = vmatpush.msrb.mxu3 %v3819_v56  ;;  %v3835_v10 = vld [vmem:[#allocation5 + $0x68] sm:$0xff] }
 0x251   :  { %951 = vmatpush.msrb.mxu0 %v3822_v60  ;;  %971 = vmatpush.msrb.mxu1 %v3825_v19  ;;  %5507 = vst [vmem:[#allocation29_spill] sm:$0xff] %v3835_v10 }
 0x252   :  { %991 = vmatpush.msrb.mxu2 %v5477_v16  ;;  %1011 = vmatpush.msrb.mxu3 %v3829_v18  ;;  %v3843_v16 = vld [vmem:[#allocation5 + $0x48] sm:$0xff] }
 0x253   :  { %952 = vmatpush.msrb.mxu0 %v3832_v3  ;;  %972 = vmatpush.msrb.mxu1 %v3835_v10  ;;  %5509 = vst [vmem:[#allocation13_spill] sm:$0xff] %v3843_v16 }
 0x254   :  { %992 = vmatpush.msrb.mxu2 %v5481_v22  ;;  %1012 = vmatpush.msrb.mxu3 %v5482_v23  ;;  %v3856_v22 = vld [vmem:[#allocation5] sm:$0xff]  ;;  %v3859_v23 = vld [vmem:[#allocation5 + $0x8] sm:$0xff] }
 0x255   :  { %953 = vmatpush.msrb.mxu0 %v3840_v1  ;;  %973 = vmatpush.msrb.mxu1 %v3843_v16  ;;  %5512 = vst [vmem:[#allocation24_spill] sm:$0xff] %v3856_v22 }
 0x256   :  { %993 = vmatpush.msrb.mxu2 %v5485_v26  ;;  %1013 = vmatpush.msrb.mxu3 %v5486_v27  ;;  %5513 = vst [vmem:[#allocation14_spill] sm:$0xff] %v3859_v23  ;;  %v5514_v26 = vld [vmem:[#allocation43_spill] sm:$0xff] }
 0x257   :  { %954 = vmatpush.msrb.mxu0 %v3848_v59  ;;  %974 = vmatpush.msrb.mxu1 %v3851_v44  ;;  %v200_v27 = vadd.f32 %v5514_v26, %v5495_v38 }
 0x258   :  { %994 = vmatpush.msrb.mxu2 %v5489_v30  ;;  %1014 = vmatpush.msrb.mxu3 %v5490_v33  ;;  %v159_v30 = vadd.f32 %v5515_v32, %v5497_v41 }
 0x259   :  { %955 = vmatpush.msrb.mxu0 %v3856_v22  ;;  %975 = vmatpush.msrb.mxu1 %v3859_v23 }
 0x25a   :  { %995 = vmatpush.msrb.mxu2 %v5493_v36  ;;  %1015 = vmatpush.msrb.mxu3 %v5494_v37  ;;  %v5517_v36 = vld [vmem:[#allocation51_spill] sm:$0xff] }
 0x25b   :  { %v282_v43 = vadd.f32 %v5517_v36, %v3533_v53 }
 0x2b6   :  { %v739_v13 = vpop.f32.mrf.mxu0  ;;  %v759_v33 = vpop.f32.mrf.mxu1 }
 0x2b7   :  { %v802_v14 = vadd.f32 %v739_v13, %v159_v30  ;;  %v803_v15 = vadd.f32 %v759_v33, %v200_v27 }
 0x2b9   :  { %v806_v20 = vmul.f32 0.5, %v802_v14  ;;  %v810_v21 = vmul.f32 0.5, %v803_v15 }
 0x2bb   :  { %2617 = vtanh.f32 %v806_v20 }
 0x2bc   :  { %2619 = vtanh.f32 %v810_v21  ;;  %v3902_v21 = vld [vmem:[#allocation5 + $0x190] sm:$0xff] }
 0x2bd   :  { %v779_v37 = vpop.f32.mrf.mxu2  ;;  %v799_v23 = vpop.f32.mrf.mxu3 }
 0x2be   :  { %v804_v26 = vadd.f32 %v779_v37, %v241_v25  ;;  %v805_v38 = vadd.f32 %v799_v23, %v282_v43  ;;  %v3908_v37 = vld [vmem:[#allocation5 + $0x170] sm:$0xff] }
 0x2c0   :  { %2621 = vtanh.f32 %v804_v26  ;;  %v815_v32 = vmul.f32 0.5, %v805_v38  ;;  %v3914_v26 = vld [vmem:[#allocation5 + $0x150] sm:$0xff] }
 0x2c1   :  { %v2618_v41 = vpop.eup %2617 }
 0x2c2   :  { %v2620_v22 = vpop.eup %2619  ;;  %v808_v30 = vmul.f32 0.5, %v2618_v41  ;;  %2623 = vtanh.f32 %v815_v32  ;;  %v3884_v41 = vld [vmem:[#allocation5 + $0x1f0] sm:$0xff] }
 0x2c3   :  { %v812_v27 = vmul.f32 0.5, %v2620_v22  ;;  %v3896_v22 = vld [vmem:[#allocation5 + $0x1b0] sm:$0xff] }
 0x2c4   :  { %v809_v13 = vadd.f32 0.5, %v808_v30  ;;  %v3920_v32 = vld [vmem:[#allocation5 + $0x130] sm:$0xff] }
 0x2c5   :  { %v813_v33 = vadd.f32 0.5, %v812_v27  ;;  %v3926_v30 = vld [vmem:[#allocation5 + $0x110] sm:$0xff] }
 0x2c6   :  { %v2622_v14 = vpop.eup %2621  ;;  %v3932_v27 = vld [vmem:[#allocation5 + $0xf0] sm:$0xff] }
 0x2c7   :  { %v819_v15 = vmul.f32 %v813_v33, %v3703_v17  ;;  %v820_v20 = vmul.f32 %v2622_v14, %v809_v13  ;;  %v3890_v17 = vld [vmem:[#allocation5 + $0x1d0] sm:$0xff] }
 0x2c8   :  { %v2624_v24 = vpop.eup %2623  ;;  %v3938_v13 = vld [vmem:[#allocation5 + $0xd0] sm:$0xff] }
 0x2c9   :  { %v3873_v36 = vadd.f32 %v820_v20, %v819_v15  ;;  %v817_v25 = vmul.f32 0.5, %v2624_v24  ;;  %v3944_v33 = vld [vmem:[#allocation5 + $0xb0] sm:$0xff]  ;;  %v3959_v20 = vld [vmem:[#allocation5 + $0x78] sm:$0xff] }
 0x2ca   :  { %5519 = vst [vmem:[#allocation31_spill] sm:$0xff] %v3944_v33  ;;  %v3950_v14 = vld [vmem:[#allocation5 + $0x90] sm:$0xff] }
 0x2cb   :  { %2625 = vtanh.f32 %v3873_v36  ;;  %v818_v43 = vadd.f32 0.5, %v817_v25  ;;  %5520 = vst [vmem:[#allocation25_spill] sm:$0xff] %v3950_v14  ;;  %v3956_v15 = vld [vmem:[#allocation5 + $0x70] sm:$0xff]  ;;  %v3967_v25 = vld [vmem:[#allocation5 + $0x58] sm:$0xff] }
 0x2cc   :  { %5521 = vst [vmem:[#allocation15_spill] sm:$0xff] %v3956_v15  ;;  %v3964_v24 = vld [vmem:[#allocation5 + $0x50] sm:$0xff] }
 0x2cd   :  { %5522 = vst [vmem:[#allocation22_spill] sm:$0xff] %v3959_v20 }
 0x2ce   :  { %5523 = vst [vmem:[#allocation32_spill] sm:$0xff] %v3964_v24 }
 0x2cf   :  { %5524 = vst [vmem:[#allocation26_spill] sm:$0xff] %v3967_v25 }
 0x2d1   :  { %v2626_v23 = vpop.eup %2625 }
 0x2d2   :  { %v3876_v38 = vmul.f32 %v2626_v23, %v818_v43  ;;  %v3972_v43 = vld [vmem:[#allocation5 + $0x30] sm:$0xff]  ;;  %v3975_v23 = vld [vmem:[#allocation5 + $0x38] sm:$0xff] }
 0x2d3   :  { %5525 = vst [vmem:[#allocation16_spill] sm:$0xff] %v3972_v43 }
 0x2d4   :  { %5518 = vst [vmem:[#allocation21_spill] sm:$0xff] %v3876_v38  ;;  %847 = vmatmul.f32.vlgmr.msra.gmra.mxu0 %v3876_v38  ;;  %867 = vmatmul.f32.vlgmr.msra.gmra.mxu1 %v3876_v38 }
 0x2d5   :  { %887 = vmatmul.f32.vlgmr.msra.gmra.mxu2 %v3876_v38  ;;  %907 = vmatmul.f32.vlgmr.msra.gmra.mxu3 %v3876_v38  ;;  %5526 = vst [vmem:[#allocation23_spill] sm:$0xff] %v3975_v23  ;;  %v5527_v38 = vld [vmem:[#allocation24_spill] sm:$0xff] }
 0x2d6   :  { %1049 = vmatpush.msra.mxu0 %v3712_v52  ;;  %1069 = vmatpush.msra.mxu1 %v3715_v28 }
 0x2d7   :  { %1089 = vmatpush.msra.mxu2 %v3884_v41  ;;  %1109 = vmatpush.msra.mxu3 %v3719_v29 }
 0x2d8   :  { %1050 = vmatpush.msra.mxu0 %v3722_v34  ;;  %1070 = vmatpush.msra.mxu1 %v3725_v35 }
 0x2d9   :  { %1090 = vmatpush.msra.mxu2 %v3890_v17  ;;  %1110 = vmatpush.msra.mxu3 %v3729_v39 }
 0x2da   :  { %1051 = vmatpush.msra.mxu0 %v3732_v40  ;;  %1071 = vmatpush.msra.mxu1 %v3735_v55 }
 0x2db   :  { %1091 = vmatpush.msra.mxu2 %v3896_v22  ;;  %1111 = vmatpush.msra.mxu3 %v3739_v42 }
 0x2dc   :  { %1052 = vmatpush.msra.mxu0 %v3742_v45  ;;  %1072 = vmatpush.msra.mxu1 %v3745_v58 }
 0x2dd   :  { %1092 = vmatpush.msra.mxu2 %v3902_v21  ;;  %1112 = vmatpush.msra.mxu3 %v3749_v47 }
 0x2de   :  { %1053 = vmatpush.msra.mxu0 %v3752_v48  ;;  %1073 = vmatpush.msra.mxu1 %v3755_v61 }
 0x2df   :  { %1093 = vmatpush.msra.mxu2 %v3908_v37  ;;  %1113 = vmatpush.msra.mxu3 %v3759_v49 }
 0x2e0   :  { %1054 = vmatpush.msra.mxu0 %v3762_v51  ;;  %1074 = vmatpush.msra.mxu1 %v3765_v62 }
 0x2e1   :  { %1094 = vmatpush.msra.mxu2 %v3914_v26  ;;  %1114 = vmatpush.msra.mxu3 %v3769_v54 }
 0x2e2   :  { %1055 = vmatpush.msra.mxu0 %v3772_v31  ;;  %1075 = vmatpush.msra.mxu1 %v3775_v0 }
 0x2e3   :  { %1095 = vmatpush.msra.mxu2 %v3920_v32  ;;  %1115 = vmatpush.msra.mxu3 %v3779_v63 }
 0x2e4   :  { %1056 = vmatpush.msra.mxu0 %v3782_v6  ;;  %1076 = vmatpush.msra.mxu1 %v3785_v4 }
 0x2e5   :  { %1096 = vmatpush.msra.mxu2 %v3926_v30  ;;  %1116 = vmatpush.msra.mxu3 %v3789_v12 }
 0x2e6   :  { %1057 = vmatpush.msra.mxu0 %v3792_v57  ;;  %1077 = vmatpush.msra.mxu1 %v3795_v7 }
 0x2e7   :  { %1097 = vmatpush.msra.mxu2 %v3932_v27  ;;  %1117 = vmatpush.msra.mxu3 %v3799_v5 }
 0x2e8   :  { %1058 = vmatpush.msra.mxu0 %v3802_v46  ;;  %1078 = vmatpush.msra.mxu1 %v3805_v8 }
 0x2e9   :  { %1098 = vmatpush.msra.mxu2 %v3938_v13  ;;  %1118 = vmatpush.msra.mxu3 %v3809_v50 }
 0x2ea   :  { %1059 = vmatpush.msra.mxu0 %v3812_v11  ;;  %1079 = vmatpush.msra.mxu1 %v3815_v9 }
 0x2eb   :  { %1099 = vmatpush.msra.mxu2 %v3944_v33  ;;  %1119 = vmatpush.msra.mxu3 %v3819_v56 }
 0x2ec   :  { %1060 = vmatpush.msra.mxu0 %v3822_v60  ;;  %1080 = vmatpush.msra.mxu1 %v3825_v19  ;;  %v5536_v19 = vld [vmem:[#allocation54_spill] sm:$0xff] }
 0x2ed   :  { %1100 = vmatpush.msra.mxu2 %v3950_v14  ;;  %1120 = vmatpush.msra.mxu3 %v3829_v18  ;;  %v5535_v14 = vld [vmem:[#allocation44_spill] sm:$0xff]  ;;  %v285_v60 = vadd.f32 %v5536_v19, %v3533_v53 }
 0x2ee   :  { %1061 = vmatpush.msra.mxu0 %v3832_v3  ;;  %1081 = vmatpush.msra.mxu1 %v3835_v10 }
 0x2ef   :  { %1101 = vmatpush.msra.mxu2 %v3956_v15  ;;  %1121 = vmatpush.msra.mxu3 %v3959_v20  ;;  %v5534_v20 = vld [vmem:[#allocation46_spill] sm:$0xff] }
 0x2f0   :  { %1062 = vmatpush.msra.mxu0 %v3840_v1  ;;  %1082 = vmatpush.msra.mxu1 %v3843_v16  ;;  %v5528_v16 = vld [vmem:[#allocation14_spill] sm:$0xff] }
 0x2f1   :  { %1102 = vmatpush.msra.mxu2 %v3964_v24  ;;  %1122 = vmatpush.msra.mxu3 %v3967_v25  ;;  %v3980_v24 = vld [vmem:[#allocation5 + $0x10] sm:$0xff]  ;;  %v3983_v25 = vld [vmem:[#allocation5 + $0x18] sm:$0xff] }
 0x2f2   :  { %1063 = vmatpush.msra.mxu0 %v3848_v59  ;;  %1083 = vmatpush.msra.mxu1 %v3851_v44  ;;  %5529 = vst [vmem:[#allocation33_spill] sm:$0xff] %v3980_v24  ;;  %v5531_v44 = vld [vmem:[#allocation56_spill] sm:$0xff]  ;;  %v5532_v59 = vld [vmem:[#allocation34_spill] sm:$0xff] }
 0x2f3   :  { %1103 = vmatpush.msra.mxu2 %v3972_v43  ;;  %1123 = vmatpush.msra.mxu3 %v3975_v23  ;;  %5530 = vst [vmem:[#allocation27_spill] sm:$0xff] %v3983_v25  ;;  %v162_v1 = vadd.f32 %v5532_v59, %v5531_v44  ;;  %v5533_v43 = vld [vmem:[#allocation57_spill] sm:$0xff] }
 0x2f4   :  { %1064 = vmatpush.msra.mxu0 %v5527_v38  ;;  %1084 = vmatpush.msra.mxu1 %v5528_v16  ;;  %v203_v15 = vadd.f32 %v5534_v20, %v5533_v43 }
 0x2f5   :  { %1104 = vmatpush.msra.mxu2 %v3980_v24  ;;  %1124 = vmatpush.msra.mxu3 %v3983_v25  ;;  %v244_v24 = vadd.f32 %v5535_v14, %v3526_v2 }
 0x351   :  { %v848_v10 = vpop.f32.mrf.mxu0  ;;  %v868_v23 = vpop.f32.mrf.mxu1 }
 0x352   :  { %v911_v3 = vadd.f32 %v848_v10, %v162_v1  ;;  %v912_v38 = vadd.f32 %v868_v23, %v203_v15 }
 0x354   :  { %v915_v18 = vmul.f32 0.5, %v911_v3  ;;  %v919_v16 = vmul.f32 0.5, %v912_v38 }
 0x356   :  { %2627 = vtanh.f32 %v915_v18 }
 0x357   :  { %2629 = vtanh.f32 %v919_v16 }
 0x358   :  { %v888_v25 = vpop.f32.mrf.mxu2  ;;  %v908_v56 = vpop.f32.mrf.mxu3 }
 0x359   :  { %v913_v59 = vadd.f32 %v888_v25, %v244_v24  ;;  %v914_v44 = vadd.f32 %v908_v56, %v285_v60 }
 0x35b   :  { %2631 = vtanh.f32 %v913_v59  ;;  %v924_v20 = vmul.f32 0.5, %v914_v44 }
 0x35c   :  { %v2628_v43 = vpop.eup %2627 }
 0x35d   :  { %v2630_v33 = vpop.eup %2629  ;;  %v917_v10 = vmul.f32 0.5, %v2628_v43  ;;  %2633 = vtanh.f32 %v924_v20 }
 0x35e   :  { %v921_v1 = vmul.f32 0.5, %v2630_v33 }
 0x35f   :  { %v918_v3 = vadd.f32 0.5, %v917_v10 }
 0x360   :  { %v922_v18 = vadd.f32 0.5, %v921_v1 }
 0x361   :  { %v2632_v38 = vpop.eup %2631 }
 0x362   :  { %v928_v14 = vmul.f32 %v922_v18, %v3873_v36  ;;  %v929_v15 = vmul.f32 %v2632_v38, %v918_v3 }
 0x363   :  { %v2634_v23 = vpop.eup %2633 }
 0x364   :  { %v3995_v19 = vadd.f32 %v929_v15, %v928_v14  ;;  %v926_v16 = vmul.f32 0.5, %v2634_v23 }
 0x366   :  { %2635 = vtanh.f32 %v3995_v19  ;;  %v927_v56 = vadd.f32 0.5, %v926_v16 }
 0x36c   :  { %v2636_v60 = vpop.eup %2635 }
 0x36d   :  { %v3998_v44 = vmul.f32 %v2636_v60, %v927_v56  ;;  %v1331_v56 = vld [vmem:[#allocation7 + $0x1e8] sm:$0xff]  ;;  %v1332_v60 = vld [vmem:[#allocation7 + $0x1f0] sm:$0xff] }
 0x36f   :  { %956 = vmatmul.f32.vlgmr.msrb.gmra.mxu0 %v3998_v44  ;;  %976 = vmatmul.f32.vlgmr.msrb.gmra.mxu1 %v3998_v44 }
 0x370   :  { %996 = vmatmul.f32.vlgmr.msrb.gmra.mxu2 %v3998_v44  ;;  %1016 = vmatmul.f32.vlgmr.msrb.gmra.mxu3 %v3998_v44 }
 0x371   :  { %1158 = vmatpush.msrb.mxu0 %v3712_v52  ;;  %1178 = vmatpush.msrb.mxu1 %v3715_v28  ;;  %v5537_v52 = vld [vmem:[#allocation31_spill] sm:$0xff]  ;;  %v5538_v28 = vld [vmem:[#allocation45_spill] sm:$0xff] }
 0x372   :  { %1198 = vmatpush.msrb.mxu2 %v3884_v41  ;;  %1218 = vmatpush.msrb.mxu3 %v3719_v29  ;;  %v5539_v29 = vld [vmem:[#allocation28_spill] sm:$0xff] }
 0x373   :  { %1159 = vmatpush.msrb.mxu0 %v3722_v34  ;;  %1179 = vmatpush.msrb.mxu1 %v3725_v35  ;;  %v5540_v34 = vld [vmem:[#allocation18_spill] sm:$0xff]  ;;  %v5541_v35 = vld [vmem:[#allocation25_spill] sm:$0xff] }
 0x374   :  { %1199 = vmatpush.msrb.mxu2 %v3890_v17  ;;  %1219 = vmatpush.msrb.mxu3 %v3729_v39  ;;  %v5542_v39 = vld [vmem:[#allocation12_spill] sm:$0xff]  ;;  %v5563_v17 = vld [vmem:[#allocation47_spill] sm:$0xff] }
 0x375   :  { %1160 = vmatpush.msrb.mxu0 %v3732_v40  ;;  %1180 = vmatpush.msrb.mxu1 %v3735_v55  ;;  %v5543_v40 = vld [vmem:[#allocation17_spill] sm:$0xff] }
 0x376   :  { %1200 = vmatpush.msrb.mxu2 %v3896_v22  ;;  %1220 = vmatpush.msrb.mxu3 %v3739_v42  ;;  %v5544_v55 = vld [vmem:[#allocation29_spill] sm:$0xff]  ;;  %v5545_v42 = vld [vmem:[#allocation15_spill] sm:$0xff]  ;;  %v247_v22 = vadd.f32 %v5563_v17, %v3526_v2 }
 0x377   :  { %1161 = vmatpush.msrb.mxu0 %v3742_v45  ;;  %1181 = vmatpush.msrb.mxu1 %v3745_v58  ;;  %v5546_v45 = vld [vmem:[#allocation22_spill] sm:$0xff]  ;;  %v5547_v58 = vld [vmem:[#allocation20_spill] sm:$0xff]  ;;  %v1301_v17 = vld [vmem:[#allocation7 + $0xf8] sm:$0xff] }
 0x378   :  { %1201 = vmatpush.msrb.mxu2 %v3902_v21  ;;  %1221 = vmatpush.msrb.mxu3 %v3749_v47  ;;  %v5548_v47 = vld [vmem:[#allocation13_spill] sm:$0xff]  ;;  %v5564_v21 = vld [vmem:[#allocation58_spill] sm:$0xff] }
 0x379   :  { %1162 = vmatpush.msrb.mxu0 %v3752_v48  ;;  %1182 = vmatpush.msrb.mxu1 %v3755_v61  ;;  %v5549_v48 = vld [vmem:[#allocation32_spill] sm:$0xff]  ;;  %v5550_v61 = vld [vmem:[#allocation26_spill] sm:$0xff] }
 0x37a   :  { %1202 = vmatpush.msrb.mxu2 %v3908_v37  ;;  %1222 = vmatpush.msrb.mxu3 %v3759_v49  ;;  %v5551_v49 = vld [vmem:[#allocation19_spill] sm:$0xff]  ;;  %v288_v37 = vadd.f32 %v5564_v21, %v3533_v53  ;;  %v1295_v21 = vld [vmem:[#allocation7 + $0xc8] sm:$0xff] }
 0x37b   :  { %1163 = vmatpush.msrb.mxu0 %v3762_v51  ;;  %1183 = vmatpush.msrb.mxu1 %v3765_v62  ;;  %v5552_v51 = vld [vmem:[#allocation30_spill] sm:$0xff]  ;;  %v5553_v62 = vld [vmem:[#allocation16_spill] sm:$0xff] }
 0x37c   :  { %1203 = vmatpush.msrb.mxu2 %v3914_v26  ;;  %1223 = vmatpush.msrb.mxu3 %v3769_v54  ;;  %v5554_v54 = vld [vmem:[#allocation23_spill] sm:$0xff] }
 0x37d   :  { %1164 = vmatpush.msrb.mxu0 %v3772_v31  ;;  %1184 = vmatpush.msrb.mxu1 %v3775_v0  ;;  %v5555_v31 = vld [vmem:[#allocation24_spill] sm:$0xff]  ;;  %v5556_v0 = vld [vmem:[#allocation14_spill] sm:$0xff] }
 0x37e   :  { %1204 = vmatpush.msrb.mxu2 %v3920_v32  ;;  %1224 = vmatpush.msrb.mxu3 %v3779_v63  ;;  %v5557_v63 = vld [vmem:[#allocation33_spill] sm:$0xff] }
 0x37f   :  { %1165 = vmatpush.msrb.mxu0 %v3782_v6  ;;  %1185 = vmatpush.msrb.mxu1 %v3785_v4  ;;  %v5558_v6 = vld [vmem:[#allocation27_spill] sm:$0xff]  ;;  %v5559_v4 = vld [vmem:[#allocation56_spill] sm:$0xff] }
 0x380   :  { %1205 = vmatpush.msrb.mxu2 %v3926_v30  ;;  %1225 = vmatpush.msrb.mxu3 %v3789_v12  ;;  %v5560_v12 = vld [vmem:[#allocation35_spill] sm:$0xff] }
 0x381   :  { %1166 = vmatpush.msrb.mxu0 %v3792_v57  ;;  %1186 = vmatpush.msrb.mxu1 %v3795_v7  ;;  %v165_v57 = vadd.f32 %v5560_v12, %v5559_v4  ;;  %v5561_v7 = vld [vmem:[#allocation57_spill] sm:$0xff] }
 0x382   :  { %1206 = vmatpush.msrb.mxu2 %v3932_v27  ;;  %1226 = vmatpush.msrb.mxu3 %v3799_v5  ;;  %v5562_v5 = vld [vmem:[#allocation49_spill] sm:$0xff] }
 0x383   :  { %1167 = vmatpush.msrb.mxu0 %v3802_v46  ;;  %1187 = vmatpush.msrb.mxu1 %v3805_v8  ;;  %v206_v46 = vadd.f32 %v5562_v5, %v5561_v7  ;;  %v1307_v12 = vld [vmem:[#allocation7 + $0x128] sm:$0xff]  ;;  %v1309_v5 = vld [vmem:[#allocation7 + $0x138] sm:$0xff] }
 0x384   :  { %1207 = vmatpush.msrb.mxu2 %v3938_v13  ;;  %1227 = vmatpush.msrb.mxu3 %v3809_v50 }
 0x385   :  { %1168 = vmatpush.msrb.mxu0 %v3812_v11  ;;  %1188 = vmatpush.msrb.mxu1 %v3815_v9 }
 0x386   :  { %1208 = vmatpush.msrb.mxu2 %v5537_v52  ;;  %1228 = vmatpush.msrb.mxu3 %v5538_v28  ;;  %v1333_v52 = vld [vmem:[#allocation7 + $0x1f8] sm:$0xff]  ;;  %v1326_v28 = vld [vmem:[#allocation7 + $0x1c0] sm:$0xff] }
 0x387   :  { %1169 = vmatpush.msrb.mxu0 %v5539_v29  ;;  %1189 = vmatpush.msrb.mxu1 %v5540_v34  ;;  %v1327_v29 = vld [vmem:[#allocation7 + $0x1c8] sm:$0xff]  ;;  %v1328_v34 = vld [vmem:[#allocation7 + $0x1d0] sm:$0xff] }
 0x388   :  { %1209 = vmatpush.msrb.mxu2 %v5541_v35  ;;  %1229 = vmatpush.msrb.mxu3 %v5542_v39  ;;  %v1329_v35 = vld [vmem:[#allocation7 + $0x1d8] sm:$0xff]  ;;  %v1322_v39 = vld [vmem:[#allocation7 + $0x1a0] sm:$0xff] }
 0x389   :  { %1170 = vmatpush.msrb.mxu0 %v5543_v40  ;;  %1190 = vmatpush.msrb.mxu1 %v5544_v55  ;;  %v1323_v40 = vld [vmem:[#allocation7 + $0x1a8] sm:$0xff]  ;;  %v1324_v55 = vld [vmem:[#allocation7 + $0x1b0] sm:$0xff] }
 0x38a   :  { %1210 = vmatpush.msrb.mxu2 %v5545_v42  ;;  %1230 = vmatpush.msrb.mxu3 %v5546_v45  ;;  %v1325_v42 = vld [vmem:[#allocation7 + $0x1b8] sm:$0xff]  ;;  %v1318_v45 = vld [vmem:[#allocation7 + $0x180] sm:$0xff] }
 0x38b   :  { %1171 = vmatpush.msrb.mxu0 %v5547_v58  ;;  %1191 = vmatpush.msrb.mxu1 %v5548_v47  ;;  %v1319_v58 = vld [vmem:[#allocation7 + $0x188] sm:$0xff]  ;;  %v1320_v47 = vld [vmem:[#allocation7 + $0x190] sm:$0xff] }
 0x38c   :  { %1211 = vmatpush.msrb.mxu2 %v5549_v48  ;;  %1231 = vmatpush.msrb.mxu3 %v5550_v61  ;;  %v1321_v48 = vld [vmem:[#allocation7 + $0x198] sm:$0xff]  ;;  %v1314_v61 = vld [vmem:[#allocation7 + $0x160] sm:$0xff] }
 0x38d   :  { %1172 = vmatpush.msrb.mxu0 %v5551_v49  ;;  %1192 = vmatpush.msrb.mxu1 %v5552_v51  ;;  %v1315_v49 = vld [vmem:[#allocation7 + $0x168] sm:$0xff]  ;;  %v1316_v51 = vld [vmem:[#allocation7 + $0x170] sm:$0xff] }
 0x38e   :  { %1212 = vmatpush.msrb.mxu2 %v5553_v62  ;;  %1232 = vmatpush.msrb.mxu3 %v5554_v54  ;;  %v1317_v62 = vld [vmem:[#allocation7 + $0x178] sm:$0xff]  ;;  %v1310_v54 = vld [vmem:[#allocation7 + $0x140] sm:$0xff] }
 0x38f   :  { %1173 = vmatpush.msrb.mxu0 %v5555_v31  ;;  %1193 = vmatpush.msrb.mxu1 %v5556_v0  ;;  %v1311_v31 = vld [vmem:[#allocation7 + $0x148] sm:$0xff]  ;;  %v1312_v0 = vld [vmem:[#allocation7 + $0x150] sm:$0xff] }
 0x390   :  { %1213 = vmatpush.msrb.mxu2 %v5557_v63  ;;  %1233 = vmatpush.msrb.mxu3 %v5558_v6  ;;  %v1313_v63 = vld [vmem:[#allocation7 + $0x158] sm:$0xff]  ;;  %v1306_v6 = vld [vmem:[#allocation7 + $0x120] sm:$0xff] }
 0x3ec   :  { %v957_v8 = vpop.f32.mrf.mxu0  ;;  %v977_v50 = vpop.f32.mrf.mxu1 }
 0x3ed   :  { %v1020_v11 = vadd.f32 %v957_v8, %v165_v57  ;;  %v1021_v9 = vadd.f32 %v977_v50, %v206_v46  ;;  %v1308_v57 = vld [vmem:[#allocation7 + $0x130] sm:$0xff]  ;;  %v1302_v46 = vld [vmem:[#allocation7 + $0x100] sm:$0xff]  ;;  %v1303_v8 = vld [vmem:[#allocation7 + $0x108] sm:$0xff] }
 0x3ee   :  { %v1304_v50 = vld [vmem:[#allocation7 + $0x110] sm:$0xff] }
 0x3ef   :  { %v1024_v36 = vmul.f32 0.5, %v1020_v11  ;;  %v1028_v41 = vmul.f32 0.5, %v1021_v9  ;;  %v1305_v11 = vld [vmem:[#allocation7 + $0x118] sm:$0xff]  ;;  %v1298_v9 = vld [vmem:[#allocation7 + $0xe0] sm:$0xff] }
 0x3f1   :  { %2637 = vtanh.f32 %v1024_v36  ;;  %v1299_v36 = vld [vmem:[#allocation7 + $0xe8] sm:$0xff] }
 0x3f2   :  { %2639 = vtanh.f32 %v1028_v41  ;;  %v1300_v41 = vld [vmem:[#allocation7 + $0xf0] sm:$0xff] }
 0x3f3   :  { %v997_v26 = vpop.f32.mrf.mxu2  ;;  %v1017_v32 = vpop.f32.mrf.mxu3 }
 0x3f4   :  { %v1022_v30 = vadd.f32 %v997_v26, %v247_v22  ;;  %v1023_v27 = vadd.f32 %v1017_v32, %v288_v37  ;;  %v1294_v22 = vld [vmem:[#allocation7 + $0xc0] sm:$0xff]  ;;  %v1296_v37 = vld [vmem:[#allocation7 + $0xd0] sm:$0xff]  ;;  %v1297_v26 = vld [vmem:[#allocation7 + $0xd8] sm:$0xff] }
 0x3f5   :  { %v1290_v32 = vld [vmem:[#allocation7 + $0xa0] sm:$0xff] }
 0x3f6   :  { %2641 = vtanh.f32 %v1022_v30  ;;  %v1033_v13 = vmul.f32 0.5, %v1023_v27  ;;  %v1291_v30 = vld [vmem:[#allocation7 + $0xa8] sm:$0xff]  ;;  %v1292_v27 = vld [vmem:[#allocation7 + $0xb0] sm:$0xff] }
 0x3f7   :  { %v2638_v33 = vpop.eup %2637 }
 0x3f8   :  { %v2640_v24 = vpop.eup %2639  ;;  %v1026_v25 = vmul.f32 0.5, %v2638_v33  ;;  %2643 = vtanh.f32 %v1033_v13  ;;  %v1293_v13 = vld [vmem:[#allocation7 + $0xb8] sm:$0xff]  ;;  %v1286_v33 = vld [vmem:[#allocation7 + $0x80] sm:$0xff] }
 0x3f9   :  { %v1030_v43 = vmul.f32 0.5, %v2640_v24  ;;  %v1287_v24 = vld [vmem:[#allocation7 + $0x88] sm:$0xff] }
 0x3fa   :  { %v1027_v59 = vadd.f32 0.5, %v1026_v25  ;;  %v1288_v25 = vld [vmem:[#allocation7 + $0x90] sm:$0xff] }
 0x3fb   :  { %v1031_v20 = vadd.f32 0.5, %v1030_v43  ;;  %v1289_v43 = vld [vmem:[#allocation7 + $0x98] sm:$0xff] }
 0x3fc   :  { %v2642_v10 = vpop.eup %2641 }
 0x3fd   :  { %v1037_v1 = vmul.f32 %v1031_v20, %v3995_v19  ;;  %v1038_v3 = vmul.f32 %v2642_v10, %v1027_v59  ;;  %v1330_v19 = vld [vmem:[#allocation7 + $0x1e0] sm:$0xff] }
 0x3fe   :  { %v2644_v18 = vpop.eup %2643  ;;  %v5565_v59 = vld [vmem:[#allocation36_spill] sm:$0xff] }
 0x3ff   :  { %v4077_v38 = vadd.f32 %v1038_v3, %v1037_v1  ;;  %v1035_v14 = vmul.f32 0.5, %v2644_v18  ;;  %v168_v20 = vadd.f32 %v5565_v59, %v5559_v4  ;;  %v5566_v10 = vld [vmem:[#allocation52_spill] sm:$0xff]  ;;  %v1283_v18 = vld [vmem:[#allocation7 + $0x68] sm:$0xff]  ;;  %v4128_v59 = vld [vmem:[#allocation9 + $0x1d0] sm:$0xff] }
 0x400   :  { %v209_v1 = vadd.f32 %v5566_v10, %v5561_v7  ;;  %v1282_v3 = vld [vmem:[#allocation7 + $0x60] sm:$0xff] }
 0x401   :  { %2645 = vtanh.f32 %v4077_v38  ;;  %v1036_v15 = vadd.f32 0.5, %v1035_v14  ;;  %v1284_v14 = vld [vmem:[#allocation7 + $0x70] sm:$0xff]  ;;  %v4133_v10 = vld [vmem:[#allocation9 + $0x1a0] sm:$0xff] }
 0x407   :  { %v2646_v23 = vpop.eup %2645 }
 0x408   :  { %v4080_v16 = vmul.f32 %v2646_v23, %v1036_v15 }
 0x40a   :  { %1065 = vmatmul.f32.vlgmr.msra.gmra.mxu0 %v4080_v16  ;;  %1085 = vmatmul.f32.vlgmr.msra.gmra.mxu1 %v4080_v16 }
 0x40b   :  { %1105 = vmatmul.f32.vlgmr.msra.gmra.mxu2 %v4080_v16  ;;  %1125 = vmatmul.f32.vlgmr.msra.gmra.mxu3 %v4080_v16 }
 0x40c   :  { %1344 = vmatpush.msra.mxu0 %v1330_v19  ;;  %1385 = vmatpush.msra.mxu1 %v1331_v56  ;;  %v1285_v19 = vld [vmem:[#allocation7 + $0x78] sm:$0xff]  ;;  %v1278_v56 = vld [vmem:[#allocation7 + $0x40] sm:$0xff] }
 0x40d   :  { %1426 = vmatpush.msra.mxu2 %v1332_v60  ;;  %1467 = vmatpush.msra.mxu3 %v1333_v52  ;;  %v1279_v60 = vld [vmem:[#allocation7 + $0x48] sm:$0xff] }
 0x40e   :  { %1345 = vmatpush.msra.mxu0 %v1326_v28  ;;  %1386 = vmatpush.msra.mxu1 %v1327_v29  ;;  %v1280_v29 = vld [vmem:[#allocation7 + $0x50] sm:$0xff] }
 0x40f   :  { %1427 = vmatpush.msra.mxu2 %v1328_v34  ;;  %1468 = vmatpush.msra.mxu3 %v1329_v35  ;;  %v1281_v34 = vld [vmem:[#allocation7 + $0x58] sm:$0xff]  ;;  %v1274_v35 = vld [vmem:[#allocation7 + $0x20] sm:$0xff] }
 0x410   :  { %1346 = vmatpush.msra.mxu0 %v1322_v39  ;;  %1387 = vmatpush.msra.mxu1 %v1323_v40  ;;  %v1275_v39 = vld [vmem:[#allocation7 + $0x28] sm:$0xff]  ;;  %v1276_v40 = vld [vmem:[#allocation7 + $0x30] sm:$0xff] }
 0x411   :  { %1428 = vmatpush.msra.mxu2 %v1324_v55  ;;  %1469 = vmatpush.msra.mxu3 %v1325_v42  ;;  %v1277_v55 = vld [vmem:[#allocation7 + $0x38] sm:$0xff] }
 0x412   :  { %1347 = vmatpush.msra.mxu0 %v1318_v45  ;;  %1388 = vmatpush.msra.mxu1 %v1319_v58  ;;  %v1270_v58 = vld [vmem:[#allocation7] sm:$0xff] }
 0x413   :  { %1429 = vmatpush.msra.mxu2 %v1320_v47  ;;  %1470 = vmatpush.msra.mxu3 %v1321_v48  ;;  %v1271_v47 = vld [vmem:[#allocation7 + $0x8] sm:$0xff]  ;;  %v1272_v48 = vld [vmem:[#allocation7 + $0x10] sm:$0xff] }
 0x414   :  { %1348 = vmatpush.msra.mxu0 %v1314_v61  ;;  %1389 = vmatpush.msra.mxu1 %v1315_v49  ;;  %v1273_v61 = vld [vmem:[#allocation7 + $0x18] sm:$0xff]  ;;  %v5567_v49 = vld [vmem:[#allocation50_spill] sm:$0xff] }
 0x415   :  { %1430 = vmatpush.msra.mxu2 %v1316_v51  ;;  %1471 = vmatpush.msra.mxu3 %v1317_v62  ;;  %v250_v51 = vadd.f32 %v5567_v49, %v3526_v2  ;;  %v5568_v62 = vld [vmem:[#allocation59_spill] sm:$0xff]  ;;  %v4225_v49 = vld [vmem:[#allocation9 + $0xe8] sm:$0xff] }
 0x416   :  { %1349 = vmatpush.msra.mxu0 %v1310_v54  ;;  %1390 = vmatpush.msra.mxu1 %v1311_v31  ;;  %v291_v54 = vadd.f32 %v5568_v62, %v3533_v53  ;;  %v4233_v62 = vld [vmem:[#allocation9 + $0x118] sm:$0xff] }
 0x417   :  { %1431 = vmatpush.msra.mxu2 %v1312_v0  ;;  %1472 = vmatpush.msra.mxu3 %v1313_v63 }
 0x418   :  { %1350 = vmatpush.msra.mxu0 %v1306_v6  ;;  %1391 = vmatpush.msra.mxu1 %v1307_v12 }
 0x419   :  { %1432 = vmatpush.msra.mxu2 %v1308_v57  ;;  %1473 = vmatpush.msra.mxu3 %v1309_v5 }
 0x41a   :  { %1351 = vmatpush.msra.mxu0 %v1302_v46  ;;  %1392 = vmatpush.msra.mxu1 %v1303_v8 }
 0x41b   :  { %1433 = vmatpush.msra.mxu2 %v1304_v50  ;;  %1474 = vmatpush.msra.mxu3 %v1305_v11 }
 0x41c   :  { %1352 = vmatpush.msra.mxu0 %v1298_v9  ;;  %1393 = vmatpush.msra.mxu1 %v1299_v36 }
 0x41d   :  { %1434 = vmatpush.msra.mxu2 %v1300_v41  ;;  %1475 = vmatpush.msra.mxu3 %v1301_v17 }
 0x41e   :  { %1353 = vmatpush.msra.mxu0 %v1294_v22  ;;  %1394 = vmatpush.msra.mxu1 %v1295_v21 }
 0x41f   :  { %1435 = vmatpush.msra.mxu2 %v1296_v37  ;;  %1476 = vmatpush.msra.mxu3 %v1297_v26 }
 0x420   :  { %1354 = vmatpush.msra.mxu0 %v1290_v32  ;;  %1395 = vmatpush.msra.mxu1 %v1291_v30  ;;  %v5570_v30 = vld [vmem:[#allocation38_spill] sm:$0xff] }
 0x421   :  { %1436 = vmatpush.msra.mxu2 %v1292_v27  ;;  %1477 = vmatpush.msra.mxu3 %v1293_v13  ;;  %v5571_v27 = vld [vmem:[#allocation37_spill] sm:$0xff]  ;;  %v4116_v13 = vld [vmem:[#allocation9 + $0x1e0] sm:$0xff] }
 0x422   :  { %1355 = vmatpush.msra.mxu0 %v1286_v33  ;;  %1396 = vmatpush.msra.mxu1 %v1287_v24  ;;  %v4118_v33 = vld [vmem:[#allocation9 + $0x1e8] sm:$0xff]  ;;  %v4120_v24 = vld [vmem:[#allocation9 + $0x1f0] sm:$0xff] }
 0x423   :  { %1437 = vmatpush.msra.mxu2 %v1288_v25  ;;  %1478 = vmatpush.msra.mxu3 %v1289_v43  ;;  %v4124_v25 = vld [vmem:[#allocation9 + $0x1c0] sm:$0xff]  ;;  %v4126_v43 = vld [vmem:[#allocation9 + $0x1c8] sm:$0xff] }
 0x424   :  { %1356 = vmatpush.msra.mxu0 %v1282_v3  ;;  %1397 = vmatpush.msra.mxu1 %v1283_v18  ;;  %v4139_v3 = vld [vmem:[#allocation9 + $0x1b0] sm:$0xff]  ;;  %v4141_v18 = vld [vmem:[#allocation9 + $0x1d8] sm:$0xff] }
 0x425   :  { %1438 = vmatpush.msra.mxu2 %v1284_v14  ;;  %1479 = vmatpush.msra.mxu3 %v1285_v19  ;;  %v4149_v14 = vld [vmem:[#allocation9 + $0x180] sm:$0xff]  ;;  %v4155_v19 = vld [vmem:[#allocation9 + $0x190] sm:$0xff] }
 0x426   :  { %1357 = vmatpush.msra.mxu0 %v1278_v56  ;;  %1398 = vmatpush.msra.mxu1 %v1279_v60  ;;  %v4157_v56 = vld [vmem:[#allocation9 + $0x1b8] sm:$0xff]  ;;  %v4161_v60 = vld [vmem:[#allocation9 + $0x160] sm:$0xff] }
 0x427   :  { %1439 = vmatpush.msra.mxu2 %v1280_v29  ;;  %1480 = vmatpush.msra.mxu3 %v1281_v34  ;;  %v4169_v29 = vld [vmem:[#allocation9 + $0x198] sm:$0xff]  ;;  %v4173_v34 = vld [vmem:[#allocation9 + $0x140] sm:$0xff] }
 0x428   :  { %1358 = vmatpush.msra.mxu0 %v1274_v35  ;;  %1399 = vmatpush.msra.mxu1 %v1275_v39  ;;  %v4175_v35 = vld [vmem:[#allocation9 + $0x148] sm:$0xff]  ;;  %v4179_v39 = vld [vmem:[#allocation9 + $0x150] sm:$0xff] }
 0x429   :  { %1440 = vmatpush.msra.mxu2 %v1276_v40  ;;  %1481 = vmatpush.msra.mxu3 %v1277_v55  ;;  %v4181_v40 = vld [vmem:[#allocation9 + $0x178] sm:$0xff]  ;;  %v4189_v55 = vld [vmem:[#allocation9 + $0x120] sm:$0xff] }
 0x42a   :  { %1359 = vmatpush.msra.mxu0 %v1270_v58  ;;  %1400 = vmatpush.msra.mxu1 %v1271_v47  ;;  %v4197_v58 = vld [vmem:[#allocation9 + $0x158] sm:$0xff]  ;;  %v4215_v47 = vld [vmem:[#allocation9 + $0x108] sm:$0xff] }
 0x42b   :  { %1441 = vmatpush.msra.mxu2 %v1272_v48  ;;  %1482 = vmatpush.msra.mxu3 %v1273_v61  ;;  %v4217_v48 = vld [vmem:[#allocation9 + $0x110] sm:$0xff]  ;;  %v4221_v61 = vld [vmem:[#allocation9 + $0x138] sm:$0xff] }
 0x487   :  { %v1066_v15 = vpop.f32.mrf.mxu0  ;;  %v1086_v23 = vpop.f32.mrf.mxu1 }
 0x488   :  { %v1129_v52 = vadd.f32 %v1066_v15, %v168_v20  ;;  %v1130_v28 = vadd.f32 %v1086_v23, %v209_v1  ;;  %v4131_v20 = vld [vmem:[#allocation9 + $0x1f8] sm:$0xff]  ;;  %v4135_v1 = vld [vmem:[#allocation9 + $0x1a8] sm:$0xff] }
 0x489   :  { %v4151_v15 = vld [vmem:[#allocation9 + $0x188] sm:$0xff] }
 0x48a   :  { %v1133_v42 = vmul.f32 0.5, %v1129_v52  ;;  %v1137_v45 = vmul.f32 0.5, %v1130_v28  ;;  %v5572_v23 = vld [vmem:[#allocation21_spill] sm:$0xff]  ;;  %v4167_v28 = vld [vmem:[#allocation9 + $0x170] sm:$0xff] }
 0x48b   :  { %v4163_v52 = vld [vmem:[#allocation9 + $0x168] sm:$0xff] }
 0x48c   :  { %2647 = vtanh.f32 %v1133_v42  ;;  %v4191_v42 = vld [vmem:[#allocation9 + $0x128] sm:$0xff] }
 0x48d   :  { %2649 = vtanh.f32 %v1137_v45  ;;  %v4195_v45 = vld [vmem:[#allocation9 + $0x130] sm:$0xff] }
 0x48e   :  { %v1106_v31 = vpop.f32.mrf.mxu2  ;;  %v1126_v0 = vpop.f32.mrf.mxu3 }
 0x48f   :  { %v1131_v63 = vadd.f32 %v1106_v31, %v250_v51  ;;  %v1132_v6 = vadd.f32 %v1126_v0, %v291_v54  ;;  %v4229_v51 = vld [vmem:[#allocation9 + $0xf0] sm:$0xff]  ;;  %v4237_v54 = vld [vmem:[#allocation9 + $0xf8] sm:$0xff]  ;;  %v4240_v31 = vld [vmem:[#allocation9 + $0xc0] sm:$0xff] }
 0x490   :  { %v4242_v0 = vld [vmem:[#allocation9 + $0xc8] sm:$0xff] }
 0x491   :  { %2651 = vtanh.f32 %v1131_v63  ;;  %v1142_v12 = vmul.f32 0.5, %v1132_v6  ;;  %v4244_v63 = vld [vmem:[#allocation9 + $0xd0] sm:$0xff]  ;;  %v4248_v6 = vld [vmem:[#allocation9 + $0xd8] sm:$0xff] }
 0x492   :  { %v2648_v57 = vpop.eup %2647 }
 0x493   :  { %v2650_v5 = vpop.eup %2649  ;;  %v1135_v46 = vmul.f32 0.5, %v2648_v57  ;;  %2653 = vtanh.f32 %v1142_v12  ;;  %v4251_v12 = vld [vmem:[#allocation9 + $0xa0] sm:$0xff]  ;;  %v4253_v57 = vld [vmem:[#allocation9 + $0xa8] sm:$0xff] }
 0x494   :  { %v1139_v8 = vmul.f32 0.5, %v2650_v5  ;;  %v4255_v5 = vld [vmem:[#allocation9 + $0xb0] sm:$0xff] }
 0x495   :  { %v1136_v50 = vadd.f32 0.5, %v1135_v46  ;;  %5573 = vst [vmem:[#allocation41_spill] sm:$0xff] %v4255_v5  ;;  %v4260_v46 = vld [vmem:[#allocation9 + $0xb8] sm:$0xff] }
 0x496   :  { %v1140_v11 = vadd.f32 0.5, %v1139_v8  ;;  %5574 = vst [vmem:[#allocation62_spill] sm:$0xff] %v4260_v46  ;;  %v4263_v8 = vld [vmem:[#allocation9 + $0x80] sm:$0xff] }
 0x497   :  { %v2652_v9 = vpop.eup %2651  ;;  %5575 = vst [vmem:[#allocation40_spill] sm:$0xff] %v4263_v8 }
 0x498   :  { %v1146_v36 = vmul.f32 %v1140_v11, %v4077_v38  ;;  %v1147_v41 = vmul.f32 %v2652_v9, %v1136_v50  ;;  %v5569_v38 = vld [vmem:[#allocation61_spill] sm:$0xff]  ;;  %v4267_v11 = vld [vmem:[#allocation9 + $0x90] sm:$0xff]  ;;  %v4272_v9 = vld [vmem:[#allocation9 + $0x60] sm:$0xff] }
 0x499   :  { %v2654_v17 = vpop.eup %2653  ;;  %v4265_v50 = vld [vmem:[#allocation9 + $0x88] sm:$0xff]  ;;  %5577 = vst [vmem:[#allocation43_spill] sm:$0xff] %v4267_v11 }
 0x49a   :  { %v4095_v22 = vadd.f32 %v1147_v41, %v1146_v36  ;;  %v1144_v21 = vmul.f32 0.5, %v2654_v17  ;;  %5576 = vst [vmem:[#allocation48_spill] sm:$0xff] %v4265_v50  ;;  %v4274_v36 = vld [vmem:[#allocation9 + $0x68] sm:$0xff]  ;;  %v4276_v41 = vld [vmem:[#allocation9 + $0x70] sm:$0xff]  ;;  %v4279_v17 = vld [vmem:[#allocation9 + $0x98] sm:$0xff] }
 0x49b   :  { %5578 = vst [vmem:[#allocation63_spill] sm:$0xff] %v4272_v9 }
 0x49c   :  { %2655 = vtanh.f32 %v4095_v22  ;;  %v1145_v37 = vadd.f32 0.5, %v1144_v21  ;;  %5579 = vst [vmem:[#allocation42_spill] sm:$0xff] %v4274_v36  ;;  %v4281_v21 = vld [vmem:[#allocation9 + $0x40] sm:$0xff] }
 0x49d   :  { %5580 = vst [vmem:[#allocation51_spill] sm:$0xff] %v4276_v41 }
 0x49e   :  { %5581 = vst [vmem:[#allocation34_spill] sm:$0xff] %v4279_v17 }
 0x49f   :  { %5582 = vst [vmem:[#allocation46_spill] sm:$0xff] %v4281_v21 }
 0x4a2   :  { %v2656_v26 = vpop.eup %2655 }
 0x4a3   :  { %v4098_v32 = vmul.f32 %v2656_v26, %v1145_v37  ;;  %v4283_v37 = vld [vmem:[#allocation9 + $0x48] sm:$0xff]  ;;  %v5584_v26 = vld [vmem:[#allocation39_spill] sm:$0xff] }
 0x4a4   :  { %5583 = vst [vmem:[#allocation44_spill] sm:$0xff] %v4283_v37 }
 0x4a5   :  { %1174 = vmatmul.f32.vlgmr.msrb.gmra.mxu0 %v4098_v32  ;;  %1194 = vmatmul.f32.vlgmr.msrb.gmra.mxu1 %v4098_v32 }
 0x4a6   :  { %1214 = vmatmul.f32.vlgmr.msrb.gmra.mxu2 %v4098_v32  ;;  %1234 = vmatmul.f32.vlgmr.msrb.gmra.mxu3 %v4098_v32 }
 0x4a7   :  { %1608 = vmatpush.msrb.mxu0 %v4116_v13  ;;  %1628 = vmatpush.msrb.mxu1 %v4118_v33 }
 0x4a8   :  { %1648 = vmatpush.msrb.mxu2 %v4120_v24  ;;  %1668 = vmatpush.msrb.mxu3 %v4131_v20 }
 0x4a9   :  { %1609 = vmatpush.msrb.mxu0 %v4124_v25  ;;  %1629 = vmatpush.msrb.mxu1 %v4126_v43 }
 0x4aa   :  { %1649 = vmatpush.msrb.mxu2 %v4128_v59  ;;  %1669 = vmatpush.msrb.mxu3 %v4141_v18 }
 0x4ab   :  { %1610 = vmatpush.msrb.mxu0 %v4133_v10  ;;  %1630 = vmatpush.msrb.mxu1 %v4135_v1 }
 0x4ac   :  { %1650 = vmatpush.msrb.mxu2 %v4139_v3  ;;  %1670 = vmatpush.msrb.mxu3 %v4157_v56 }
 0x4ad   :  { %1360 = vmatmul.f32.vlgmr.msra.gmra.mxu0 %v5569_v38  ;;  %1401 = vmatmul.f32.vlgmr.msra.gmra.mxu1 %v5569_v38 }
 0x4ae   :  { %1442 = vmatmul.f32.vlgmr.msra.gmra.mxu2 %v5569_v38  ;;  %1483 = vmatmul.f32.vlgmr.msra.gmra.mxu3 %v5569_v38  ;;  %v5585_v38 = vld [vmem:[#allocation55_spill] sm:$0xff] }
 0x4af   :  { %1611 = vmatpush.msrb.mxu0 %v4149_v14  ;;  %1631 = vmatpush.msrb.mxu1 %v4151_v15 }
 0x4b0   :  { %1651 = vmatpush.msrb.mxu2 %v4155_v19  ;;  %1671 = vmatpush.msrb.mxu3 %v4169_v29 }
 0x4b1   :  { %1612 = vmatpush.msrb.mxu0 %v4161_v60  ;;  %1632 = vmatpush.msrb.mxu1 %v4163_v52 }
 0x4b2   :  { %1652 = vmatpush.msrb.mxu2 %v4167_v28  ;;  %1672 = vmatpush.msrb.mxu3 %v4181_v40 }
 0x4b3   :  { %1613 = vmatpush.msrb.mxu0 %v4173_v34  ;;  %1633 = vmatpush.msrb.mxu1 %v4175_v35 }
 0x4b4   :  { %1653 = vmatpush.msrb.mxu2 %v4179_v39  ;;  %1673 = vmatpush.msrb.mxu3 %v4197_v58 }
 0x4b5   :  { %1363 = vmatmul.f32.gmra.mxu0 %v5570_v30  ;;  %1404 = vmatmul.f32.gmra.mxu1 %v5570_v30 }
 0x4b6   :  { %1445 = vmatmul.f32.gmra.mxu2 %v5570_v30  ;;  %1486 = vmatmul.f32.gmra.mxu3 %v5570_v30  ;;  %v212_v30 = vadd.f32 %v5585_v38, %v5561_v7  ;;  %v4303_v38 = vld [vmem:[#allocation9 + $0x30] sm:$0xff] }
 0x4b7   :  { %1614 = vmatpush.msrb.mxu0 %v4189_v55  ;;  %1634 = vmatpush.msrb.mxu1 %v4191_v42  ;;  %5590 = vst [vmem:[#allocation18_spill] sm:$0xff] %v4303_v38 }
 0x4b8   :  { %1654 = vmatpush.msrb.mxu2 %v4195_v45  ;;  %1674 = vmatpush.msrb.mxu3 %v4221_v61 }
 0x4b9   :  { %1635 = vmatpush.msrb.mxu1 %v4215_v47 }
 0x4ba   :  { %1655 = vmatpush.msrb.mxu2 %v4217_v48  ;;  %1675 = vmatpush.msrb.mxu3 %v4233_v62 }
 0x4bb   :  { %1636 = vmatpush.msrb.mxu1 %v4225_v49 }
 0x4bc   :  { %1656 = vmatpush.msrb.mxu2 %v4229_v51  ;;  %1676 = vmatpush.msrb.mxu3 %v4237_v54 }
 0x4bd   :  { %1366 = vmatmul.f32.gmra.mxu0 %v5571_v27  ;;  %1407 = vmatmul.f32.gmra.mxu1 %v5571_v27 }
 0x4be   :  { %1448 = vmatmul.f32.gmra.mxu2 %v5571_v27  ;;  %1489 = vmatmul.f32.gmra.mxu3 %v5571_v27  ;;  %v4291_v27 = vld [vmem:[#allocation9 + $0x50] sm:$0xff] }
 0x4bf   :  { %1637 = vmatpush.msrb.mxu1 %v4242_v0  ;;  %1657 = vmatpush.msrb.mxu2 %v4244_v63  ;;  %5586 = vst [vmem:[#allocation54_spill] sm:$0xff] %v4291_v27 }
 0x4c0   :  { %1677 = vmatpush.msrb.mxu3 %v4248_v6 }
 0x4c1   :  { %1638 = vmatpush.msrb.mxu1 %v4253_v57  ;;  %1658 = vmatpush.msrb.mxu2 %v4255_v5 }
 0x4c2   :  { %1678 = vmatpush.msrb.mxu3 %v4260_v46 }
 0x4c3   :  { %1639 = vmatpush.msrb.mxu1 %v4265_v50  ;;  %1659 = vmatpush.msrb.mxu2 %v4267_v11 }
 0x4c4   :  { %1679 = vmatpush.msrb.mxu3 %v4279_v17 }
 0x4c5   :  { %1369 = vmatmul.f32.gmra.mxu0 %v5572_v23  ;;  %1410 = vmatmul.f32.gmra.mxu1 %v5572_v23 }
 0x4c6   :  { %1451 = vmatmul.f32.gmra.mxu2 %v5572_v23  ;;  %1492 = vmatmul.f32.gmra.mxu3 %v5572_v23  ;;  %v4293_v23 = vld [vmem:[#allocation9 + $0x78] sm:$0xff] }
 0x4c7   :  { %1640 = vmatpush.msrb.mxu1 %v4274_v36  ;;  %5587 = vst [vmem:[#allocation31_spill] sm:$0xff] %v4293_v23  ;;  %1660 = vmatpush.msrb.mxu2 %v4276_v41  ;;  %v4305_v36 = vld [vmem:[#allocation9 + $0x58] sm:$0xff]  ;;  %v4309_v41 = vld [vmem:[#allocation9] sm:$0xff] }
 0x4c8   :  { %5591 = vst [vmem:[#allocation25_spill] sm:$0xff] %v4305_v36  ;;  %1680 = vmatpush.msrb.mxu3 %v4293_v23 }
 0x4c9   :  { %1641 = vmatpush.msrb.mxu1 %v4283_v37  ;;  %1661 = vmatpush.msrb.mxu2 %v4291_v27  ;;  %5592 = vst [vmem:[#allocation12_spill] sm:$0xff] %v4309_v41 }
 0x4ca   :  { %1681 = vmatpush.msrb.mxu3 %v4305_v36 }
 0x4cb   :  { %1662 = vmatpush.msrb.mxu2 %v4303_v38 }
 0x4cd   :  { %1372 = vmatmul.f32.gmra.mxu0 %v3998_v44  ;;  %1413 = vmatmul.f32.gmra.mxu1 %v3998_v44 }
 0x4ce   :  { %1454 = vmatmul.f32.gmra.mxu2 %v3998_v44  ;;  %1495 = vmatmul.f32.gmra.mxu3 %v3998_v44  ;;  %v4213_v44 = vld [vmem:[#allocation9 + $0x100] sm:$0xff] }
 0x4cf   :  { %1615 = vmatpush.msrb.mxu0 %v4213_v44 }
 0x4d5   :  { %1375 = vmatmul.f32.gmra.mxu0 %v4080_v16  ;;  %1416 = vmatmul.f32.gmra.mxu1 %v4080_v16 }
 0x4d6   :  { %1457 = vmatmul.f32.gmra.mxu2 %v4080_v16  ;;  %1498 = vmatmul.f32.gmra.mxu3 %v4080_v16  ;;  %v4223_v16 = vld [vmem:[#allocation9 + $0xe0] sm:$0xff] }
 0x4d7   :  { %1616 = vmatpush.msrb.mxu0 %v4223_v16 }
 0x4d9   :  { %1617 = vmatpush.msrb.mxu0 %v4240_v31 }
 0x4db   :  { %1618 = vmatpush.msrb.mxu0 %v4251_v12 }
 0x4dd   :  { %1378 = vmatmul.f32.gmra.mxu0 %v4098_v32  ;;  %1419 = vmatmul.f32.gmra.mxu1 %v4098_v32 }
 0x4de   :  { %1460 = vmatmul.f32.gmra.mxu2 %v4098_v32  ;;  %1501 = vmatmul.f32.gmra.mxu3 %v4098_v32  ;;  %v171_v32 = vadd.f32 %v5584_v26, %v5559_v4  ;;  %v4299_v4 = vld [vmem:[#allocation9 + $0x28] sm:$0xff] }
 0x4df   :  { %1619 = vmatpush.msrb.mxu0 %v4263_v8  ;;  %v4297_v8 = vld [vmem:[#allocation9 + $0x20] sm:$0xff]  ;;  %5589 = vst [vmem:[#allocation28_spill] sm:$0xff] %v4299_v4  ;;  %1642 = vmatpush.msrb.mxu1 %v4299_v4 }
 0x4e0   :  { %5588 = vst [vmem:[#allocation45_spill] sm:$0xff] %v4297_v8 }
 0x4e1   :  { %1620 = vmatpush.msrb.mxu0 %v4272_v9  ;;  %v4311_v9 = vld [vmem:[#allocation9 + $0x8] sm:$0xff] }
 0x4e2   :  { %5593 = vst [vmem:[#allocation17_spill] sm:$0xff] %v4311_v9  ;;  %1643 = vmatpush.msrb.mxu1 %v4311_v9 }
 0x4e3   :  { %1621 = vmatpush.msrb.mxu0 %v4281_v21 }
 0x4e4   :  { %1735 = vmatpush.msra.mxu1 %v4118_v33 }
 0x4e5   :  { %1622 = vmatpush.msrb.mxu0 %v4297_v8 }
 0x4e6   :  { %1736 = vmatpush.msra.mxu1 %v4126_v43 }
 0x4e7   :  { %1623 = vmatpush.msrb.mxu0 %v4309_v41 }
 0x4e8   :  { %1737 = vmatpush.msra.mxu1 %v4135_v1 }
 0x4e9   :  { %1715 = vmatpush.msra.mxu0 %v4116_v13 }
 0x4ea   :  { %1738 = vmatpush.msra.mxu1 %v4151_v15 }
 0x4eb   :  { %1716 = vmatpush.msra.mxu0 %v4124_v25 }
 0x4ec   :  { %1739 = vmatpush.msra.mxu1 %v4163_v52 }
 0x4ed   :  { %1717 = vmatpush.msra.mxu0 %v4133_v10 }
 0x4ee   :  { %1740 = vmatpush.msra.mxu1 %v4175_v35 }
 0x4ef   :  { %1718 = vmatpush.msra.mxu0 %v4149_v14 }
 0x4f0   :  { %1741 = vmatpush.msra.mxu1 %v4191_v42 }
 0x4f1   :  { %1719 = vmatpush.msra.mxu0 %v4161_v60 }
 0x4f2   :  { %1742 = vmatpush.msra.mxu1 %v4215_v47 }
 0x4f3   :  { %1720 = vmatpush.msra.mxu0 %v4173_v34 }
 0x4f4   :  { %1743 = vmatpush.msra.mxu1 %v4225_v49 }
 0x4f5   :  { %1721 = vmatpush.msra.mxu0 %v4189_v55 }
 0x4f6   :  { %1744 = vmatpush.msra.mxu1 %v4242_v0 }
 0x4f7   :  { %1722 = vmatpush.msra.mxu0 %v4213_v44 }
 0x4f8   :  { %1745 = vmatpush.msra.mxu1 %v4253_v57 }
 0x4f9   :  { %1723 = vmatpush.msra.mxu0 %v4223_v16 }
 0x4fb   :  { %1724 = vmatpush.msra.mxu0 %v4240_v31 }
 0x4fd   :  { %1725 = vmatpush.msra.mxu0 %v4251_v12 }
 0x522   :  { %v1175_v11 = vpop.f32.mrf.mxu0  ;;  %v1195_v50 = vpop.f32.mrf.mxu1 }
 0x523   :  { %v1238_v26 = vadd.f32 %v1175_v11, %v171_v32  ;;  %v1239_v7 = vadd.f32 %v1195_v50, %v212_v30  ;;  %v4315_v50 = vld [vmem:[#allocation9 + $0x10] sm:$0xff]  ;;  %v4317_v11 = vld [vmem:[#allocation9 + $0x38] sm:$0xff]  ;;  %v5597_v30 = vld [vmem:[#allocation53_spill] sm:$0xff] }
 0x524   :  { %5594 = vst [vmem:[#allocation29_spill] sm:$0xff] %v4315_v50  ;;  %v4323_v32 = vld [vmem:[#allocation9 + $0x18] sm:$0xff]  ;;  %1663 = vmatpush.msrb.mxu2 %v4315_v50  ;;  %1682 = vmatpush.msrb.mxu3 %v4317_v11 }
 0x525   :  { %v1242_v17 = vmul.f32 0.5, %v1238_v26  ;;  %v1246_v46 = vmul.f32 0.5, %v1239_v7  ;;  %5595 = vst [vmem:[#allocation15_spill] sm:$0xff] %v4317_v11  ;;  %v253_v26 = vadd.f32 %v5597_v30, %v3526_v2  ;;  %v5598_v7 = vld [vmem:[#allocation60_spill] sm:$0xff] }
 0x526   :  { %5596 = vst [vmem:[#allocation22_spill] sm:$0xff] %v4323_v32  ;;  %v294_v4 = vadd.f32 %v5598_v7, %v3533_v53  ;;  %1683 = vmatpush.msrb.mxu3 %v4323_v32  ;;  %1755 = vmatpush.msra.mxu2 %v4120_v24 }
 0x527   :  { %2657 = vtanh.f32 %v1242_v17 }
 0x528   :  { %2659 = vtanh.f32 %v1246_v46  ;;  %1775 = vmatpush.msra.mxu3 %v4131_v20  ;;  %1756 = vmatpush.msra.mxu2 %v4128_v59 }
 0x529   :  { %v1215_v38 = vpop.f32.mrf.mxu2  ;;  %v1235_v8 = vpop.f32.mrf.mxu3 }
 0x52a   :  { %v1240_v17 = vadd.f32 %v1215_v38, %v253_v26  ;;  %v1241_v9 = vadd.f32 %v1235_v8, %v294_v4  ;;  %1776 = vmatpush.msra.mxu3 %v4141_v18  ;;  %1757 = vmatpush.msra.mxu2 %v4139_v3 }
 0x52c   :  { %2661 = vtanh.f32 %v1240_v17  ;;  %v1251_v2 = vmul.f32 0.5, %v1241_v9  ;;  %1777 = vmatpush.msra.mxu3 %v4157_v56  ;;  %1758 = vmatpush.msra.mxu2 %v4155_v19 }
 0x52d   :  { %v2658_v53 = vpop.eup %2657 }
 0x52e   :  { %v2660_v46 = vpop.eup %2659  ;;  %v1244_v8 = vmul.f32 0.5, %v2658_v53  ;;  %2663 = vtanh.f32 %v1251_v2  ;;  %1778 = vmatpush.msra.mxu3 %v4169_v29  ;;  %1759 = vmatpush.msra.mxu2 %v4167_v28 }
 0x52f   :  { %v1248_v4 = vmul.f32 0.5, %v2660_v46 }
 0x530   :  { %v1245_v9 = vadd.f32 0.5, %v1244_v8  ;;  %1779 = vmatpush.msra.mxu3 %v4181_v40  ;;  %1760 = vmatpush.msra.mxu2 %v4179_v39 }
 0x531   :  { %v1249_v38 = vadd.f32 0.5, %v1248_v4  ;;  %v5599_v4 = vld [vmem:[#allocation62_spill] sm:$0xff] }
 0x532   :  { %v2662_v30 = vpop.eup %2661  ;;  %1780 = vmatpush.msra.mxu3 %v4197_v58  ;;  %1761 = vmatpush.msra.mxu2 %v4195_v45 }
 0x533   :  { %v1255_v26 = vmul.f32 %v1249_v38, %v4095_v22  ;;  %v1256_v7 = vmul.f32 %v2662_v30, %v1245_v9  ;;  %v5600_v9 = vld [vmem:[#allocation40_spill] sm:$0xff]  ;;  %v5602_v30 = vld [vmem:[#allocation43_spill] sm:$0xff] }
 0x534   :  { %v2664_v17 = vpop.eup %2663  ;;  %1781 = vmatpush.msra.mxu3 %v4221_v61  ;;  %1762 = vmatpush.msra.mxu2 %v4217_v48  ;;  %v5601_v38 = vld [vmem:[#allocation48_spill] sm:$0xff] }
 0x535   :  { %v1257_v2 = vadd.f32 %v1256_v7, %v1255_v26  ;;  %v1253_v22 = vmul.f32 0.5, %v2664_v17  ;;  %1726 = vmatpush.msra.mxu0 %v5600_v9  ;;  %1746 = vmatpush.msra.mxu1 %v5601_v38  ;;  %v5603_v26 = vld [vmem:[#allocation34_spill] sm:$0xff]  ;;  %v5604_v7 = vld [vmem:[#allocation63_spill] sm:$0xff] }
 0x536   :  { %1782 = vmatpush.msra.mxu3 %v4233_v62  ;;  %1763 = vmatpush.msra.mxu2 %v4229_v51  ;;  %v5605_v17 = vld [vmem:[#allocation42_spill] sm:$0xff] }
 0x537   :  { %2665 = vtanh.f32 %v1257_v2  ;;  %v1254_v53 = vadd.f32 0.5, %v1253_v22  ;;  %1727 = vmatpush.msra.mxu0 %v5604_v7  ;;  %1747 = vmatpush.msra.mxu1 %v5605_v17  ;;  %v5606_v2 = vld [vmem:[#allocation51_spill] sm:$0xff]  ;;  %v5607_v22 = vmov 0.0  }
 0x538   :  { %1783 = vmatpush.msra.mxu3 %v4237_v54  ;;  %1764 = vmatpush.msra.mxu2 %v4244_v63 }
 0x539   :  { %1728 = vmatpush.msra.mxu0 %v4281_v21  ;;  %1748 = vmatpush.msra.mxu1 %v4283_v37 }
 0x53a   :  { %1784 = vmatpush.msra.mxu3 %v4248_v6  ;;  %1765 = vmatpush.msra.mxu2 %v4255_v5 }
 0x53c   :  { %1785 = vmatpush.msra.mxu3 %v5599_v4  ;;  %1766 = vmatpush.msra.mxu2 %v5602_v30 }
 0x53d   :  { %v2666_v46 = vpop.eup %2665 }
 0x53e   :  { %v1259_v8 = vmul.f32 %v2666_v46, %v1254_v53  ;;  %1786 = vmatpush.msra.mxu3 %v5603_v26  ;;  %1767 = vmatpush.msra.mxu2 %v5606_v2  ;;  %v5608_v53 = vld [vmem:[#allocation45_spill] sm:$0xff]  ;;  %v5609_v46 = vld [vmem:[#allocation28_spill] sm:$0xff] }
 0x53f   :  { %1729 = vmatpush.msra.mxu0 %v5608_v53  ;;  %1749 = vmatpush.msra.mxu1 %v5609_v46 }
 0x540   :  { %1381 = vmatmul.f32.gmra.mxu0 %v1259_v8  ;;  %1422 = vmatmul.f32.gmra.mxu1 %v1259_v8 }
 0x541   :  { %1463 = vmatmul.f32.gmra.mxu2 %v1259_v8  ;;  %1504 = vmatmul.f32.gmra.mxu3 %v1259_v8  ;;  %v5610_v8 = vld [vmem:[#allocation18_spill] sm:$0xff] }
 0x542   :  { %1787 = vmatpush.msra.mxu3 %v4293_v23  ;;  %1768 = vmatpush.msra.mxu2 %v4291_v27  ;;  %v5611_v27 = vld [vmem:[#allocation17_spill] sm:$0xff] }
 0x543   :  { %1730 = vmatpush.msra.mxu0 %v4309_v41  ;;  %1750 = vmatpush.msra.mxu1 %v5611_v27 }
 0x544   :  { %1788 = vmatpush.msra.mxu3 %v4305_v36  ;;  %1769 = vmatpush.msra.mxu2 %v5610_v8 }
 0x546   :  { %1789 = vmatpush.msra.mxu3 %v4317_v11  ;;  %1770 = vmatpush.msra.mxu2 %v4315_v50 }
 0x548   :  { %1624 = vmatmul.f32.vlgmr.msrb.gmra.mxu0 %v5607_v22  ;;  %1644 = vmatmul.f32.vlgmr.msrb.gmra.mxu1 %v5607_v22 }
 0x549   :  { %1664 = vmatmul.f32.vlgmr.msrb.gmra.mxu2 %v5607_v22  ;;  %1684 = vmatmul.f32.vlgmr.msrb.gmra.mxu3 %v5607_v22  ;;  %v5612_v22 = vld [vmem:[#allocation54_spill] sm:$0xff] }
 0x54a   :  { %1790 = vmatpush.msra.mxu3 %v4323_v32  ;;  %1822 = vmatpush.msrb.mxu0 %v4116_v13 }
 0x54b   :  { %1842 = vmatpush.msrb.mxu1 %v4118_v33  ;;  %1862 = vmatpush.msrb.mxu2 %v4120_v24 }
 0x54c   :  { %1882 = vmatpush.msrb.mxu3 %v4131_v20  ;;  %1823 = vmatpush.msrb.mxu0 %v4124_v25 }
 0x54d   :  { %1843 = vmatpush.msrb.mxu1 %v4126_v43  ;;  %1863 = vmatpush.msrb.mxu2 %v4128_v59 }
 0x54e   :  { %1883 = vmatpush.msrb.mxu3 %v4141_v18  ;;  %1824 = vmatpush.msrb.mxu0 %v4133_v10 }
 0x54f   :  { %1844 = vmatpush.msrb.mxu1 %v4135_v1  ;;  %1864 = vmatpush.msrb.mxu2 %v4139_v3 }
 0x550   :  { %1884 = vmatpush.msrb.mxu3 %v4157_v56  ;;  %1825 = vmatpush.msrb.mxu0 %v4149_v14 }
 0x551   :  { %1845 = vmatpush.msrb.mxu1 %v4151_v15  ;;  %1865 = vmatpush.msrb.mxu2 %v4155_v19 }
 0x552   :  { %1885 = vmatpush.msrb.mxu3 %v4169_v29  ;;  %1826 = vmatpush.msrb.mxu0 %v4161_v60 }
 0x553   :  { %1846 = vmatpush.msrb.mxu1 %v4163_v52  ;;  %1866 = vmatpush.msrb.mxu2 %v4167_v28 }
 0x554   :  { %1886 = vmatpush.msrb.mxu3 %v4181_v40  ;;  %1827 = vmatpush.msrb.mxu0 %v4173_v34 }
 0x555   :  { %1847 = vmatpush.msrb.mxu1 %v4175_v35  ;;  %1867 = vmatpush.msrb.mxu2 %v4179_v39 }
 0x556   :  { %1887 = vmatpush.msrb.mxu3 %v4197_v58  ;;  %1828 = vmatpush.msrb.mxu0 %v4189_v55 }
 0x557   :  { %1848 = vmatpush.msrb.mxu1 %v4191_v42  ;;  %1868 = vmatpush.msrb.mxu2 %v4195_v45 }
 0x558   :  { %1888 = vmatpush.msrb.mxu3 %v4221_v61  ;;  %1829 = vmatpush.msrb.mxu0 %v4213_v44 }
 0x559   :  { %1849 = vmatpush.msrb.mxu1 %v4215_v47  ;;  %1869 = vmatpush.msrb.mxu2 %v4217_v48 }
 0x55a   :  { %1889 = vmatpush.msrb.mxu3 %v4233_v62  ;;  %1830 = vmatpush.msrb.mxu0 %v4223_v16 }
 0x55b   :  { %1850 = vmatpush.msrb.mxu1 %v4225_v49  ;;  %1870 = vmatpush.msrb.mxu2 %v4229_v51 }
 0x55c   :  { %1890 = vmatpush.msrb.mxu3 %v4237_v54  ;;  %1831 = vmatpush.msrb.mxu0 %v4240_v31 }
 0x55d   :  { %1851 = vmatpush.msrb.mxu1 %v4242_v0  ;;  %1871 = vmatpush.msrb.mxu2 %v4244_v63 }
 0x55e   :  { %1891 = vmatpush.msrb.mxu3 %v4248_v6  ;;  %1832 = vmatpush.msrb.mxu0 %v4251_v12 }
 0x55f   :  { %1852 = vmatpush.msrb.mxu1 %v4253_v57  ;;  %1872 = vmatpush.msrb.mxu2 %v4255_v5 }
 0x560   :  { %1892 = vmatpush.msrb.mxu3 %v5599_v4  ;;  %1833 = vmatpush.msrb.mxu0 %v5600_v9 }
 0x561   :  { %1853 = vmatpush.msrb.mxu1 %v5601_v38  ;;  %1873 = vmatpush.msrb.mxu2 %v5602_v30 }
 0x562   :  { %1893 = vmatpush.msrb.mxu3 %v5603_v26  ;;  %1834 = vmatpush.msrb.mxu0 %v5604_v7 }
 0x563   :  { %1854 = vmatpush.msrb.mxu1 %v5605_v17  ;;  %1874 = vmatpush.msrb.mxu2 %v5606_v2 }
 0x564   :  { %1894 = vmatpush.msrb.mxu3 %v4293_v23  ;;  %1835 = vmatpush.msrb.mxu0 %v4281_v21  ;;  %v1443_v21 = vpop.f32.mrf.mxu2 }
 0x565   :  { %1855 = vmatpush.msrb.mxu1 %v4283_v37  ;;  %1875 = vmatpush.msrb.mxu2 %v5612_v22  ;;  %v1361_v37 = vpop.f32.mrf.mxu0  ;;  %v1402_v22 = vpop.f32.mrf.mxu1 }
 0x566   :  { %1895 = vmatpush.msrb.mxu3 %v4305_v36  ;;  %1836 = vmatpush.msrb.mxu0 %v5608_v53  ;;  %v1484_v36 = vpop.f32.mrf.mxu3 }
 0x567   :  { %1856 = vmatpush.msrb.mxu1 %v5609_v46  ;;  %1876 = vmatpush.msrb.mxu2 %v5610_v8 }
 0x568   :  { %1896 = vmatpush.msrb.mxu3 %v4317_v11  ;;  %1837 = vmatpush.msrb.mxu0 %v4309_v41 }
 0x569   :  { %1857 = vmatpush.msrb.mxu1 %v5611_v27  ;;  %1877 = vmatpush.msrb.mxu2 %v4315_v50 }
 0x56a   :  { %1897 = vmatpush.msrb.mxu3 %v4323_v32 }
 0x56c   :  { %v4469_v46 = vpop.f32.mrf.mxu2 }
 0x56d   :  { %v4465_v23 = vpop.f32.mrf.mxu0  ;;  %v4467_v53 = vpop.f32.mrf.mxu1  ;;  %5615 = vst [vmem:[#allocation32_spill] sm:$0xff] %v4469_v46 }
 0x56e   :  { %5613 = vst [vmem:[#allocation20_spill] sm:$0xff] %v4465_v23  ;;  %v4471_v8 = vpop.f32.mrf.mxu3 }
 0x56f   :  { %5614 = vst [vmem:[#allocation13_spill] sm:$0xff] %v4467_v53 }
 0x570   :  { %5616 = vst [vmem:[#allocation26_spill] sm:$0xff] %v4471_v8 }
 0x574   :  { %v4477_v27 = vpop.f32.mrf.mxu2 }
 0x575   :  { %v4473_v11 = vpop.f32.mrf.mxu0  ;;  %v4475_v41 = vpop.f32.mrf.mxu1  ;;  %5619 = vst [vmem:[#allocation16_spill] sm:$0xff] %v4477_v27 }
 0x576   :  { %5617 = vst [vmem:[#allocation19_spill] sm:$0xff] %v4473_v11  ;;  %v4479_v50 = vpop.f32.mrf.mxu3 }
 0x577   :  { %5618 = vst [vmem:[#allocation30_spill] sm:$0xff] %v4475_v41 }
 0x578   :  { %5620 = vst [vmem:[#allocation23_spill] sm:$0xff] %v4479_v50 }
 0x57c   :  { %v4485_v17 = vpop.f32.mrf.mxu2 }
 0x57d   :  { %v4481_v32 = vpop.f32.mrf.mxu0  ;;  %v4483_v2 = vpop.f32.mrf.mxu1  ;;  %5623 = vst [vmem:[#allocation33_spill] sm:$0xff] %v4485_v17 }
 0x57e   :  { %5621 = vst [vmem:[#allocation24_spill] sm:$0xff] %v4481_v32  ;;  %v4487_v23 = vpop.f32.mrf.mxu3 }
 0x57f   :  { %5622 = vst [vmem:[#allocation14_spill] sm:$0xff] %v4483_v2 }
 0x580   :  { %5624 = vst [vmem:[#allocation27_spill] sm:$0xff] %v4487_v23 }
 0x584   :  { %v4493_v8 = vpop.f32.mrf.mxu2 }
 0x585   :  { %v4489_v53 = vpop.f32.mrf.mxu0  ;;  %v4491_v46 = vpop.f32.mrf.mxu1  ;;  %5627 = vst [vmem:[#allocation57_spill] sm:$0xff] %v4493_v8 }
 0x586   :  { %5625 = vst [vmem:[#allocation56_spill] sm:$0xff] %v4489_v53  ;;  %v4495_v11 = vpop.f32.mrf.mxu3 }
 0x587   :  { %5626 = vst [vmem:[#allocation35_spill] sm:$0xff] %v4491_v46 }
 0x588   :  { %5628 = vst [vmem:[#allocation49_spill] sm:$0xff] %v4495_v11  ;;  %v1334_v11 = vld [vmem:[%s5192_s6] sm:$0xf] }
 0x589   :  { %v4530_v30 = vperm.slane %v1334_v11, 2 }
 0x58b   :  { %5643 = vst [vmem:[#allocation64_spill] sm:$0xff] %v4530_v30  ;;  %v1444_v9 = vadd.f32 %v1443_v21, %v4530_v30 }
 0x58c   :  { %v4501_v50 = vpop.f32.mrf.mxu2 }
 0x58d   :  { %v4497_v41 = vpop.f32.mrf.mxu0  ;;  %v4499_v27 = vpop.f32.mrf.mxu1  ;;  %5631 = vst [vmem:[#allocation36_spill] sm:$0xff] %v4501_v50  ;;  %v4522_v50 = vperm.slane %v1334_v11, 1 }
 0x58e   :  { %5629 = vst [vmem:[#allocation47_spill] sm:$0xff] %v4497_v41  ;;  %v4503_v32 = vpop.f32.mrf.mxu3 }
 0x58f   :  { %5630 = vst [vmem:[#allocation58_spill] sm:$0xff] %v4499_v27  ;;  %v4520_v27 = vperm.slane %v1334_v11, 0 }
 0x590   :  { %5632 = vst [vmem:[#allocation52_spill] sm:$0xff] %v4503_v32 }
 0x591   :  { %5639 = vst [vmem:[#allocation39_spill] sm:$0xff] %v4520_v27 }
 0x592   :  { %5640 = vst [vmem:[#allocation55_spill] sm:$0xff] %v4522_v50 }
 0x594   :  { %v4509_v23 = vpop.f32.mrf.mxu2 }
 0x595   :  { %v4505_v2 = vpop.f32.mrf.mxu0  ;;  %v4507_v17 = vpop.f32.mrf.mxu1  ;;  %5635 = vst [vmem:[#allocation61_spill] sm:$0xff] %v4509_v23 }
 0x596   :  { %5633 = vst [vmem:[#allocation50_spill] sm:$0xff] %v4505_v2  ;;  %v4511_v53 = vpop.f32.mrf.mxu3  ;;  %v1362_v2 = vadd.f32 %v1361_v37, %v4520_v27 }
 0x597   :  { %5634 = vst [vmem:[#allocation59_spill] sm:$0xff] %v4507_v17  ;;  %v1403_v17 = vadd.f32 %v1402_v22, %v4522_v50 }
 0x598   :  { %5636 = vst [vmem:[#allocation38_spill] sm:$0xff] %v4511_v53 }
 0x5bd   :  { %v4516_v8 = vpop.f32.mrf.mxu0  ;;  %v4518_v41 = vpop.f32.mrf.mxu1 }
 0x5be   :  { %5637 = vst [vmem:[#allocation37_spill] sm:$0xff] %v4516_v8  ;;  %v4532_v8 = vperm.slane %v1334_v11, 3 }
 0x5bf   :  { %5638 = vst [vmem:[#allocation21_spill] sm:$0xff] %v4518_v41 }
 0x5c0   :  { %v1485_v37 = vadd.f32 %v1484_v36, %v4532_v8 }
 0x5c4   :  { %v4526_v32 = vpop.f32.mrf.mxu2  ;;  %v4528_v23 = vpop.f32.mrf.mxu3 }
 0x5c5   :  { %5641 = vst [vmem:[#allocation53_spill] sm:$0xff] %v4526_v32  ;;  %v1625_v53 = vpop.f32.mrf.mxu0  ;;  %v1645_v46 = vpop.f32.mrf.mxu1 }
 0x5c6   :  { %5642 = vst [vmem:[#allocation60_spill] sm:$0xff] %v4528_v23  ;;  %v1688_v7 = vadd.f32 %v1625_v53, %v1362_v2  ;;  %v1689_v26 = vadd.f32 %v1645_v46, %v1403_v17 }
 0x5c8   :  { %v1692_v41 = vmul.f32 0.5, %v1688_v7  ;;  %v1696_v38 = vmul.f32 0.5, %v1689_v26 }
 0x5ca   :  { %2667 = vtanh.f32 %v1692_v41 }
 0x5cb   :  { %2669 = vtanh.f32 %v1696_v38  ;;  %v5648_v38 = vld [vmem:[#allocation43_spill] sm:$0xff] }
 0x5cc   :  { %v1665_v22 = vpop.f32.mrf.mxu2  ;;  %v1685_v32 = vpop.f32.mrf.mxu3 }
 0x5cd   :  { %v1690_v50 = vadd.f32 %v1665_v22, %v1444_v9  ;;  %v1691_v23 = vadd.f32 %v1685_v32, %v1485_v37  ;;  %v5649_v37 = vld [vmem:[#allocation34_spill] sm:$0xff]  ;;  %v5650_v22 = vld [vmem:[#allocation63_spill] sm:$0xff] }
 0x5cf   :  { %2671 = vtanh.f32 %v1690_v50  ;;  %v1701_v27 = vmul.f32 0.5, %v1691_v23  ;;  %v5646_v23 = vld [vmem:[#allocation40_spill] sm:$0xff] }
 0x5d0   :  { %v2668_v2 = vpop.eup %2667 }
 0x5d1   :  { %v2670_v17 = vpop.eup %2669  ;;  %v1694_v53 = vmul.f32 0.5, %v2668_v2  ;;  %2673 = vtanh.f32 %v1701_v27  ;;  %v5645_v27 = vld [vmem:[#allocation62_spill] sm:$0xff] }
 0x5d2   :  { %v1698_v46 = vmul.f32 0.5, %v2670_v17  ;;  %v5651_v2 = vld [vmem:[#allocation42_spill] sm:$0xff]  ;;  %v5652_v17 = vld [vmem:[#allocation51_spill] sm:$0xff] }
 0x5d3   :  { %v1695_v11 = vadd.f32 0.5, %v1694_v53  ;;  %v5653_v53 = vld [vmem:[#allocation31_spill] sm:$0xff] }
 0x5d4   :  { %v1699_v7 = vadd.f32 0.5, %v1698_v46  ;;  %v5654_v46 = vld [vmem:[#allocation46_spill] sm:$0xff] }
 0x5d5   :  { %v2672_v26 = vpop.eup %2671 }
 0x5d6   :  { %v1705_v41 = vmul.f32 0.0, %v1699_v7  ;;  %v1706_v4 = vmul.f32 %v2672_v26, %v1695_v11  ;;  %v5655_v11 = vld [vmem:[#allocation44_spill] sm:$0xff]  ;;  %v5656_v7 = vld [vmem:[#allocation54_spill] sm:$0xff]  ;;  %v5657_v26 = vld [vmem:[#allocation25_spill] sm:$0xff] }
 0x5d7   :  { %v2674_v21 = vpop.eup %2673 }
 0x5d8   :  { %v4536_v30 = vadd.f32 %v1706_v4, %v1705_v41  ;;  %v1703_v36 = vmul.f32 0.5, %v2674_v21  ;;  %v5647_v4 = vld [vmem:[#allocation48_spill] sm:$0xff]  ;;  %v5658_v41 = vld [vmem:[#allocation45_spill] sm:$0xff] }
 0x5d9   :  { %v5659_v21 = vld [vmem:[#allocation28_spill] sm:$0xff] }
 0x5da   :  { %2675 = vtanh.f32 %v4536_v30  ;;  %v1704_v9 = vadd.f32 0.5, %v1703_v36  ;;  %v5660_v36 = vld [vmem:[#allocation18_spill] sm:$0xff] }
 0x5e0   :  { %v2676_v32 = vpop.eup %2675 }
 0x5e1   :  { %v4539_v50 = vmul.f32 %v2676_v32, %v1704_v9  ;;  %v5661_v9 = vld [vmem:[#allocation15_spill] sm:$0xff]  ;;  %v5662_v32 = vld [vmem:[#allocation12_spill] sm:$0xff] }
 0x5e3   :  { %5644 = vst [vmem:[#allocation65_spill] sm:$0xff] %v4539_v50  ;;  %1731 = vmatmul.f32.vlgmr.msra.gmra.mxu0 %v4539_v50  ;;  %1751 = vmatmul.f32.vlgmr.msra.gmra.mxu1 %v4539_v50 }
 0x5e4   :  { %1771 = vmatmul.f32.vlgmr.msra.gmra.mxu2 %v4539_v50  ;;  %1791 = vmatmul.f32.vlgmr.msra.gmra.mxu3 %v4539_v50  ;;  %v5663_v50 = vld [vmem:[#allocation17_spill] sm:$0xff] }
 0x5e5   :  { %1929 = vmatpush.msra.mxu0 %v4116_v13  ;;  %1949 = vmatpush.msra.mxu1 %v4118_v33 }
 0x5e6   :  { %1969 = vmatpush.msra.mxu2 %v4120_v24  ;;  %1989 = vmatpush.msra.mxu3 %v4131_v20 }
 0x5e7   :  { %1930 = vmatpush.msra.mxu0 %v4124_v25  ;;  %1950 = vmatpush.msra.mxu1 %v4126_v43 }
 0x5e8   :  { %1970 = vmatpush.msra.mxu2 %v4128_v59  ;;  %1990 = vmatpush.msra.mxu3 %v4141_v18 }
 0x5e9   :  { %1931 = vmatpush.msra.mxu0 %v4133_v10  ;;  %1951 = vmatpush.msra.mxu1 %v4135_v1 }
 0x5ea   :  { %1971 = vmatpush.msra.mxu2 %v4139_v3  ;;  %1991 = vmatpush.msra.mxu3 %v4157_v56 }
 0x5eb   :  { %1932 = vmatpush.msra.mxu0 %v4149_v14  ;;  %1952 = vmatpush.msra.mxu1 %v4151_v15 }
 0x5ec   :  { %1972 = vmatpush.msra.mxu2 %v4155_v19  ;;  %1992 = vmatpush.msra.mxu3 %v4169_v29 }
 0x5ed   :  { %1933 = vmatpush.msra.mxu0 %v4161_v60  ;;  %1953 = vmatpush.msra.mxu1 %v4163_v52 }
 0x5ee   :  { %1973 = vmatpush.msra.mxu2 %v4167_v28  ;;  %1993 = vmatpush.msra.mxu3 %v4181_v40 }
 0x5ef   :  { %1934 = vmatpush.msra.mxu0 %v4173_v34  ;;  %1954 = vmatpush.msra.mxu1 %v4175_v35 }
 0x5f0   :  { %1974 = vmatpush.msra.mxu2 %v4179_v39  ;;  %1994 = vmatpush.msra.mxu3 %v4197_v58 }
 0x5f1   :  { %1935 = vmatpush.msra.mxu0 %v4189_v55  ;;  %1955 = vmatpush.msra.mxu1 %v4191_v42 }
 0x5f2   :  { %1975 = vmatpush.msra.mxu2 %v4195_v45  ;;  %1995 = vmatpush.msra.mxu3 %v4221_v61 }
 0x5f3   :  { %1936 = vmatpush.msra.mxu0 %v4213_v44  ;;  %1956 = vmatpush.msra.mxu1 %v4215_v47 }
 0x5f4   :  { %1976 = vmatpush.msra.mxu2 %v4217_v48  ;;  %1996 = vmatpush.msra.mxu3 %v4233_v62 }
 0x5f5   :  { %1937 = vmatpush.msra.mxu0 %v4223_v16  ;;  %1957 = vmatpush.msra.mxu1 %v4225_v49 }
 0x5f6   :  { %1977 = vmatpush.msra.mxu2 %v4229_v51  ;;  %1997 = vmatpush.msra.mxu3 %v4237_v54 }
 0x5f7   :  { %1938 = vmatpush.msra.mxu0 %v4240_v31  ;;  %1958 = vmatpush.msra.mxu1 %v4242_v0 }
 0x5f8   :  { %1978 = vmatpush.msra.mxu2 %v4244_v63  ;;  %1998 = vmatpush.msra.mxu3 %v4248_v6 }
 0x5f9   :  { %1939 = vmatpush.msra.mxu0 %v4251_v12  ;;  %1959 = vmatpush.msra.mxu1 %v4253_v57 }
 0x5fa   :  { %1979 = vmatpush.msra.mxu2 %v4255_v5  ;;  %1999 = vmatpush.msra.mxu3 %v5645_v27 }
 0x5fb   :  { %1940 = vmatpush.msra.mxu0 %v5646_v23  ;;  %1960 = vmatpush.msra.mxu1 %v5647_v4  ;;  %v5671_v4 = vld [vmem:[#allocation32_spill] sm:$0xff] }
 0x5fc   :  { %1980 = vmatpush.msra.mxu2 %v5648_v38  ;;  %2000 = vmatpush.msra.mxu3 %v5649_v37 }
 0x5fd   :  { %1941 = vmatpush.msra.mxu0 %v5650_v22  ;;  %1961 = vmatpush.msra.mxu1 %v5651_v2  ;;  %v5669_v2 = vld [vmem:[#allocation13_spill] sm:$0xff] }
 0x5fe   :  { %1981 = vmatpush.msra.mxu2 %v5652_v17  ;;  %2001 = vmatpush.msra.mxu3 %v5653_v53  ;;  %v5664_v53 = vld [vmem:[#allocation29_spill] sm:$0xff] }
 0x5ff   :  { %1942 = vmatpush.msra.mxu0 %v5654_v46  ;;  %1962 = vmatpush.msra.mxu1 %v5655_v11  ;;  %v5665_v46 = vld [vmem:[#allocation22_spill] sm:$0xff]  ;;  %v5666_v11 = vld [vmem:[#allocation39_spill] sm:$0xff] }
 0x600   :  { %1982 = vmatpush.msra.mxu2 %v5656_v7  ;;  %2002 = vmatpush.msra.mxu3 %v5657_v26  ;;  %v5667_v7 = vld [vmem:[#allocation20_spill] sm:$0xff]  ;;  %v5668_v26 = vld [vmem:[#allocation55_spill] sm:$0xff] }
 0x601   :  { %1943 = vmatpush.msra.mxu0 %v5658_v41  ;;  %1963 = vmatpush.msra.mxu1 %v5659_v21  ;;  %v1365_v17 = vadd.f32 %v5667_v7, %v5666_v11  ;;  %v1406_v41 = vadd.f32 %v5669_v2, %v5668_v26 }
 0x602   :  { %1983 = vmatpush.msra.mxu2 %v5660_v36  ;;  %2003 = vmatpush.msra.mxu3 %v5661_v9 }
 0x603   :  { %1944 = vmatpush.msra.mxu0 %v5662_v32  ;;  %1964 = vmatpush.msra.mxu1 %v5663_v50  ;;  %v5670_v32 = vld [vmem:[#allocation64_spill] sm:$0xff] }
 0x604   :  { %1984 = vmatpush.msra.mxu2 %v5664_v53  ;;  %2004 = vmatpush.msra.mxu3 %v5665_v46  ;;  %v1447_v50 = vadd.f32 %v5671_v4, %v5670_v32  ;;  %v5672_v53 = vld [vmem:[#allocation26_spill] sm:$0xff] }
 0x605   :  { %v1488_v23 = vadd.f32 %v5672_v53, %v4532_v8 }
 0x660   :  { %v1732_v22 = vpop.f32.mrf.mxu0  ;;  %v1752_v21 = vpop.f32.mrf.mxu1 }
 0x661   :  { %v1795_v37 = vadd.f32 %v1732_v22, %v1365_v17  ;;  %v1796_v36 = vadd.f32 %v1752_v21, %v1406_v41 }
 0x663   :  { %v1799_v38 = vmul.f32 0.5, %v1795_v37  ;;  %v1803_v9 = vmul.f32 0.5, %v1796_v36 }
 0x665   :  { %2677 = vtanh.f32 %v1799_v38 }
 0x666   :  { %2679 = vtanh.f32 %v1803_v9 }
 0x667   :  { %v1772_v46 = vpop.f32.mrf.mxu2  ;;  %v1792_v27 = vpop.f32.mrf.mxu3 }
 0x668   :  { %v1797_v7 = vadd.f32 %v1772_v46, %v1447_v50  ;;  %v1798_v11 = vadd.f32 %v1792_v27, %v1488_v23 }
 0x66a   :  { %2681 = vtanh.f32 %v1797_v7  ;;  %v1808_v2 = vmul.f32 0.5, %v1798_v11 }
 0x66b   :  { %v2678_v26 = vpop.eup %2677 }
 0x66c   :  { %v2680_v5 = vpop.eup %2679  ;;  %v1801_v22 = vmul.f32 0.5, %v2678_v26  ;;  %2683 = vtanh.f32 %v1808_v2 }
 0x66d   :  { %v1805_v17 = vmul.f32 0.5, %v2680_v5 }
 0x66e   :  { %v1802_v37 = vadd.f32 0.5, %v1801_v22 }
 0x66f   :  { %v1806_v38 = vadd.f32 0.5, %v1805_v17 }
 0x670   :  { %v2682_v41 = vpop.eup %2681 }
 0x671   :  { %v1812_v4 = vmul.f32 %v1806_v38, %v4536_v30  ;;  %v1813_v21 = vmul.f32 %v2682_v41, %v1802_v37 }
 0x672   :  { %v2684_v36 = vpop.eup %2683 }
 0x673   :  { %v4618_v53 = vadd.f32 %v1813_v21, %v1812_v4  ;;  %v1810_v50 = vmul.f32 0.5, %v2684_v36 }
 0x675   :  { %2685 = vtanh.f32 %v4618_v53  ;;  %v1811_v27 = vadd.f32 0.5, %v1810_v50 }
 0x67b   :  { %v2686_v23 = vpop.eup %2685 }
 0x67c   :  { %v4621_v46 = vmul.f32 %v2686_v23, %v1811_v27  ;;  %v4712_v27 = vld [vmem:[#allocation9 + $0x1e8] sm:$0xff]  ;;  %v4715_v23 = vld [vmem:[#allocation9 + $0x1f0] sm:$0xff] }
 0x67e   :  { %5673 = vst [vmem:[#allocation20_spill] sm:$0xff] %v4621_v46  ;;  %1838 = vmatmul.f32.vlgmr.msrb.gmra.mxu0 %v4621_v46  ;;  %1858 = vmatmul.f32.vlgmr.msrb.gmra.mxu1 %v4621_v46 }
 0x67f   :  { %1878 = vmatmul.f32.vlgmr.msrb.gmra.mxu2 %v4621_v46  ;;  %1898 = vmatmul.f32.vlgmr.msrb.gmra.mxu3 %v4621_v46  ;;  %v4880_v46 = vld [vmem:[#allocation9 + $0x28] sm:$0xff] }
 0x680   :  { %2036 = vmatpush.msrb.mxu0 %v4116_v13  ;;  %2056 = vmatpush.msrb.mxu1 %v4118_v33  ;;  %v5674_v13 = vld [vmem:[#allocation41_spill] sm:$0xff]  ;;  %v5675_v33 = vld [vmem:[#allocation62_spill] sm:$0xff] }
 0x681   :  { %2076 = vmatpush.msrb.mxu2 %v4120_v24  ;;  %2096 = vmatpush.msrb.mxu3 %v4131_v20  ;;  %v5676_v24 = vld [vmem:[#allocation40_spill] sm:$0xff]  ;;  %v5680_v20 = vld [vmem:[#allocation63_spill] sm:$0xff] }
 0x682   :  { %2037 = vmatpush.msrb.mxu0 %v4124_v25  ;;  %2057 = vmatpush.msrb.mxu1 %v4126_v43  ;;  %v5677_v25 = vld [vmem:[#allocation48_spill] sm:$0xff]  ;;  %v5678_v43 = vld [vmem:[#allocation43_spill] sm:$0xff] }
 0x683   :  { %2077 = vmatpush.msrb.mxu2 %v4128_v59  ;;  %2097 = vmatpush.msrb.mxu3 %v4141_v18  ;;  %v5679_v59 = vld [vmem:[#allocation34_spill] sm:$0xff] }
 0x684   :  { %2038 = vmatpush.msrb.mxu0 %v4133_v10  ;;  %2058 = vmatpush.msrb.mxu1 %v4135_v1  ;;  %v5681_v10 = vld [vmem:[#allocation42_spill] sm:$0xff]  ;;  %v5682_v1 = vld [vmem:[#allocation51_spill] sm:$0xff] }
 0x685   :  { %2078 = vmatpush.msrb.mxu2 %v4139_v3  ;;  %2098 = vmatpush.msrb.mxu3 %v4157_v56  ;;  %v5683_v3 = vld [vmem:[#allocation31_spill] sm:$0xff]  ;;  %v5684_v18 = vld [vmem:[#allocation46_spill] sm:$0xff]  ;;  %v5688_v56 = vld [vmem:[#allocation45_spill] sm:$0xff] }
 0x686   :  { %2039 = vmatpush.msrb.mxu0 %v4149_v14  ;;  %2059 = vmatpush.msrb.mxu1 %v4151_v15  ;;  %v5685_v14 = vld [vmem:[#allocation44_spill] sm:$0xff]  ;;  %v5686_v15 = vld [vmem:[#allocation54_spill] sm:$0xff] }
 0x687   :  { %2079 = vmatpush.msrb.mxu2 %v4155_v19  ;;  %2099 = vmatpush.msrb.mxu3 %v4169_v29  ;;  %v5687_v19 = vld [vmem:[#allocation25_spill] sm:$0xff]  ;;  %v5692_v29 = vld [vmem:[#allocation12_spill] sm:$0xff]  ;;  %5718 = vst [vmem:[#allocation54_spill] sm:$0xff] %v4880_v46 }
 0x688   :  { %2040 = vmatpush.msrb.mxu0 %v4161_v60  ;;  %2060 = vmatpush.msrb.mxu1 %v4163_v52  ;;  %v5689_v60 = vld [vmem:[#allocation28_spill] sm:$0xff]  ;;  %v5690_v52 = vld [vmem:[#allocation18_spill] sm:$0xff] }
 0x689   :  { %2080 = vmatpush.msrb.mxu2 %v4167_v28  ;;  %2100 = vmatpush.msrb.mxu3 %v4181_v40  ;;  %v5691_v28 = vld [vmem:[#allocation15_spill] sm:$0xff] }
 0x68a   :  { %2041 = vmatpush.msrb.mxu0 %v4173_v34  ;;  %2061 = vmatpush.msrb.mxu1 %v4175_v35  ;;  %v5693_v34 = vld [vmem:[#allocation17_spill] sm:$0xff]  ;;  %v5696_v40 = vld [vmem:[#allocation39_spill] sm:$0xff] }
 0x68b   :  { %2081 = vmatpush.msrb.mxu2 %v4179_v39  ;;  %2101 = vmatpush.msrb.mxu3 %v4197_v58  ;;  %v5694_v35 = vld [vmem:[#allocation29_spill] sm:$0xff]  ;;  %v5695_v39 = vld [vmem:[#allocation22_spill] sm:$0xff] }
 0x68c   :  { %2042 = vmatpush.msrb.mxu0 %v4189_v55  ;;  %2062 = vmatpush.msrb.mxu1 %v4191_v42  ;;  %v5697_v55 = vld [vmem:[#allocation19_spill] sm:$0xff]  ;;  %v5699_v58 = vld [vmem:[#allocation30_spill] sm:$0xff] }
 0x68d   :  { %2082 = vmatpush.msrb.mxu2 %v4195_v45  ;;  %2102 = vmatpush.msrb.mxu3 %v4221_v61  ;;  %v1368_v42 = vadd.f32 %v5697_v55, %v5696_v40  ;;  %v5698_v45 = vld [vmem:[#allocation55_spill] sm:$0xff]  ;;  %v4781_v55 = vld [vmem:[#allocation9 + $0x120] sm:$0xff] }
 0x68e   :  { %2043 = vmatpush.msrb.mxu0 %v4213_v44  ;;  %2063 = vmatpush.msrb.mxu1 %v4215_v47  ;;  %v1409_v44 = vadd.f32 %v5699_v58, %v5698_v45  ;;  %v4787_v58 = vld [vmem:[#allocation9 + $0x130] sm:$0xff] }
 0x68f   :  { %2083 = vmatpush.msrb.mxu2 %v4217_v48  ;;  %2103 = vmatpush.msrb.mxu3 %v4233_v62  ;;  %v5700_v62 = vld [vmem:[#allocation16_spill] sm:$0xff] }
 0x690   :  { %2044 = vmatpush.msrb.mxu0 %v4223_v16  ;;  %2064 = vmatpush.msrb.mxu1 %v4225_v49 }
 0x691   :  { %2084 = vmatpush.msrb.mxu2 %v4229_v51  ;;  %2104 = vmatpush.msrb.mxu3 %v4237_v54  ;;  %v1450_v54 = vadd.f32 %v5700_v62, %v5670_v32  ;;  %v4811_v62 = vld [vmem:[#allocation9 + $0xf0] sm:$0xff] }
 0x692   :  { %2045 = vmatpush.msrb.mxu0 %v4240_v31  ;;  %2065 = vmatpush.msrb.mxu1 %v4242_v0  ;;  %v5701_v31 = vld [vmem:[#allocation23_spill] sm:$0xff] }
 0x693   :  { %2085 = vmatpush.msrb.mxu2 %v4244_v63  ;;  %2105 = vmatpush.msrb.mxu3 %v4248_v6  ;;  %v1491_v0 = vadd.f32 %v5701_v31, %v4532_v8  ;;  %v4817_v31 = vld [vmem:[#allocation9 + $0xc0] sm:$0xff] }
 0x694   :  { %2046 = vmatpush.msrb.mxu0 %v4251_v12  ;;  %2066 = vmatpush.msrb.mxu1 %v4253_v57 }
 0x695   :  { %2086 = vmatpush.msrb.mxu2 %v5674_v13  ;;  %2106 = vmatpush.msrb.mxu3 %v5675_v33  ;;  %v4718_v13 = vld [vmem:[#allocation9 + $0x1f8] sm:$0xff]  ;;  %v4721_v33 = vld [vmem:[#allocation9 + $0x1c0] sm:$0xff] }
 0x696   :  { %2047 = vmatpush.msrb.mxu0 %v5676_v24  ;;  %2067 = vmatpush.msrb.mxu1 %v5677_v25  ;;  %v4724_v24 = vld [vmem:[#allocation9 + $0x1c8] sm:$0xff]  ;;  %v4727_v25 = vld [vmem:[#allocation9 + $0x1d0] sm:$0xff] }
 0x697   :  { %2087 = vmatpush.msrb.mxu2 %v5678_v43  ;;  %2107 = vmatpush.msrb.mxu3 %v5679_v59  ;;  %v4730_v43 = vld [vmem:[#allocation9 + $0x1d8] sm:$0xff]  ;;  %v4733_v59 = vld [vmem:[#allocation9 + $0x1a0] sm:$0xff] }
 0x698   :  { %2048 = vmatpush.msrb.mxu0 %v5680_v20  ;;  %2068 = vmatpush.msrb.mxu1 %v5681_v10  ;;  %v4736_v20 = vld [vmem:[#allocation9 + $0x1a8] sm:$0xff]  ;;  %v4739_v10 = vld [vmem:[#allocation9 + $0x1b0] sm:$0xff] }
 0x699   :  { %2088 = vmatpush.msrb.mxu2 %v5682_v1  ;;  %2108 = vmatpush.msrb.mxu3 %v5683_v3  ;;  %v4742_v1 = vld [vmem:[#allocation9 + $0x1b8] sm:$0xff]  ;;  %v4745_v3 = vld [vmem:[#allocation9 + $0x180] sm:$0xff] }
 0x69a   :  { %2049 = vmatpush.msrb.mxu0 %v5684_v18  ;;  %2069 = vmatpush.msrb.mxu1 %v5685_v14  ;;  %v4748_v18 = vld [vmem:[#allocation9 + $0x188] sm:$0xff]  ;;  %v4751_v14 = vld [vmem:[#allocation9 + $0x190] sm:$0xff] }
 0x69b   :  { %2089 = vmatpush.msrb.mxu2 %v5686_v15  ;;  %2109 = vmatpush.msrb.mxu3 %v5687_v19  ;;  %v4754_v15 = vld [vmem:[#allocation9 + $0x198] sm:$0xff]  ;;  %v4757_v19 = vld [vmem:[#allocation9 + $0x160] sm:$0xff] }
 0x69c   :  { %2050 = vmatpush.msrb.mxu0 %v5688_v56  ;;  %2070 = vmatpush.msrb.mxu1 %v5689_v60  ;;  %v4760_v56 = vld [vmem:[#allocation9 + $0x168] sm:$0xff]  ;;  %v4763_v60 = vld [vmem:[#allocation9 + $0x170] sm:$0xff] }
 0x69d   :  { %2090 = vmatpush.msrb.mxu2 %v5690_v52  ;;  %2110 = vmatpush.msrb.mxu3 %v5691_v28  ;;  %v4766_v52 = vld [vmem:[#allocation9 + $0x178] sm:$0xff]  ;;  %v4769_v28 = vld [vmem:[#allocation9 + $0x140] sm:$0xff] }
 0x69e   :  { %2051 = vmatpush.msrb.mxu0 %v5692_v29  ;;  %2071 = vmatpush.msrb.mxu1 %v5693_v34  ;;  %v4772_v29 = vld [vmem:[#allocation9 + $0x148] sm:$0xff]  ;;  %v4775_v34 = vld [vmem:[#allocation9 + $0x150] sm:$0xff] }
 0x69f   :  { %2091 = vmatpush.msrb.mxu2 %v5694_v35  ;;  %2111 = vmatpush.msrb.mxu3 %v5695_v39  ;;  %v4778_v35 = vld [vmem:[#allocation9 + $0x158] sm:$0xff] }
 0x6fb   :  { %v1839_v47 = vpop.f32.mrf.mxu0  ;;  %v1859_v48 = vpop.f32.mrf.mxu1 }
 0x6fc   :  { %v1902_v61 = vadd.f32 %v1839_v47, %v1368_v42  ;;  %v1903_v16 = vadd.f32 %v1859_v48, %v1409_v44  ;;  %v4784_v42 = vld [vmem:[#allocation9 + $0x128] sm:$0xff]  ;;  %v4790_v44 = vld [vmem:[#allocation9 + $0x138] sm:$0xff]  ;;  %v4793_v47 = vld [vmem:[#allocation9 + $0x100] sm:$0xff] }
 0x6fd   :  { %v4796_v48 = vld [vmem:[#allocation9 + $0x108] sm:$0xff] }
 0x6fe   :  { %v1906_v49 = vmul.f32 0.5, %v1902_v61  ;;  %v1910_v51 = vmul.f32 0.5, %v1903_v16  ;;  %v4799_v61 = vld [vmem:[#allocation9 + $0x110] sm:$0xff]  ;;  %v4802_v16 = vld [vmem:[#allocation9 + $0x118] sm:$0xff] }
 0x700   :  { %2687 = vtanh.f32 %v1906_v49  ;;  %v4805_v49 = vld [vmem:[#allocation9 + $0xe0] sm:$0xff] }
 0x701   :  { %2689 = vtanh.f32 %v1910_v51  ;;  %v4808_v51 = vld [vmem:[#allocation9 + $0xe8] sm:$0xff] }
 0x702   :  { %v1879_v63 = vpop.f32.mrf.mxu2  ;;  %v1899_v6 = vpop.f32.mrf.mxu3 }
 0x703   :  { %v1904_v12 = vadd.f32 %v1879_v63, %v1450_v54  ;;  %v1905_v57 = vadd.f32 %v1899_v6, %v1491_v0  ;;  %v4814_v54 = vld [vmem:[#allocation9 + $0xf8] sm:$0xff]  ;;  %v4820_v0 = vld [vmem:[#allocation9 + $0xc8] sm:$0xff]  ;;  %v4823_v63 = vld [vmem:[#allocation9 + $0xd0] sm:$0xff] }
 0x704   :  { %v4826_v6 = vld [vmem:[#allocation9 + $0xd8] sm:$0xff] }
 0x705   :  { %2691 = vtanh.f32 %v1904_v12  ;;  %v1915_v5 = vmul.f32 0.5, %v1905_v57  ;;  %v4829_v12 = vld [vmem:[#allocation9 + $0xa0] sm:$0xff]  ;;  %v4832_v57 = vld [vmem:[#allocation9 + $0xa8] sm:$0xff] }
 0x706   :  { %v2688_v30 = vpop.eup %2687 }
 0x707   :  { %v2690_v11 = vpop.eup %2689  ;;  %v1908_v26 = vmul.f32 0.5, %v2688_v30  ;;  %2693 = vtanh.f32 %v1915_v5  ;;  %v4835_v5 = vld [vmem:[#allocation9 + $0xb0] sm:$0xff]  ;;  %v4838_v30 = vld [vmem:[#allocation9 + $0xb8] sm:$0xff] }
 0x708   :  { %v1912_v9 = vmul.f32 0.5, %v2690_v11  ;;  %5703 = vst [vmem:[#allocation64_spill] sm:$0xff] %v4835_v5  ;;  %v4841_v11 = vld [vmem:[#allocation9 + $0x80] sm:$0xff] }
 0x709   :  { %v1909_v7 = vadd.f32 0.5, %v1908_v26  ;;  %5704 = vst [vmem:[#allocation32_spill] sm:$0xff] %v4838_v30  ;;  %v4844_v26 = vld [vmem:[#allocation9 + $0x88] sm:$0xff] }
 0x70a   :  { %v1913_v2 = vadd.f32 0.5, %v1912_v9  ;;  %5705 = vst [vmem:[#allocation26_spill] sm:$0xff] %v4841_v11  ;;  %v4847_v9 = vld [vmem:[#allocation9 + $0x90] sm:$0xff] }
 0x70b   :  { %v2692_v22 = vpop.eup %2691  ;;  %5706 = vst [vmem:[#allocation41_spill] sm:$0xff] %v4844_v26 }
 0x70c   :  { %v1919_v17 = vmul.f32 %v1913_v2, %v4618_v53  ;;  %v1920_v37 = vmul.f32 %v2692_v22, %v1909_v7  ;;  %v4709_v53 = vld [vmem:[#allocation9 + $0x1e0] sm:$0xff]  ;;  %5707 = vst [vmem:[#allocation62_spill] sm:$0xff] %v4847_v9  ;;  %v4850_v7 = vld [vmem:[#allocation9 + $0x98] sm:$0xff]  ;;  %v4856_v22 = vld [vmem:[#allocation9 + $0x68] sm:$0xff] }
 0x70d   :  { %v2694_v38 = vpop.eup %2693  ;;  %5708 = vst [vmem:[#allocation40_spill] sm:$0xff] %v4850_v7  ;;  %v4853_v2 = vld [vmem:[#allocation9 + $0x60] sm:$0xff] }
 0x70e   :  { %v4700_v41 = vadd.f32 %v1920_v37, %v1919_v17  ;;  %v1917_v4 = vmul.f32 0.5, %v2694_v38  ;;  %5709 = vst [vmem:[#allocation48_spill] sm:$0xff] %v4853_v2  ;;  %v4859_v17 = vld [vmem:[#allocation9 + $0x70] sm:$0xff]  ;;  %v4862_v37 = vld [vmem:[#allocation9 + $0x78] sm:$0xff]  ;;  %v4865_v38 = vld [vmem:[#allocation9 + $0x40] sm:$0xff] }
 0x70f   :  { %5710 = vst [vmem:[#allocation43_spill] sm:$0xff] %v4856_v22 }
 0x710   :  { %2695 = vtanh.f32 %v4700_v41  ;;  %v1918_v21 = vadd.f32 0.5, %v1917_v4  ;;  %5711 = vst [vmem:[#allocation34_spill] sm:$0xff] %v4859_v17  ;;  %v4868_v4 = vld [vmem:[#allocation9 + $0x48] sm:$0xff] }
 0x711   :  { %5712 = vst [vmem:[#allocation63_spill] sm:$0xff] %v4862_v37 }
 0x712   :  { %5713 = vst [vmem:[#allocation42_spill] sm:$0xff] %v4865_v38 }
 0x713   :  { %5714 = vst [vmem:[#allocation51_spill] sm:$0xff] %v4868_v4 }
 0x716   :  { %v2696_v36 = vpop.eup %2695 }
 0x717   :  { %v4703_v50 = vmul.f32 %v2696_v36, %v1918_v21  ;;  %v4871_v21 = vld [vmem:[#allocation9 + $0x50] sm:$0xff]  ;;  %v4874_v36 = vld [vmem:[#allocation9 + $0x58] sm:$0xff] }
 0x718   :  { %5715 = vst [vmem:[#allocation31_spill] sm:$0xff] %v4871_v21 }
 0x719   :  { %5702 = vst [vmem:[#allocation13_spill] sm:$0xff] %v4703_v50  ;;  %1945 = vmatmul.f32.vlgmr.msra.gmra.mxu0 %v4703_v50  ;;  %1965 = vmatmul.f32.vlgmr.msra.gmra.mxu1 %v4703_v50 }
 0x71a   :  { %1985 = vmatmul.f32.vlgmr.msra.gmra.mxu2 %v4703_v50  ;;  %2005 = vmatmul.f32.vlgmr.msra.gmra.mxu3 %v4703_v50  ;;  %5716 = vst [vmem:[#allocation46_spill] sm:$0xff] %v4874_v36  ;;  %v4877_v50 = vld [vmem:[#allocation9 + $0x20] sm:$0xff] }
 0x71b   :  { %2143 = vmatpush.msra.mxu0 %v4709_v53  ;;  %2163 = vmatpush.msra.mxu1 %v4712_v27  ;;  %5717 = vst [vmem:[#allocation44_spill] sm:$0xff] %v4877_v50 }
 0x71c   :  { %2183 = vmatpush.msra.mxu2 %v4715_v23  ;;  %2203 = vmatpush.msra.mxu3 %v4718_v13 }
 0x71d   :  { %2144 = vmatpush.msra.mxu0 %v4721_v33  ;;  %2164 = vmatpush.msra.mxu1 %v4724_v24 }
 0x71e   :  { %2184 = vmatpush.msra.mxu2 %v4727_v25  ;;  %2204 = vmatpush.msra.mxu3 %v4730_v43 }
 0x71f   :  { %2145 = vmatpush.msra.mxu0 %v4733_v59  ;;  %2165 = vmatpush.msra.mxu1 %v4736_v20 }
 0x720   :  { %2185 = vmatpush.msra.mxu2 %v4739_v10  ;;  %2205 = vmatpush.msra.mxu3 %v4742_v1 }
 0x721   :  { %2146 = vmatpush.msra.mxu0 %v4745_v3  ;;  %2166 = vmatpush.msra.mxu1 %v4748_v18 }
 0x722   :  { %2186 = vmatpush.msra.mxu2 %v4751_v14  ;;  %2206 = vmatpush.msra.mxu3 %v4754_v15 }
 0x723   :  { %2147 = vmatpush.msra.mxu0 %v4757_v19  ;;  %2167 = vmatpush.msra.mxu1 %v4760_v56 }
 0x724   :  { %2187 = vmatpush.msra.mxu2 %v4763_v60  ;;  %2207 = vmatpush.msra.mxu3 %v4766_v52 }
 0x725   :  { %2148 = vmatpush.msra.mxu0 %v4769_v28  ;;  %2168 = vmatpush.msra.mxu1 %v4772_v29 }
 0x726   :  { %2188 = vmatpush.msra.mxu2 %v4775_v34  ;;  %2208 = vmatpush.msra.mxu3 %v4778_v35 }
 0x727   :  { %2149 = vmatpush.msra.mxu0 %v4781_v55  ;;  %2169 = vmatpush.msra.mxu1 %v4784_v42 }
 0x728   :  { %2189 = vmatpush.msra.mxu2 %v4787_v58  ;;  %2209 = vmatpush.msra.mxu3 %v4790_v44 }
 0x729   :  { %2150 = vmatpush.msra.mxu0 %v4793_v47  ;;  %2170 = vmatpush.msra.mxu1 %v4796_v48 }
 0x72a   :  { %2190 = vmatpush.msra.mxu2 %v4799_v61  ;;  %2210 = vmatpush.msra.mxu3 %v4802_v16 }
 0x72b   :  { %2151 = vmatpush.msra.mxu0 %v4805_v49  ;;  %2171 = vmatpush.msra.mxu1 %v4808_v51 }
 0x72c   :  { %2191 = vmatpush.msra.mxu2 %v4811_v62  ;;  %2211 = vmatpush.msra.mxu3 %v4814_v54 }
 0x72d   :  { %2152 = vmatpush.msra.mxu0 %v4817_v31  ;;  %2172 = vmatpush.msra.mxu1 %v4820_v0 }
 0x72e   :  { %2192 = vmatpush.msra.mxu2 %v4823_v63  ;;  %2212 = vmatpush.msra.mxu3 %v4826_v6 }
 0x72f   :  { %2153 = vmatpush.msra.mxu0 %v4829_v12  ;;  %2173 = vmatpush.msra.mxu1 %v4832_v57 }
 0x730   :  { %2193 = vmatpush.msra.mxu2 %v4835_v5  ;;  %2213 = vmatpush.msra.mxu3 %v4838_v30 }
 0x731   :  { %2154 = vmatpush.msra.mxu0 %v4841_v11  ;;  %2174 = vmatpush.msra.mxu1 %v4844_v26 }
 0x732   :  { %2194 = vmatpush.msra.mxu2 %v4847_v9  ;;  %2214 = vmatpush.msra.mxu3 %v4850_v7 }
 0x733   :  { %2155 = vmatpush.msra.mxu0 %v4853_v2  ;;  %2175 = vmatpush.msra.mxu1 %v4856_v22 }
 0x734   :  { %2195 = vmatpush.msra.mxu2 %v4859_v17  ;;  %2215 = vmatpush.msra.mxu3 %v4862_v37  ;;  %v5725_v37 = vld [vmem:[#allocation14_spill] sm:$0xff] }
 0x735   :  { %2156 = vmatpush.msra.mxu0 %v4865_v38  ;;  %2176 = vmatpush.msra.mxu1 %v4868_v4  ;;  %v4883_v38 = vld [vmem:[#allocation9 + $0x30] sm:$0xff]  ;;  %v4886_v4 = vld [vmem:[#allocation9 + $0x38] sm:$0xff] }
 0x736   :  { %2196 = vmatpush.msra.mxu2 %v4871_v21  ;;  %2216 = vmatpush.msra.mxu3 %v4874_v36  ;;  %5719 = vst [vmem:[#allocation25_spill] sm:$0xff] %v4883_v38  ;;  %v4889_v21 = vld [vmem:[#allocation9] sm:$0xff]  ;;  %v4892_v36 = vld [vmem:[#allocation9 + $0x8] sm:$0xff] }
 0x737   :  { %2157 = vmatpush.msra.mxu0 %v4877_v50  ;;  %2177 = vmatpush.msra.mxu1 %v4880_v46  ;;  %5720 = vst [vmem:[#allocation45_spill] sm:$0xff] %v4886_v4  ;;  %v4895_v50 = vld [vmem:[#allocation9 + $0x10] sm:$0xff] }
 0x738   :  { %2197 = vmatpush.msra.mxu2 %v4883_v38  ;;  %2217 = vmatpush.msra.mxu3 %v4886_v4  ;;  %5721 = vst [vmem:[#allocation28_spill] sm:$0xff] %v4889_v21  ;;  %v5724_v38 = vld [vmem:[#allocation24_spill] sm:$0xff]  ;;  %v1412_v4 = vadd.f32 %v5725_v37, %v5698_v45 }
 0x739   :  { %2158 = vmatpush.msra.mxu0 %v4889_v21  ;;  %5722 = vst [vmem:[#allocation18_spill] sm:$0xff] %v4892_v36  ;;  %2178 = vmatpush.msra.mxu1 %v4892_v36  ;;  %v1371_v46 = vadd.f32 %v5724_v38, %v5696_v40  ;;  %v5726_v36 = vld [vmem:[#allocation33_spill] sm:$0xff] }
 0x73a   :  { %5723 = vst [vmem:[#allocation15_spill] sm:$0xff] %v4895_v50  ;;  %2198 = vmatpush.msra.mxu2 %v4895_v50  ;;  %2218 = vmatpush.msra.mxu3 %v5695_v39  ;;  %v1453_v26 = vadd.f32 %v5726_v36, %v5670_v32  ;;  %v5727_v50 = vld [vmem:[#allocation27_spill] sm:$0xff] }
 0x73b   :  { %v1494_v11 = vadd.f32 %v5727_v50, %v4532_v8 }
 0x796   :  { %v1946_v17 = vpop.f32.mrf.mxu0  ;;  %v1966_v22 = vpop.f32.mrf.mxu1 }
 0x797   :  { %v2009_v2 = vadd.f32 %v1946_v17, %v1371_v46  ;;  %v2010_v21 = vadd.f32 %v1966_v22, %v1412_v4 }
 0x799   :  { %v2013_v7 = vmul.f32 0.5, %v2009_v2  ;;  %v2017_v9 = vmul.f32 0.5, %v2010_v21 }
 0x79b   :  { %2697 = vtanh.f32 %v2013_v7 }
 0x79c   :  { %2699 = vtanh.f32 %v2017_v9  ;;  %v5732_v9 = vld [vmem:[#allocation41_spill] sm:$0xff] }
 0x79d   :  { %v1986_v39 = vpop.f32.mrf.mxu2  ;;  %v2006_v30 = vpop.f32.mrf.mxu3 }
 0x79e   :  { %v2011_v38 = vadd.f32 %v1986_v39, %v1453_v26  ;;  %v2012_v40 = vadd.f32 %v2006_v30, %v1494_v11  ;;  %v5733_v39 = vld [vmem:[#allocation62_spill] sm:$0xff] }
 0x7a0   :  { %2701 = vtanh.f32 %v2011_v38  ;;  %v2022_v37 = vmul.f32 0.5, %v2012_v40  ;;  %v5734_v38 = vld [vmem:[#allocation40_spill] sm:$0xff] }
 0x7a1   :  { %v2698_v45 = vpop.eup %2697 }
 0x7a2   :  { %v2700_v5 = vpop.eup %2699  ;;  %v2015_v46 = vmul.f32 0.5, %v2698_v45  ;;  %2703 = vtanh.f32 %v2022_v37  ;;  %v5729_v45 = vld [vmem:[#allocation64_spill] sm:$0xff] }
 0x7a3   :  { %v2019_v22 = vmul.f32 0.5, %v2700_v5  ;;  %v5731_v5 = vld [vmem:[#allocation26_spill] sm:$0xff]  ;;  %v5735_v37 = vld [vmem:[#allocation48_spill] sm:$0xff] }
 0x7a4   :  { %v2016_v2 = vadd.f32 0.5, %v2015_v46  ;;  %v5736_v46 = vld [vmem:[#allocation43_spill] sm:$0xff] }
 0x7a5   :  { %v2020_v7 = vadd.f32 0.5, %v2019_v22  ;;  %v5737_v22 = vld [vmem:[#allocation34_spill] sm:$0xff] }
 0x7a6   :  { %v2702_v17 = vpop.eup %2701 }
 0x7a7   :  { %v2026_v4 = vmul.f32 %v2020_v7, %v4700_v41  ;;  %v2027_v21 = vmul.f32 %v2702_v17, %v2016_v2  ;;  %v5730_v41 = vld [vmem:[#allocation32_spill] sm:$0xff]  ;;  %v5738_v2 = vld [vmem:[#allocation63_spill] sm:$0xff]  ;;  %v5739_v7 = vld [vmem:[#allocation42_spill] sm:$0xff] }
 0x7a8   :  { %v2704_v36 = vpop.eup %2703  ;;  %v5740_v17 = vld [vmem:[#allocation51_spill] sm:$0xff] }
 0x7a9   :  { %v4908_v50 = vadd.f32 %v2027_v21, %v2026_v4  ;;  %v2024_v26 = vmul.f32 0.5, %v2704_v36  ;;  %v5741_v4 = vld [vmem:[#allocation31_spill] sm:$0xff]  ;;  %v5742_v21 = vld [vmem:[#allocation46_spill] sm:$0xff]  ;;  %v5743_v36 = vld [vmem:[#allocation44_spill] sm:$0xff] }
 0x7ab   :  { %2705 = vtanh.f32 %v4908_v50  ;;  %v2025_v30 = vadd.f32 0.5, %v2024_v26  ;;  %v5744_v26 = vld [vmem:[#allocation54_spill] sm:$0xff] }
 0x7b1   :  { %v2706_v11 = vpop.eup %2705 }
 0x7b2   :  { %v4911_v40 = vmul.f32 %v2706_v11, %v2025_v30  ;;  %v5745_v30 = vld [vmem:[#allocation25_spill] sm:$0xff] }
 0x7b3   :  { %v5746_v11 = vld [vmem:[#allocation45_spill] sm:$0xff] }
 0x7b4   :  { %5728 = vst [vmem:[#allocation12_spill] sm:$0xff] %v4911_v40  ;;  %2052 = vmatmul.f32.vlgmr.msrb.gmra.mxu0 %v4911_v40  ;;  %2072 = vmatmul.f32.vlgmr.msrb.gmra.mxu1 %v4911_v40 }
 0x7b5   :  { %2092 = vmatmul.f32.vlgmr.msrb.gmra.mxu2 %v4911_v40  ;;  %2112 = vmatmul.f32.vlgmr.msrb.gmra.mxu3 %v4911_v40  ;;  %v5747_v40 = vld [vmem:[#allocation28_spill] sm:$0xff] }
 0x7b6   :  { %2250 = vmatpush.msrb.mxu0 %v4709_v53  ;;  %2270 = vmatpush.msrb.mxu1 %v4712_v27 }
 0x7b7   :  { %2290 = vmatpush.msrb.mxu2 %v4715_v23  ;;  %2310 = vmatpush.msrb.mxu3 %v4718_v13 }
 0x7b8   :  { %2251 = vmatpush.msrb.mxu0 %v4721_v33  ;;  %2271 = vmatpush.msrb.mxu1 %v4724_v24 }
 0x7b9   :  { %2291 = vmatpush.msrb.mxu2 %v4727_v25  ;;  %2311 = vmatpush.msrb.mxu3 %v4730_v43 }
 0x7ba   :  { %2252 = vmatpush.msrb.mxu0 %v4733_v59  ;;  %2272 = vmatpush.msrb.mxu1 %v4736_v20 }
 0x7bb   :  { %2292 = vmatpush.msrb.mxu2 %v4739_v10  ;;  %2312 = vmatpush.msrb.mxu3 %v4742_v1 }
 0x7bc   :  { %2253 = vmatpush.msrb.mxu0 %v4745_v3  ;;  %2273 = vmatpush.msrb.mxu1 %v4748_v18 }
 0x7bd   :  { %2293 = vmatpush.msrb.mxu2 %v4751_v14  ;;  %2313 = vmatpush.msrb.mxu3 %v4754_v15 }
 0x7be   :  { %2254 = vmatpush.msrb.mxu0 %v4757_v19  ;;  %2274 = vmatpush.msrb.mxu1 %v4760_v56 }
 0x7bf   :  { %2294 = vmatpush.msrb.mxu2 %v4763_v60  ;;  %2314 = vmatpush.msrb.mxu3 %v4766_v52 }
 0x7c0   :  { %2255 = vmatpush.msrb.mxu0 %v4769_v28  ;;  %2275 = vmatpush.msrb.mxu1 %v4772_v29 }
 0x7c1   :  { %2295 = vmatpush.msrb.mxu2 %v4775_v34  ;;  %2315 = vmatpush.msrb.mxu3 %v4778_v35 }
 0x7c2   :  { %2256 = vmatpush.msrb.mxu0 %v4781_v55  ;;  %2276 = vmatpush.msrb.mxu1 %v4784_v42 }
 0x7c3   :  { %2296 = vmatpush.msrb.mxu2 %v4787_v58  ;;  %2316 = vmatpush.msrb.mxu3 %v4790_v44 }
 0x7c4   :  { %2257 = vmatpush.msrb.mxu0 %v4793_v47  ;;  %2277 = vmatpush.msrb.mxu1 %v4796_v48 }
 0x7c5   :  { %2297 = vmatpush.msrb.mxu2 %v4799_v61  ;;  %2317 = vmatpush.msrb.mxu3 %v4802_v16 }
 0x7c6   :  { %2258 = vmatpush.msrb.mxu0 %v4805_v49  ;;  %2278 = vmatpush.msrb.mxu1 %v4808_v51 }
 0x7c7   :  { %2298 = vmatpush.msrb.mxu2 %v4811_v62  ;;  %2318 = vmatpush.msrb.mxu3 %v4814_v54 }
 0x7c8   :  { %2259 = vmatpush.msrb.mxu0 %v4817_v31  ;;  %2279 = vmatpush.msrb.mxu1 %v4820_v0 }
 0x7c9   :  { %2299 = vmatpush.msrb.mxu2 %v4823_v63  ;;  %2319 = vmatpush.msrb.mxu3 %v4826_v6 }
 0x7ca   :  { %2260 = vmatpush.msrb.mxu0 %v4829_v12  ;;  %2280 = vmatpush.msrb.mxu1 %v4832_v57 }
 0x7cb   :  { %2300 = vmatpush.msrb.mxu2 %v5729_v45  ;;  %2320 = vmatpush.msrb.mxu3 %v5730_v41 }
 0x7cc   :  { %2261 = vmatpush.msrb.mxu0 %v5731_v5  ;;  %2281 = vmatpush.msrb.mxu1 %v5732_v9  ;;  %v5756_v9 = vld [vmem:[#allocation49_spill] sm:$0xff] }
 0x7cd   :  { %2301 = vmatpush.msrb.mxu2 %v5733_v39  ;;  %2321 = vmatpush.msrb.mxu3 %v5734_v38  ;;  %v1497_v5 = vadd.f32 %v5756_v9, %v4532_v8 }
 0x7ce   :  { %2262 = vmatpush.msrb.mxu0 %v5735_v37  ;;  %2282 = vmatpush.msrb.mxu1 %v5736_v46  ;;  %v5754_v46 = vld [vmem:[#allocation35_spill] sm:$0xff] }
 0x7cf   :  { %2302 = vmatpush.msrb.mxu2 %v5737_v22  ;;  %2322 = vmatpush.msrb.mxu3 %v5738_v2  ;;  %v5748_v22 = vld [vmem:[#allocation18_spill] sm:$0xff]  ;;  %v5749_v2 = vld [vmem:[#allocation15_spill] sm:$0xff] }
 0x7d0   :  { %2263 = vmatpush.msrb.mxu0 %v5739_v7  ;;  %2283 = vmatpush.msrb.mxu1 %v5740_v17  ;;  %v4980_v7 = vld [vmem:[#allocation9 + $0x18] sm:$0xff] }
 0x7d1   :  { %2303 = vmatpush.msrb.mxu2 %v5741_v4  ;;  %2323 = vmatpush.msrb.mxu3 %v5742_v21  ;;  %5750 = vst [vmem:[#allocation17_spill] sm:$0xff] %v4980_v7  ;;  %v5751_v4 = vld [vmem:[#allocation39_spill] sm:$0xff]  ;;  %v5752_v21 = vld [vmem:[#allocation56_spill] sm:$0xff] }
 0x7d2   :  { %2264 = vmatpush.msrb.mxu0 %v5743_v36  ;;  %2284 = vmatpush.msrb.mxu1 %v5744_v26  ;;  %v1374_v17 = vadd.f32 %v5752_v21, %v5751_v4  ;;  %v5753_v36 = vld [vmem:[#allocation55_spill] sm:$0xff] }
 0x7d3   :  { %2304 = vmatpush.msrb.mxu2 %v5745_v30  ;;  %2324 = vmatpush.msrb.mxu3 %v5746_v11  ;;  %v1415_v26 = vadd.f32 %v5754_v46, %v5753_v36 }
 0x7d4   :  { %2265 = vmatpush.msrb.mxu0 %v5747_v40  ;;  %2285 = vmatpush.msrb.mxu1 %v5748_v22  ;;  %v5755_v22 = vld [vmem:[#allocation57_spill] sm:$0xff] }
 0x7d5   :  { %2305 = vmatpush.msrb.mxu2 %v5749_v2  ;;  %2325 = vmatpush.msrb.mxu3 %v4980_v7  ;;  %v1456_v2 = vadd.f32 %v5755_v22, %v5670_v32 }
 0x831   :  { %v2053_v37 = vpop.f32.mrf.mxu0  ;;  %v2073_v30 = vpop.f32.mrf.mxu1 }
 0x832   :  { %v2116_v38 = vadd.f32 %v2053_v37, %v1374_v17  ;;  %v2117_v11 = vadd.f32 %v2073_v30, %v1415_v26 }
 0x834   :  { %v2120_v39 = vmul.f32 0.5, %v2116_v38  ;;  %v2124_v40 = vmul.f32 0.5, %v2117_v11 }
 0x836   :  { %2707 = vtanh.f32 %v2120_v39 }
 0x837   :  { %2709 = vtanh.f32 %v2124_v40 }
 0x838   :  { %v2093_v7 = vpop.f32.mrf.mxu2  ;;  %v2113_v41 = vpop.f32.mrf.mxu3 }
 0x839   :  { %v2118_v21 = vadd.f32 %v2093_v7, %v1456_v2  ;;  %v2119_v4 = vadd.f32 %v2113_v41, %v1497_v5 }
 0x83b   :  { %2711 = vtanh.f32 %v2118_v21  ;;  %v2129_v46 = vmul.f32 0.5, %v2119_v4 }
 0x83c   :  { %v2708_v36 = vpop.eup %2707 }
 0x83d   :  { %v2710_v45 = vpop.eup %2709  ;;  %v2122_v37 = vmul.f32 0.5, %v2708_v36  ;;  %2713 = vtanh.f32 %v2129_v46 }
 0x83e   :  { %v2126_v17 = vmul.f32 0.5, %v2710_v45 }
 0x83f   :  { %v2123_v38 = vadd.f32 0.5, %v2122_v37 }
 0x840   :  { %v2127_v39 = vadd.f32 0.5, %v2126_v17 }
 0x841   :  { %v2712_v26 = vpop.eup %2711 }
 0x842   :  { %v2133_v22 = vmul.f32 %v2127_v39, %v4908_v50  ;;  %v2134_v30 = vmul.f32 %v2712_v26, %v2123_v38 }
 0x843   :  { %v2714_v11 = vpop.eup %2713 }
 0x844   :  { %v4992_v9 = vadd.f32 %v2134_v30, %v2133_v22  ;;  %v2131_v40 = vmul.f32 0.5, %v2714_v11 }
 0x846   :  { %2715 = vtanh.f32 %v4992_v9  ;;  %v2132_v41 = vadd.f32 0.5, %v2131_v40 }
 0x84c   :  { %v2716_v5 = vpop.eup %2715 }
 0x84d   :  { %v4995_v2 = vmul.f32 %v2716_v5, %v2132_v41  ;;  %v2482_v41 = vld [vmem:[%s5193_s7 + $0x70] sm:$0xff]  ;;  %v2481_v5 = vld [vmem:[%s5193_s7 + $0x68] sm:$0xff] }
 0x84f   :  { %2159 = vmatmul.f32.vlgmr.msra.gmra.mxu0 %v4995_v2  ;;  %2179 = vmatmul.f32.vlgmr.msra.gmra.mxu1 %v4995_v2 }
 0x850   :  { %2199 = vmatmul.f32.vlgmr.msra.gmra.mxu2 %v4995_v2  ;;  %2219 = vmatmul.f32.vlgmr.msra.gmra.mxu3 %v4995_v2 }
 0x851   :  { %2357 = vmatpush.msra.mxu0 %v4709_v53  ;;  %2377 = vmatpush.msra.mxu1 %v4712_v27  ;;  %v5757_v53 = vld [vmem:[#allocation64_spill] sm:$0xff] }
 0x852   :  { %2397 = vmatpush.msra.mxu2 %v4715_v23  ;;  %2417 = vmatpush.msra.mxu3 %v4718_v13  ;;  %v5758_v27 = vld [vmem:[#allocation32_spill] sm:$0xff]  ;;  %v5759_v23 = vld [vmem:[#allocation26_spill] sm:$0xff]  ;;  %v5760_v13 = vld [vmem:[#allocation41_spill] sm:$0xff] }
 0x853   :  { %2358 = vmatpush.msra.mxu0 %v4721_v33  ;;  %2378 = vmatpush.msra.mxu1 %v4724_v24  ;;  %v5761_v33 = vld [vmem:[#allocation62_spill] sm:$0xff]  ;;  %v5762_v24 = vld [vmem:[#allocation40_spill] sm:$0xff] }
 0x854   :  { %2398 = vmatpush.msra.mxu2 %v4727_v25  ;;  %2418 = vmatpush.msra.mxu3 %v4730_v43  ;;  %v5763_v25 = vld [vmem:[#allocation48_spill] sm:$0xff]  ;;  %v5764_v43 = vld [vmem:[#allocation43_spill] sm:$0xff] }
 0x855   :  { %2359 = vmatpush.msra.mxu0 %v4733_v59  ;;  %2379 = vmatpush.msra.mxu1 %v4736_v20  ;;  %v5765_v59 = vld [vmem:[#allocation34_spill] sm:$0xff]  ;;  %v5766_v20 = vld [vmem:[#allocation63_spill] sm:$0xff] }
 0x856   :  { %2399 = vmatpush.msra.mxu2 %v4739_v10  ;;  %2419 = vmatpush.msra.mxu3 %v4742_v1  ;;  %v5767_v10 = vld [vmem:[#allocation42_spill] sm:$0xff]  ;;  %v5768_v1 = vld [vmem:[#allocation51_spill] sm:$0xff] }
 0x857   :  { %2360 = vmatpush.msra.mxu0 %v4745_v3  ;;  %2380 = vmatpush.msra.mxu1 %v4748_v18  ;;  %v5769_v3 = vld [vmem:[#allocation31_spill] sm:$0xff]  ;;  %v5770_v18 = vld [vmem:[#allocation46_spill] sm:$0xff] }
 0x858   :  { %2400 = vmatpush.msra.mxu2 %v4751_v14  ;;  %2420 = vmatpush.msra.mxu3 %v4754_v15  ;;  %v5771_v14 = vld [vmem:[#allocation44_spill] sm:$0xff]  ;;  %v5772_v15 = vld [vmem:[#allocation54_spill] sm:$0xff] }
 0x859   :  { %2361 = vmatpush.msra.mxu0 %v4757_v19  ;;  %2381 = vmatpush.msra.mxu1 %v4760_v56  ;;  %v5773_v19 = vld [vmem:[#allocation25_spill] sm:$0xff] }
 0x85a   :  { %2401 = vmatpush.msra.mxu2 %v4763_v60  ;;  %2421 = vmatpush.msra.mxu3 %v4766_v52  ;;  %v5774_v56 = vld [vmem:[#allocation45_spill] sm:$0xff]  ;;  %v5775_v60 = vld [vmem:[#allocation28_spill] sm:$0xff]  ;;  %v5776_v52 = vld [vmem:[#allocation18_spill] sm:$0xff] }
 0x85b   :  { %2362 = vmatpush.msra.mxu0 %v4769_v28  ;;  %2382 = vmatpush.msra.mxu1 %v4772_v29  ;;  %v5777_v28 = vld [vmem:[#allocation15_spill] sm:$0xff]  ;;  %v5778_v29 = vld [vmem:[#allocation17_spill] sm:$0xff] }
 0x85c   :  { %2402 = vmatpush.msra.mxu2 %v4775_v34  ;;  %2422 = vmatpush.msra.mxu3 %v4778_v35  ;;  %v5779_v34 = vld [vmem:[#allocation39_spill] sm:$0xff] }
 0x85d   :  { %2363 = vmatpush.msra.mxu0 %v4781_v55  ;;  %2383 = vmatpush.msra.mxu1 %v4784_v42  ;;  %v5780_v35 = vld [vmem:[#allocation47_spill] sm:$0xff] }
 0x85e   :  { %2403 = vmatpush.msra.mxu2 %v4787_v58  ;;  %2423 = vmatpush.msra.mxu3 %v4790_v44  ;;  %v1377_v55 = vadd.f32 %v5780_v35, %v5779_v34  ;;  %v5781_v42 = vld [vmem:[#allocation55_spill] sm:$0xff]  ;;  %v5782_v58 = vld [vmem:[#allocation58_spill] sm:$0xff] }
 0x85f   :  { %2364 = vmatpush.msra.mxu0 %v4793_v47  ;;  %2384 = vmatpush.msra.mxu1 %v4796_v48  ;;  %v1418_v44 = vadd.f32 %v5782_v58, %v5781_v42  ;;  %v2468_v35 = vld [vmem:[%s5193_s7] sm:$0xff] }
 0x860   :  { %2404 = vmatpush.msra.mxu2 %v4799_v61  ;;  %2424 = vmatpush.msra.mxu3 %v4802_v16 }
 0x861   :  { %2365 = vmatpush.msra.mxu0 %v4805_v49  ;;  %2385 = vmatpush.msra.mxu1 %v4808_v51 }
 0x862   :  { %2405 = vmatpush.msra.mxu2 %v4811_v62  ;;  %2425 = vmatpush.msra.mxu3 %v4814_v54  ;;  %v5783_v62 = vld [vmem:[#allocation36_spill] sm:$0xff] }
 0x863   :  { %2366 = vmatpush.msra.mxu0 %v4817_v31  ;;  %2386 = vmatpush.msra.mxu1 %v4820_v0  ;;  %v1459_v54 = vadd.f32 %v5783_v62, %v5670_v32  ;;  %v5784_v31 = vld [vmem:[#allocation52_spill] sm:$0xff] }
 0x864   :  { %2406 = vmatpush.msra.mxu2 %v4823_v63  ;;  %2426 = vmatpush.msra.mxu3 %v4826_v6  ;;  %v1500_v0 = vadd.f32 %v5784_v31, %v4532_v8 }
 0x865   :  { %2367 = vmatpush.msra.mxu0 %v4829_v12  ;;  %2387 = vmatpush.msra.mxu1 %v4832_v57 }
 0x866   :  { %2407 = vmatpush.msra.mxu2 %v5757_v53  ;;  %2427 = vmatpush.msra.mxu3 %v5758_v27  ;;  %v2480_v53 = vld [vmem:[%s5193_s7 + $0x60] sm:$0xff]  ;;  %v2479_v27 = vld [vmem:[%s5193_s7 + $0x58] sm:$0xff] }
 0x867   :  { %2368 = vmatpush.msra.mxu0 %v5759_v23  ;;  %2388 = vmatpush.msra.mxu1 %v5760_v13  ;;  %v2478_v23 = vld [vmem:[%s5193_s7 + $0x50] sm:$0xff]  ;;  %v2477_v13 = vld [vmem:[%s5193_s7 + $0x48] sm:$0xff] }
 0x868   :  { %2408 = vmatpush.msra.mxu2 %v5761_v33  ;;  %2428 = vmatpush.msra.mxu3 %v5762_v24  ;;  %v2476_v33 = vld [vmem:[%s5193_s7 + $0x40] sm:$0xff]  ;;  %v2475_v24 = vld [vmem:[%s5193_s7 + $0x38] sm:$0xff] }
 0x869   :  { %2369 = vmatpush.msra.mxu0 %v5763_v25  ;;  %2389 = vmatpush.msra.mxu1 %v5764_v43  ;;  %v2474_v25 = vld [vmem:[%s5193_s7 + $0x30] sm:$0xff]  ;;  %v2473_v43 = vld [vmem:[%s5193_s7 + $0x28] sm:$0xff] }
 0x86a   :  { %2409 = vmatpush.msra.mxu2 %v5765_v59  ;;  %2429 = vmatpush.msra.mxu3 %v5766_v20  ;;  %v2472_v59 = vld [vmem:[%s5193_s7 + $0x20] sm:$0xff]  ;;  %v5785_v20 = vld [vmem:[#allocation50_spill] sm:$0xff] }
 0x86b   :  { %2370 = vmatpush.msra.mxu0 %v5767_v10  ;;  %2390 = vmatpush.msra.mxu1 %v5768_v1  ;;  %v1380_v10 = vadd.f32 %v5785_v20, %v5779_v34  ;;  %v5786_v1 = vld [vmem:[#allocation59_spill] sm:$0xff] }
 0x86c   :  { %2410 = vmatpush.msra.mxu2 %v5769_v3  ;;  %2430 = vmatpush.msra.mxu3 %v5770_v18  ;;  %v1421_v3 = vadd.f32 %v5786_v1, %v5781_v42  ;;  %v2471_v18 = vld [vmem:[%s5193_s7 + $0x18] sm:$0xff] }
 0x86d   :  { %2371 = vmatpush.msra.mxu0 %v5771_v14  ;;  %2391 = vmatpush.msra.mxu1 %v5772_v15  ;;  %v2470_v14 = vld [vmem:[%s5193_s7 + $0x10] sm:$0xff] }
 0x86e   :  { %2411 = vmatpush.msra.mxu2 %v5773_v19  ;;  %2431 = vmatpush.msra.mxu3 %v5774_v56 }
 0x86f   :  { %2372 = vmatpush.msra.mxu0 %v5775_v60  ;;  %2392 = vmatpush.msra.mxu1 %v5776_v52  ;;  %v2469_v52 = vld [vmem:[%s5193_s7 + $0x8] sm:$0xff] }
 0x870   :  { %2412 = vmatpush.msra.mxu2 %v5777_v28  ;;  %2432 = vmatpush.msra.mxu3 %v5778_v29 }
 0x8cc   :  { %v2160_v47 = vpop.f32.mrf.mxu0  ;;  %v2180_v48 = vpop.f32.mrf.mxu1 }
 0x8cd   :  { %v2223_v61 = vadd.f32 %v2160_v47, %v1377_v55  ;;  %v2224_v16 = vadd.f32 %v2180_v48, %v1418_v44  ;;  %v5787_v55 = vld [vmem:[#allocation61_spill] sm:$0xff]  ;;  %v5788_v44 = vld [vmem:[#allocation38_spill] sm:$0xff] }
 0x8ce   :  { %v1462_v58 = vadd.f32 %v5787_v55, %v5670_v32  ;;  %v1503_v47 = vadd.f32 %v5788_v44, %v4532_v8 }
 0x8cf   :  { %v2227_v49 = vmul.f32 0.5, %v2223_v61  ;;  %v2231_v51 = vmul.f32 0.5, %v2224_v16 }
 0x8d1   :  { %2717 = vtanh.f32 %v2227_v49 }
 0x8d2   :  { %2719 = vtanh.f32 %v2231_v51 }
 0x8d3   :  { %v2200_v63 = vpop.f32.mrf.mxu2  ;;  %v2220_v6 = vpop.f32.mrf.mxu3 }
 0x8d4   :  { %v2225_v12 = vadd.f32 %v2200_v63, %v1459_v54  ;;  %v2226_v57 = vadd.f32 %v2220_v6, %v1500_v0 }
 0x8d6   :  { %2721 = vtanh.f32 %v2225_v12  ;;  %v2236_v50 = vmul.f32 0.5, %v2226_v57 }
 0x8d7   :  { %v2718_v45 = vpop.eup %2717 }
 0x8d8   :  { %v2720_v7 = vpop.eup %2719  ;;  %v2229_v4 = vmul.f32 0.5, %v2718_v45  ;;  %2723 = vtanh.f32 %v2236_v50 }
 0x8d9   :  { %v2233_v36 = vmul.f32 0.5, %v2720_v7 }
 0x8da   :  { %v2230_v21 = vadd.f32 0.5, %v2229_v4 }
 0x8db   :  { %v2234_v46 = vadd.f32 0.5, %v2233_v36 }
 0x8dc   :  { %v2722_v37 = vpop.eup %2721 }
 0x8dd   :  { %v2240_v17 = vmul.f32 %v2234_v46, %v4992_v9  ;;  %v2241_v38 = vmul.f32 %v2722_v37, %v2230_v21  ;;  %v2483_v9 = vld [vmem:[%s5193_s7 + $0x78] sm:$0xff]  ;;  %v5789_v37 = vld [vmem:[#allocation65_spill] sm:$0xff] }
 0x8de   :  { %v2724_v39 = vpop.eup %2723 }
 0x8df   :  { %v5074_v26 = vadd.f32 %v2241_v38, %v2240_v17  ;;  %v2238_v22 = vmul.f32 0.5, %v2724_v39  ;;  %v5790_v17 = vld [vmem:[#allocation20_spill] sm:$0xff]  ;;  %v5791_v38 = vld [vmem:[#allocation13_spill] sm:$0xff] }
 0x8e0   :  { %v5792_v39 = vld [vmem:[#allocation12_spill] sm:$0xff] }
 0x8e1   :  { %2725 = vtanh.f32 %v5074_v26  ;;  %v2239_v30 = vadd.f32 0.5, %v2238_v22 }
 0x8e7   :  { %v2726_v11 = vpop.eup %2725 }
 0x8e8   :  { %v5077_v40 = vmul.f32 %v2726_v11, %v2239_v30  ;;  %v5794_v30 = vld [vmem:[#allocation21_spill] sm:$0xff] }
 0x8e9   :  { %v1424_v11 = vadd.f32 %v5794_v30, %v5781_v42 }
 0x8ea   :  { %2266 = vmatmul.f32.vlgmr.msrb.gmra.mxu0 %v5077_v40  ;;  %2286 = vmatmul.f32.vlgmr.msrb.gmra.mxu1 %v5077_v40 }
 0x8eb   :  { %2306 = vmatmul.f32.vlgmr.msrb.gmra.mxu2 %v5077_v40  ;;  %2326 = vmatmul.f32.vlgmr.msrb.gmra.mxu3 %v5077_v40 }
 0x8ec   :  { %2488 = vmatpush.msrb.mxu0 %v2483_v9 }
 0x8ee   :  { %2489 = vmatpush.msrb.mxu0 %v2482_v41 }
 0x8f0   :  { %2490 = vmatpush.msrb.mxu0 %v2481_v5 }
 0x8f2   :  { %2491 = vmatpush.msrb.mxu0 %v2480_v53 }
 0x8f4   :  { %2492 = vmatpush.msrb.mxu0 %v2479_v27 }
 0x8f6   :  { %2493 = vmatpush.msrb.mxu0 %v2478_v23 }
 0x8f8   :  { %2494 = vmatpush.msrb.mxu0 %v2477_v13  ;;  %v2586_v13 = vld [vmem:[#allocation4] ss:$0 sm:$0xff] }
 0x8fa   :  { %2495 = vmatpush.msrb.mxu0 %v2476_v33  ;;  %v5795_v33 = vld [vmem:[#allocation53_spill] sm:$0xff] }
 0x8fc   :  { %2496 = vmatpush.msrb.mxu0 %v2475_v24 }
 0x8fe   :  { %2497 = vmatpush.msrb.mxu0 %v2474_v25 }
 0x900   :  { %2498 = vmatpush.msrb.mxu0 %v2473_v43 }
 0x902   :  { %2499 = vmatpush.msrb.mxu0 %v2472_v59 }
 0x904   :  { %2500 = vmatpush.msrb.mxu0 %v2471_v18 }
 0x906   :  { %2501 = vmatpush.msrb.mxu0 %v2470_v14 }
 0x908   :  { %2502 = vmatpush.msrb.mxu0 %v2469_v52 }
 0x90a   :  { %2503 = vmatpush.msrb.mxu0 %v2468_v35 }
 0x967   :  { %v2267_v15 = vpop.f32.mrf.mxu0  ;;  %v2287_v19 = vpop.f32.mrf.mxu1 }
 0x968   :  { %v2330_v56 = vadd.f32 %v2267_v15, %v1380_v10  ;;  %v2331_v60 = vadd.f32 %v2287_v19, %v1421_v3 }
 0x96a   :  { %v2334_v28 = vmul.f32 0.5, %v2330_v56  ;;  %v2338_v29 = vmul.f32 0.5, %v2331_v60 }
 0x96c   :  { %2727 = vtanh.f32 %v2334_v28 }
 0x96d   :  { %2729 = vtanh.f32 %v2338_v29 }
 0x96e   :  { %v2307_v48 = vpop.f32.mrf.mxu2  ;;  %v2327_v61 = vpop.f32.mrf.mxu3 }
 0x96f   :  { %v2332_v16 = vadd.f32 %v2307_v48, %v1462_v58  ;;  %v2333_v49 = vadd.f32 %v2327_v61, %v1503_v47 }
 0x971   :  { %2731 = vtanh.f32 %v2332_v16  ;;  %v2343_v51 = vmul.f32 0.5, %v2333_v49 }
 0x972   :  { %v2728_v62 = vpop.eup %2727 }
 0x973   :  { %v2730_v54 = vpop.eup %2729  ;;  %v2336_v31 = vmul.f32 0.5, %v2728_v62  ;;  %2733 = vtanh.f32 %v2343_v51 }
 0x974   :  { %v2340_v0 = vmul.f32 0.5, %v2730_v54 }
 0x975   :  { %v2337_v63 = vadd.f32 0.5, %v2336_v31 }
 0x976   :  { %v2341_v6 = vadd.f32 0.5, %v2340_v0 }
 0x977   :  { %v2732_v12 = vpop.eup %2731 }
 0x978   :  { %v2347_v57 = vmul.f32 %v2341_v6, %v5074_v26  ;;  %v2348_v50 = vmul.f32 %v2732_v12, %v2337_v63  ;;  %v5793_v26 = vld [vmem:[#allocation37_spill] sm:$0xff] }
 0x979   :  { %v2734_v45 = vpop.eup %2733  ;;  %v1383_v22 = vadd.f32 %v5793_v26, %v5779_v34 }
 0x97a   :  { %v2349_v7 = vadd.f32 %v2348_v50, %v2347_v57  ;;  %v2345_v4 = vmul.f32 0.5, %v2734_v45 }
 0x97c   :  { %2735 = vtanh.f32 %v2349_v7  ;;  %v2346_v36 = vadd.f32 0.5, %v2345_v4 }
 0x982   :  { %v2736_v21 = vpop.eup %2735 }
 0x983   :  { %v2351_v46 = vmul.f32 %v2736_v21, %v2346_v36 }
 0x985   :  { %2373 = vmatmul.f32.vlgmr.msra.gmra.mxu0 %v2351_v46  ;;  %2393 = vmatmul.f32.vlgmr.msra.gmra.mxu1 %v2351_v46 }
 0x986   :  { %2413 = vmatmul.f32.vlgmr.msra.gmra.mxu2 %v2351_v46  ;;  %2433 = vmatmul.f32.vlgmr.msra.gmra.mxu3 %v2351_v46 }
 0x98d   :  { %2504 = vmatmul.f32.vlgmr.msrb.gmra.mxu0 %v5789_v37 }
 0x995   :  { %2507 = vmatmul.f32.gmra.mxu0 %v5790_v17 }
 0x99d   :  { %2510 = vmatmul.f32.gmra.mxu0 %v5791_v38 }
 0x9a5   :  { %2513 = vmatmul.f32.gmra.mxu0 %v5792_v39 }
 0x9ad   :  { %2516 = vmatmul.f32.gmra.mxu0 %v4995_v2  ;;  %v1465_v2 = vadd.f32 %v5795_v33, %v5670_v32 }
 0x9b5   :  { %2519 = vmatmul.f32.gmra.mxu0 %v5077_v40  ;;  %v5796_v40 = vld [vmem:[#allocation60_spill] sm:$0xff] }
 0x9b6   :  { %v1506_v24 = vadd.f32 %v5796_v40, %v4532_v8 }
 0x9bd   :  { %2522 = vmatmul.f32.gmra.mxu0 %v2351_v46 }
 0xa02   :  { %v2374_v9 = vpop.f32.mrf.mxu0  ;;  %v2394_v41 = vpop.f32.mrf.mxu1 }
 0xa03   :  { %v2437_v5 = vadd.f32 %v2374_v9, %v1383_v22  ;;  %v2438_v53 = vadd.f32 %v2394_v41, %v1424_v11 }
 0xa05   :  { %v2441_v27 = vmul.f32 0.5, %v2437_v5  ;;  %v2445_v23 = vmul.f32 0.5, %v2438_v53 }
 0xa07   :  { %2737 = vtanh.f32 %v2441_v27 }
 0xa08   :  { %2739 = vtanh.f32 %v2445_v23 }
 0xa09   :  { %v2414_v25 = vpop.f32.mrf.mxu2  ;;  %v2434_v34 = vpop.f32.mrf.mxu3 }
 0xa0a   :  { %v2439_v43 = vadd.f32 %v2414_v25, %v1465_v2  ;;  %v2440_v59 = vadd.f32 %v2434_v34, %v1506_v24  ;;  %v2505_v42 = vpop.f32.mrf.mxu0 }
 0xa0b   :  { %v2506_v20 = vadd.f32 %v2586_v13, %v2505_v42 }
 0xa0c   :  { %2741 = vtanh.f32 %v2439_v43  ;;  %v2450_v10 = vmul.f32 0.5, %v2440_v59 }
 0xa0d   :  { %v2738_v1 = vpop.eup %2737  ;;  %2530 = vst.msk [vmem:[%s5195_s9] sm:$0xff] %vm2529_vm1, %v2506_v20 }
 0xa0e   :  { %v2740_v32 = vpop.eup %2739  ;;  %v2443_v3 = vmul.f32 0.5, %v2738_v1  ;;  %2743 = vtanh.f32 %v2450_v10 }
 0xa0f   :  { %v2447_v18 = vmul.f32 0.5, %v2740_v32 }
 0xa10   :  { %v2444_v8 = vadd.f32 0.5, %v2443_v3 }
 0xa11   :  { %v2448_v14 = vadd.f32 0.5, %v2447_v18 }
 0xa12   :  { %v2742_v15 = vpop.eup %2741  ;;  %v2508_v19 = vpop.f32.mrf.mxu0 }
 0xa13   :  { %v2454_v56 = vmul.f32 %v2448_v14, %v2349_v7  ;;  %v2455_v60 = vmul.f32 %v2742_v15, %v2444_v8  ;;  %v2509_v52 = vadd.f32 %v2586_v13, %v2508_v19 }
 0xa14   :  { %v2744_v28 = vpop.eup %2743 }
 0xa15   :  { %v2456_v29 = vadd.f32 %v2455_v60, %v2454_v56  ;;  %2531 = vst.msk [vmem:[%s5195_s9 + $0x8] sm:$0xff] %vm2529_vm1, %v2509_v52  ;;  %v2452_v35 = vmul.f32 0.5, %v2744_v28 }
 0xa17   :  { %2745 = vtanh.f32 %v2456_v29  ;;  %v2453_v44 = vadd.f32 0.5, %v2452_v35 }
 0xa1a   :  { %v2511_v55 = vpop.f32.mrf.mxu0 }
 0xa1b   :  { %v2512_v58 = vadd.f32 %v2586_v13, %v2511_v55 }
 0xa1d   :  { %v2746_v47 = vpop.eup %2745  ;;  %2532 = vst.msk [vmem:[%s5195_s9 + $0x10] sm:$0xff] %vm2529_vm1, %v2512_v58 }
 0xa1e   :  { %v2458_v48 = vmul.f32 %v2746_v47, %v2453_v44 }
 0xa20   :  { %2525 = vmatmul.f32.gmra.mxu0 %v2458_v48 }
 0xa22   :  { %v2514_v61 = vpop.f32.mrf.mxu0 }
 0xa23   :  { %v2515_v16 = vadd.f32 %v2586_v13, %v2514_v61 }
 0xa25   :  { %2533 = vst.msk [vmem:[%s5195_s9 + $0x18] sm:$0xff] %vm2529_vm1, %v2515_v16 }
 0xa2a   :  { %v2517_v49 = vpop.f32.mrf.mxu0 }
 0xa2b   :  { %v2518_v51 = vadd.f32 %v2586_v13, %v2517_v49 }
 0xa2d   :  { %2534 = vst.msk [vmem:[%s5195_s9 + $0x20] sm:$0xff] %vm2529_vm1, %v2518_v51 }
 0xa32   :  { %v2520_v62 = vpop.f32.mrf.mxu0 }
 0xa33   :  { %v2521_v54 = vadd.f32 %v2586_v13, %v2520_v62 }
 0xa35   :  { %2535 = vst.msk [vmem:[%s5195_s9 + $0x28] sm:$0xff] %vm2529_vm1, %v2521_v54 }
 0xa3a   :  { %v2523_v31 = vpop.f32.mrf.mxu0 }
 0xa3b   :  { %v2524_v0 = vadd.f32 %v2586_v13, %v2523_v31 }
 0xa3d   :  { %2536 = vst.msk [vmem:[%s5195_s9 + $0x30] sm:$0xff] %vm2529_vm1, %v2524_v0 }
 0xa9d   :  { %v2526_v63 = vpop.f32.mrf.mxu0 }
 0xa9e   :  { %v2527_v6 = vadd.f32 %v2586_v13, %v2526_v63 }
 0xaa0   :  { %2537 = vst.msk [vmem:[%s5195_s9 + $0x38] sm:$0xff] %vm2529_vm1, %v2527_v6 }
 0xaa1   :  { %2542 = vsyncpa [#allocation6], 1 }
 0xaa2   :  { %2543 = vsyncpa [#allocation8], 1 }

</bundles_post_ra>
